<compile_context>
chip_gen: v7x
topology: tpu7x:2x2x1
jax: 0.10.0
libtpu: 0.0.40
codegen_flags: <defaults>
</compile_context>

<pallas_src>
import functools
import math

import jax
import jax.numpy as jnp
from jax import lax
from jax.experimental import pallas as pl
from jax.experimental.pallas import tpu as pltpu

_VMEM_LIMIT = 64 * 1024 * 1024  # valid on v5e / v6e / v7x


# -----------------------------------------------------------------------------
# In-kernel helpers
# -----------------------------------------------------------------------------
def _layernorm(h, g, b, eps):
    mu = jnp.mean(h, axis=-1, keepdims=True)
    c = h - mu
    var = jnp.mean(c * c, axis=-1, keepdims=True)
    return c * lax.rsqrt(var + eps) * g + b


def _mha_heads(q, k, v, attn_ref, num_heads):
    """Multi-head scaled-dot-product attention on [S, D] slices.

    Each head's [S, dh] output is written into its lane slice of the bf16 VMEM
    scratch `attn_ref` (no lane-dim concatenate); the caller does the single
    full-K out-projection matmul from the scratch.
    """
    S, D = q.shape
    dh = D // num_heads
    scale = 1.0 / math.sqrt(dh)
    # TODO(synk): head-batched [H,S,dh] contraction would fill more MXU lanes;
    # kept as a short unrolled loop to avoid small-shape relayout lowering.
    for h in range(num_heads):
        sl = slice(h * dh, (h + 1) * dh)
        qh = q[:, sl].astype(jnp.bfloat16)
        kh = k[:, sl].astype(jnp.bfloat16)
        vh = v[:, sl].astype(jnp.bfloat16)
        # Contract last axes directly (no explicit transpose of k).
        s = lax.dot_general(qh, kh, (((1,), (1,)), ((), ())),
                            preferred_element_type=jnp.float32) * scale
        s = s - jnp.max(s, axis=-1, keepdims=True)
        p = jnp.exp(s)
        # approx reciprocal runs on the EUP slot; ~1e-3 rel. error vs exact div.
        p = p * pl.reciprocal(jnp.sum(p, axis=-1, keepdims=True), approx=True)
        oh = jnp.dot(p.astype(jnp.bfloat16), vh, preferred_element_type=jnp.float32)
        attn_ref[:, sl] = oh.astype(jnp.bfloat16)


# misc packed rows for the encoder layer: [ln1_g, ln1_b, ln2_g, ln2_b, bo, b1, b2, 0]
_LN1G, _LN1B, _LN2G, _LN2B, _BO, _B1, _B2 = range(7)


# -----------------------------------------------------------------------------
# Fused encoder-layer kernel: grid=(modality, batch), both encoder stacks merged
# -----------------------------------------------------------------------------
def _encoder_layer_kernel(x_ref, wqkv_ref, bqkv_ref, wo_ref, w1_ref, w2_ref,
                          misc_ref, o_ref, attn_ref, *, num_heads, eps):
    x = x_ref[0, 0]                                   # [S, D] f32
    D = x.shape[-1]
    misc = misc_ref[0]                                # [8, D] f32 packed vectors

    ln1_g, ln1_b = misc[_LN1G:_LN1G + 1], misc[_LN1B:_LN1B + 1]
    ln2_g, ln2_b = misc[_LN2G:_LN2G + 1], misc[_LN2B:_LN2B + 1]
    bo, b1, b2 = misc[_BO:_BO + 1], misc[_B1:_B1 + 1], misc[_B2:_B2 + 1]

    # Fused Q/K/V projection: one bf16 [D, 3D] matmul, f32 accumulation.
    xb = x.astype(jnp.bfloat16)
    qkv = jnp.dot(xb, wqkv_ref[0], preferred_element_type=jnp.float32) + bqkv_ref[0]
    q, k, v = qkv[:, :D], qkv[:, D:2 * D], qkv[:, 2 * D:]

    _mha_heads(q, k, v, attn_ref, num_heads)
    sa = jnp.dot(attn_ref[...], wo_ref[0], preferred_element_type=jnp.float32) + bo

    # TODO(synk): dropout (p=0.1) is identity here (eval-mode forward).
    h1 = _layernorm(x + sa, ln1_g, ln1_b, eps)

    # Fused FFN: linear1 + relu + linear2 kept in VMEM, bf16 matmuls.
    ff = jnp.maximum(
        jnp.dot(h1.astype(jnp.bfloat16), w1_ref[0],
                preferred_element_type=jnp.float32) + b1, 0.0)
    ff = jnp.dot(ff.astype(jnp.bfloat16), w2_ref[0],
                 preferred_element_type=jnp.float32) + b2

    o_ref[0, 0] = _layernorm(h1 + ff, ln2_g, ln2_b, eps)


def encoder_layer_stacked(x2, lp, num_heads, eps=1e-5):
    """Runs one encoder depth for BOTH modalities. x2: [2, B, S, D]."""
    M, B, S, D = x2.shape
    dff = lp["w1"].shape[-1]
    x_spec = pl.BlockSpec((1, 1, S, D), lambda m, b: (m, b, 0, 0))
    w_specs = [
        pl.BlockSpec((1, D, 3 * D), lambda m, b: (m, 0, 0)),   # wqkv (bf16)
        pl.BlockSpec((1, 1, 3 * D), lambda m, b: (m, 0, 0)),   # bqkv (f32)
        pl.BlockSpec((1, D, D),     lambda m, b: (m, 0, 0)),   # wo   (bf16)
        pl.BlockSpec((1, D, dff),   lambda m, b: (m, 0, 0)),   # w1   (bf16)
        pl.BlockSpec((1, dff, D),   lambda m, b: (m, 0, 0)),   # w2   (bf16)
        pl.BlockSpec((1, 8, D),     lambda m, b: (m, 0, 0)),   # packed ln/bias (f32)
    ]
    kernel = functools.partial(_encoder_layer_kernel, num_heads=num_heads, eps=eps)
    return pl.pallas_call(
        kernel,
        grid=(M, B),
        in_specs=[x_spec] + w_specs,
        out_specs=x_spec,
        out_shape=jax.ShapeDtypeStruct((M, B, S, D), jnp.float32),
        scratch_shapes=[pltpu.VMEM((S, D), jnp.bfloat16)],
        compiler_params=pltpu.CompilerParams(
            dimension_semantics=("parallel", "parallel"),
            vmem_limit_bytes=_VMEM_LIMIT),
    )(x2, lp["wqkv"], lp["bqkv"], lp["wo"], lp["w1"], lp["w2"], lp["misc"])


# -----------------------------------------------------------------------------
# Fused cross-modal stage kernel (pre-composed projections + 3 cross-MHAs)
# -----------------------------------------------------------------------------
def _cross_stage_kernel(v_ref, a_ref, wv3_ref, wa3_ref, wfv_ref, wfa_ref, b3_ref,
                        wo_av_ref, wo_va_ref, bo_ref, o_ref, attn_ref, *, num_heads):
    ve = v_ref[0]                                     # [S, D] f32
    ae = a_ref[0]
    D = ve.shape[-1]
    veb = ve.astype(jnp.bfloat16)
    aeb = ae.astype(jnp.bfloat16)
    b3 = b3_ref[...]                                  # [3, 3D] f32
    bo = bo_ref[...]                                  # [2, D]  f32

    # Batched composed projections (transform ∘ attention-in-proj already fused
    # into the weights at param-prep time).
    pv = jnp.dot(veb, wv3_ref[...], preferred_element_type=jnp.float32) + b3[0:1]
    pa = jnp.dot(aeb, wa3_ref[...], preferred_element_type=jnp.float32) + b3[1:2]
    # Fused-concat path without materializing cat([v, a]): split-K matmul.
    pf = (jnp.dot(veb, wfv_ref[...], preferred_element_type=jnp.float32)
          + jnp.dot(aeb, wfa_ref[...], preferred_element_type=jnp.float32) + b3[2:3])

    k_av, v_av, q_va = pv[:, :D], pv[:, D:2 * D], pv[:, 2 * D:]
    q_av, k_va, v_va = pa[:, :D], pa[:, D:2 * D], pa[:, 2 * D:]
    q_f, k_f, v_f = pf[:, :D], pf[:, D:2 * D], pf[:, 2 * D:]

    # fav = cross_av(q_a, k_a, v_a)  -> lane slice [0:D]  of the output block
    _mha_heads(q_av, k_av, v_av, attn_ref, num_heads)
    o_ref[0, :, 0:D] = (jnp.dot(attn_ref[...], wo_av_ref[...],
                                preferred_element_type=jnp.float32) + bo[0:1])
    # fva = cross_va(q_v, k_v, v_v)  -> lane slice [D:2D]
    _mha_heads(q_va, k_va, v_va, attn_ref, num_heads)
    o_ref[0, :, D:2 * D] = (jnp.dot(attn_ref[...], wo_va_ref[...],
                                    preferred_element_type=jnp.float32) + bo[1:2])
    # f_a_v reuses cross_va (as in the PyTorch module) -> lane slice [2D:3D]
    _mha_heads(q_f, k_f, v_f, attn_ref, num_heads)
    o_ref[0, :, 2 * D:3 * D] = (jnp.dot(attn_ref[...], wo_va_ref[...],
                                        preferred_element_type=jnp.float32) + bo[1:2])


def cross_stage(v_enc, a_enc, cp, num_heads):
    B, S, D = v_enc.shape
    x_spec = pl.BlockSpec((1, S, D), lambda b: (b, 0, 0))
    o_spec = pl.BlockSpec((1, S, 3 * D), lambda b: (b, 0, 0))

    def const(shape):
        return pl.BlockSpec(shape, lambda b: (0,) * len(shape))

    kernel = functools.partial(_cross_stage_kernel, num_heads=num_heads)
    return pl.pallas_call(
        kernel,
        grid=(B,),
        in_specs=[x_spec, x_spec,
                  const((D, 3 * D)), const((D, 3 * D)),
                  const((D, 3 * D)), const((D, 3 * D)),
                  const((3, 3 * D)),
                  const((D, D)), const((D, D)),
                  const((2, D))],
        out_specs=o_spec,
        out_shape=jax.ShapeDtypeStruct((B, S, 3 * D), jnp.float32),
        scratch_shapes=[pltpu.VMEM((S, D), jnp.bfloat16)],
        compiler_params=pltpu.CompilerParams(
            dimension_semantics=("parallel",),
            vmem_limit_bytes=_VMEM_LIMIT),
    )(v_enc, a_enc, cp["W_v3"], cp["W_a3"], cp["Wf_v"], cp["Wf_a"], cp["b3"],
      cp["wo_av"], cp["wo_va"], cp["bo"])


# -----------------------------------------------------------------------------
# Full forward
# -----------------------------------------------------------------------------
def mutual_transformer_forward(v, a, params, num_heads=4):
    x2 = jnp.stack([v, a], axis=0)                    # [2, B, S, D]
    for lp in params["enc_layers"]:
        x2 = encoder_layer_stacked(x2, lp, num_heads)
    v_enc, a_enc = x2[0], x2[1]
    return cross_stage(v_enc, a_enc, params["cross"], num_heads)   # [B, S, 3D]


# -----------------------------------------------------------------------------
# Deterministic parameter initialization + param prep.
# Weights are stored [din, dout] (transposed PyTorch convention); matmul
# weights are cast to bf16, bias / LayerNorm vectors stay f32.
# -----------------------------------------------------------------------------
def _rand_linear(key, din, dout, w_scale=0.05, b_scale=0.01):
    kw, kb = jax.random.split(key)
    w = jax.random.normal(kw, (din, dout), jnp.float32) * w_scale
    b = jax.random.normal(kb, (1, dout), jnp.float32) * b_scale
    return w, b


def _init_mha(key, d):
    ks = jax.random.split(key, 4)
    wq, bq = _rand_linear(ks[0], d, d)
    wk, bk = _rand_linear(ks[1], d, d)
    wv, bv = _rand_linear(ks[2], d, d)
    wo, bo = _rand_linear(ks[3], d, d)
    return dict(wq=wq, bq=bq, wk=wk, bk=bk, wv=wv, bv=bv, wo=wo, bo=bo)


def _init_encoder_layer(key, d, dff):
    assert dff == d, "bias packing assumes dim_feedforward == d_model (as in the module)"
    ks = jax.random.split(key, 4)
    wqkv, bqkv = _rand_linear(ks[0], d, 3 * d)        # fused in-proj
    wo, bo = _rand_linear(ks[1], d, d)
    w1, b1 = _rand_linear(ks[2], d, dff)
    w2, b2 = _rand_linear(ks[3], dff, d)
    misc = jnp.concatenate([jnp.ones((1, d), jnp.float32),   # ln1_g
                            jnp.zeros((1, d), jnp.float32),  # ln1_b
                            jnp.ones((1, d), jnp.float32),   # ln2_g
                            jnp.zeros((1, d), jnp.float32),  # ln2_b
                            bo, b1, b2,
                            jnp.zeros((1, d), jnp.float32)], axis=0)   # [8, d]
    return dict(wqkv=wqkv.astype(jnp.bfloat16), bqkv=bqkv,
                wo=wo.astype(jnp.bfloat16), w1=w1.astype(jnp.bfloat16),
                w2=w2.astype(jnp.bfloat16), misc=misc)


def _prepare_cross(d, transforms, cross_av, cross_va):
    """Pre-compose the nine transform linears with the cross-attention in-proj."""
    def comp(name, mha, proj):
        wt, bt = transforms[name]
        win, bin_ = mha["w" + proj], mha["b" + proj]
        return jnp.dot(wt, win), jnp.dot(bt, win) + bin_

    k_av = comp("ka", cross_av, "k")
    v_av = comp("va", cross_av, "v")
    q_va = comp("qv", cross_va, "q")
    q_av = comp("qa", cross_av, "q")
    k_va = comp("kv", cross_va, "k")
    v_va = comp("vv", cross_va, "v")
    q_f = comp("qf", cross_va, "q")
    k_f = comp("kf", cross_va, "k")
    v_f = comp("vf", cross_va, "v")

    W_v3 = jnp.concatenate([k_av[0], v_av[0], q_va[0]], axis=1).astype(jnp.bfloat16)
    W_a3 = jnp.concatenate([q_av[0], k_va[0], v_va[0]], axis=1).astype(jnp.bfloat16)
    Wf = jnp.concatenate([q_f[0], k_f[0], v_f[0]], axis=1)              # [2d, 3d]
    b3 = jnp.concatenate([
        jnp.concatenate([k_av[1], v_av[1], q_va[1]], axis=1),
        jnp.concatenate([q_av[1], k_va[1], v_va[1]], axis=1),
        jnp.concatenate([q_f[1], k_f[1], v_f[1]], axis=1)], axis=0)     # [3, 3d]
    bo = jnp.concatenate([cross_av["bo"], cross_va["bo"]], axis=0)      # [2, d]
    return dict(W_v3=W_v3, W_a3=W_a3,
                Wf_v=Wf[:d].astype(jnp.bfloat16),
                Wf_a=Wf[d:].astype(jnp.bfloat16),
                b3=b3.astype(jnp.float32), bo=bo.astype(jnp.float32),
                wo_av=cross_av["wo"].astype(jnp.bfloat16),
                wo_va=cross_va["wo"].astype(jnp.bfloat16))


def init_params(key, d, f_d, l):
    assert f_d == 2 * d, "fused dim must be 2*d for the forward to be well-formed"
    ks = jax.random.split(key, 2 * l + 11)
    it = iter(ks)
    v_layers = [_init_encoder_layer(next(it), d, d) for _ in range(l)]
    a_layers = [_init_encoder_layer(next(it), d, d) for _ in range(l)]
    enc_layers = [jax.tree_util.tree_map(lambda x, y: jnp.stack([x, y], axis=0), vl, al)
                  for vl, al in zip(v_layers, a_layers)]
    transforms = {
        "qa": _rand_linear(next(it), d, d), "ka": _rand_linear(next(it), d, d),
        "va": _rand_linear(next(it), d, d), "qv": _rand_linear(next(it), d, d),
        "kv": _rand_linear(next(it), d, d), "vv": _rand_linear(next(it), d, d),
        "qf": _rand_linear(next(it), f_d, d), "kf": _rand_linear(next(it), f_d, d),
        "vf": _rand_linear(next(it), f_d, d),
    }
    cross_av = _init_mha(next(it), d)
    cross_va = _init_mha(next(it), d)
    cross = _prepare_cross(d, transforms, cross_av, cross_va)
    return {"enc_layers": enc_layers, "cross": cross}


# -----------------------------------------------------------------------------
if __name__ == "__main__":
    # Small, lane-aligned demo shapes (d_model multiple of 128, seq multiple of 8).
    B, S, D = 2, 8, 128         # batch, seq, d_model
    F_D = 2 * D                 # fused dim
    L = 2                       # number of encoder layers (small for the demo)
    NUM_HEADS = 4

    key = jax.random.PRNGKey(0)
    k_v, k_a, k_p = jax.random.split(key, 3)
    v_in = jax.random.normal(k_v, (B, S, D), jnp.float32)
    a_in = jax.random.normal(k_a, (B, S, D), jnp.float32)
    params = init_params(k_p, D, F_D, L)

    fwd = jax.jit(functools.partial(mutual_transformer_forward, num_heads=NUM_HEADS))
    out = jax.block_until_ready(fwd(v_in, a_in, params))

    assert out.shape == (B, S, 3 * D), out.shape
    assert bool(jnp.all(jnp.isfinite(out)))
    print("KERNEL_OK")
</pallas_src>

<mosaic_0001>
module attributes {stable_mosaic.version = 11 : i64} {
  func.func @_encoder_layer_kernel(%arg0: i32, %arg1: i32, %arg2: memref<1x1x8x128xf32, #tpu.memory_space<vmem>>, %arg3: memref<1x128x384xbf16, #tpu.memory_space<vmem>>, %arg4: memref<1x1x384xf32, #tpu.memory_space<vmem>>, %arg5: memref<1x128x128xbf16, #tpu.memory_space<vmem>>, %arg6: memref<1x128x128xbf16, #tpu.memory_space<vmem>>, %arg7: memref<1x128x128xbf16, #tpu.memory_space<vmem>>, %arg8: memref<1x8x128xf32, #tpu.memory_space<vmem>>, %arg9: memref<1x1x8x128xf32, #tpu.memory_space<vmem>>, %arg10: memref<8x128xbf16, #tpu.memory_space<vmem>>) attributes {dimension_semantics = [#tpu.dimension_semantics<parallel>, #tpu.dimension_semantics<parallel>], iteration_bounds = array<i64: 2, 2>, scalar_prefetch = 0 : i64, scratch_operands = 1 : i64, tpu.core_type = #tpu.core_type<tc>, window_params = [{transform_indices = @transform_0, window_bounds = array<i64: 1, 1, 8, 128>}, {transform_indices = @transform_1, window_bounds = array<i64: 1, 128, 384>}, {transform_indices = @transform_2, window_bounds = array<i64: 1, 1, 384>}, {transform_indices = @transform_3, window_bounds = array<i64: 1, 128, 128>}, {transform_indices = @transform_4, window_bounds = array<i64: 1, 128, 128>}, {transform_indices = @transform_5, window_bounds = array<i64: 1, 128, 128>}, {transform_indices = @transform_6, window_bounds = array<i64: 1, 8, 128>}, {transform_indices = @transform_7, window_bounds = array<i64: 1, 1, 8, 128>}]} {
    %c0 = arith.constant 0 : index
    %c0_0 = arith.constant 0 : index
    %c0_1 = arith.constant 0 : index
    %c0_2 = arith.constant 0 : index
    %0 = vector.load %arg2[%c0, %c0_0, %c0_1, %c0_2] : memref<1x1x8x128xf32, #tpu.memory_space<vmem>>, vector<1x1x8x128xf32>
    %1 = vector.shape_cast %0 : vector<1x1x8x128xf32> to vector<8x128xf32>
    %c0_3 = arith.constant 0 : index
    %c0_4 = arith.constant 0 : index
    %c0_5 = arith.constant 0 : index
    %2 = vector.load %arg8[%c0_3, %c0_4, %c0_5] : memref<1x8x128xf32, #tpu.memory_space<vmem>>, vector<1x8x128xf32>
    %3 = vector.shape_cast %2 : vector<1x8x128xf32> to vector<8x128xf32>
    %4 = vector.extract_strided_slice %3 {offsets = [0, 0], sizes = [1, 128], strides = [1, 1]} : vector<8x128xf32> to vector<1x128xf32>
    %5 = vector.extract_strided_slice %3 {offsets = [1, 0], sizes = [1, 128], strides = [1, 1]} : vector<8x128xf32> to vector<1x128xf32>
    %6 = vector.extract_strided_slice %3 {offsets = [2, 0], sizes = [1, 128], strides = [1, 1]} : vector<8x128xf32> to vector<1x128xf32>
    %7 = vector.extract_strided_slice %3 {offsets = [3, 0], sizes = [1, 128], strides = [1, 1]} : vector<8x128xf32> to vector<1x128xf32>
    %8 = vector.extract_strided_slice %3 {offsets = [4, 0], sizes = [1, 128], strides = [1, 1]} : vector<8x128xf32> to vector<1x128xf32>
    %9 = vector.extract_strided_slice %3 {offsets = [5, 0], sizes = [1, 128], strides = [1, 1]} : vector<8x128xf32> to vector<1x128xf32>
    %10 = vector.extract_strided_slice %3 {offsets = [6, 0], sizes = [1, 128], strides = [1, 1]} : vector<8x128xf32> to vector<1x128xf32>
    %11 = arith.truncf %1 : vector<8x128xf32> to vector<8x128xbf16>
    %c0_6 = arith.constant 0 : index
    %c0_7 = arith.constant 0 : index
    %c0_8 = arith.constant 0 : index
    %12 = vector.load %arg3[%c0_6, %c0_7, %c0_8] : memref<1x128x384xbf16, #tpu.memory_space<vmem>>, vector<1x128x384xbf16>
    %13 = vector.shape_cast %12 : vector<1x128x384xbf16> to vector<128x384xbf16>
    %cst = arith.constant dense<0.000000e+00> : vector<8x384xf32>
    %14 = tpu.matmul %11, %13, %cst {dimension_numbers = #tpu.dot_dimension_numbers<[1], [0], [0], [1], [0, 0, 1, 1], [], []>} : vector<8x128xbf16>, vector<128x384xbf16>, vector<8x384xf32> -> vector<8x384xf32>
    %c0_9 = arith.constant 0 : index
    %c0_10 = arith.constant 0 : index
    %c0_11 = arith.constant 0 : index
    %15 = vector.load %arg4[%c0_9, %c0_10, %c0_11] : memref<1x1x384xf32, #tpu.memory_space<vmem>>, vector<1x1x384xf32>
    %16 = vector.shape_cast %15 : vector<1x1x384xf32> to vector<1x384xf32>
    %17 = vector.broadcast %16 : vector<1x384xf32> to vector<8x384xf32>
    %18 = arith.addf %14, %17 : vector<8x384xf32>
    %19 = vector.extract_strided_slice %18 {offsets = [0, 0], sizes = [8, 128], strides = [1, 1]} : vector<8x384xf32> to vector<8x128xf32>
    %20 = vector.extract_strided_slice %18 {offsets = [0, 128], sizes = [8, 128], strides = [1, 1]} : vector<8x384xf32> to vector<8x128xf32>
    %21 = vector.extract_strided_slice %18 {offsets = [0, 256], sizes = [8, 128], strides = [1, 1]} : vector<8x384xf32> to vector<8x128xf32>
    %22 = vector.extract_strided_slice %19 {offsets = [0, 0], sizes = [8, 32], strides = [1, 1]} : vector<8x128xf32> to vector<8x32xf32>
    %23 = arith.truncf %22 : vector<8x32xf32> to vector<8x32xbf16>
    %24 = vector.extract_strided_slice %20 {offsets = [0, 0], sizes = [8, 32], strides = [1, 1]} : vector<8x128xf32> to vector<8x32xf32>
    %25 = arith.truncf %24 : vector<8x32xf32> to vector<8x32xbf16>
    %26 = vector.extract_strided_slice %21 {offsets = [0, 0], sizes = [8, 32], strides = [1, 1]} : vector<8x128xf32> to vector<8x32xf32>
    %27 = arith.truncf %26 : vector<8x32xf32> to vector<8x32xbf16>
    %cst_12 = arith.constant dense<0.000000e+00> : vector<8x8xf32>
    %28 = tpu.matmul %23, %25, %cst_12 {dimension_numbers = #tpu.dot_dimension_numbers<[1], [1], [0], [0], [0, 0, 1, 0], [], []>} : vector<8x32xbf16>, vector<8x32xbf16>, vector<8x8xf32> -> vector<8x8xf32>
    %cst_13 = arith.constant 0.176776692 : f32
    %29 = vector.broadcast %cst_13 : f32 to vector<8x8xf32>
    %30 = arith.mulf %28, %29 : vector<8x8xf32>
    %cst_14 = arith.constant dense<0xFF800000> : vector<8xf32>
    %31 = vector.multi_reduction <maximumf>, %30, %cst_14 [1] : vector<8x8xf32> to vector<8xf32>
    %32 = vector.shape_cast %31 : vector<8xf32> to vector<8x1xf32>
    %33 = vector.broadcast %32 : vector<8x1xf32> to vector<8x8xf32>
    %34 = arith.subf %30, %33 : vector<8x8xf32>
    %35 = math.exp %34 : vector<8x8xf32>
    %cst_15 = arith.constant dense<0.000000e+00> : vector<8xf32>
    %36 = vector.multi_reduction <add>, %35, %cst_15 [1] : vector<8x8xf32> to vector<8xf32>
    %37 = vector.shape_cast %36 : vector<8xf32> to vector<8x1xf32>
    %38 = tpu.reciprocal %37 {approx = true} : vector<8x1xf32> -> vector<8x1xf32>
    %39 = vector.broadcast %38 : vector<8x1xf32> to vector<8x8xf32>
    %40 = arith.mulf %35, %39 : vector<8x8xf32>
    %41 = arith.truncf %40 : vector<8x8xf32> to vector<8x8xbf16>
    %cst_16 = arith.constant dense<0.000000e+00> : vector<8x32xf32>
    %42 = tpu.matmul %41, %27, %cst_16 {dimension_numbers = #tpu.dot_dimension_numbers<[1], [0], [0], [1], [0, 0, 1, 1], [], []>} : vector<8x8xbf16>, vector<8x32xbf16>, vector<8x32xf32> -> vector<8x32xf32>
    %43 = arith.truncf %42 : vector<8x32xf32> to vector<8x32xbf16>
    %c0_17 = arith.constant 0 : index
    %c0_18 = arith.constant 0 : index
    %44 = vector.load %arg10[%c0_17, %c0_18] : memref<8x128xbf16, #tpu.memory_space<vmem>>, vector<8x32xbf16>
    tpu.vector_store %arg10[%c0_17, %c0_18], %43 {strides = array<i32>} : memref<8x128xbf16, #tpu.memory_space<vmem>>, vector<8x32xbf16>,
    %45 = vector.extract_strided_slice %19 {offsets = [0, 32], sizes = [8, 32], strides = [1, 1]} : vector<8x128xf32> to vector<8x32xf32>
    %46 = arith.truncf %45 : vector<8x32xf32> to vector<8x32xbf16>
    %47 = vector.extract_strided_slice %20 {offsets = [0, 32], sizes = [8, 32], strides = [1, 1]} : vector<8x128xf32> to vector<8x32xf32>
    %48 = arith.truncf %47 : vector<8x32xf32> to vector<8x32xbf16>
    %49 = vector.extract_strided_slice %21 {offsets = [0, 32], sizes = [8, 32], strides = [1, 1]} : vector<8x128xf32> to vector<8x32xf32>
    %50 = arith.truncf %49 : vector<8x32xf32> to vector<8x32xbf16>
    %cst_19 = arith.constant dense<0.000000e+00> : vector<8x8xf32>
    %51 = tpu.matmul %46, %48, %cst_19 {dimension_numbers = #tpu.dot_dimension_numbers<[1], [1], [0], [0], [0, 0, 1, 0], [], []>} : vector<8x32xbf16>, vector<8x32xbf16>, vector<8x8xf32> -> vector<8x8xf32>
    %cst_20 = arith.constant 0.176776692 : f32
    %52 = vector.broadcast %cst_20 : f32 to vector<8x8xf32>
    %53 = arith.mulf %51, %52 : vector<8x8xf32>
    %cst_21 = arith.constant dense<0xFF800000> : vector<8xf32>
    %54 = vector.multi_reduction <maximumf>, %53, %cst_21 [1] : vector<8x8xf32> to vector<8xf32>
    %55 = vector.shape_cast %54 : vector<8xf32> to vector<8x1xf32>
    %56 = vector.broadcast %55 : vector<8x1xf32> to vector<8x8xf32>
    %57 = arith.subf %53, %56 : vector<8x8xf32>
    %58 = math.exp %57 : vector<8x8xf32>
    %cst_22 = arith.constant dense<0.000000e+00> : vector<8xf32>
    %59 = vector.multi_reduction <add>, %58, %cst_22 [1] : vector<8x8xf32> to vector<8xf32>
    %60 = vector.shape_cast %59 : vector<8xf32> to vector<8x1xf32>
    %61 = tpu.reciprocal %60 {approx = true} : vector<8x1xf32> -> vector<8x1xf32>
    %62 = vector.broadcast %61 : vector<8x1xf32> to vector<8x8xf32>
    %63 = arith.mulf %58, %62 : vector<8x8xf32>
    %64 = arith.truncf %63 : vector<8x8xf32> to vector<8x8xbf16>
    %cst_23 = arith.constant dense<0.000000e+00> : vector<8x32xf32>
    %65 = tpu.matmul %64, %50, %cst_23 {dimension_numbers = #tpu.dot_dimension_numbers<[1], [0], [0], [1], [0, 0, 1, 1], [], []>} : vector<8x8xbf16>, vector<8x32xbf16>, vector<8x32xf32> -> vector<8x32xf32>
    %66 = arith.truncf %65 : vector<8x32xf32> to vector<8x32xbf16>
    %c0_24 = arith.constant 0 : index
    %c32 = arith.constant 32 : index
    %67 = vector.load %arg10[%c0_24, %c32] : memref<8x128xbf16, #tpu.memory_space<vmem>>, vector<8x32xbf16>
    tpu.vector_store %arg10[%c0_24, %c32], %66 {strides = array<i32>} : memref<8x128xbf16, #tpu.memory_space<vmem>>, vector<8x32xbf16>,
    %68 = vector.extract_strided_slice %19 {offsets = [0, 64], sizes = [8, 32], strides = [1, 1]} : vector<8x128xf32> to vector<8x32xf32>
    %69 = arith.truncf %68 : vector<8x32xf32> to vector<8x32xbf16>
    %70 = vector.extract_strided_slice %20 {offsets = [0, 64], sizes = [8, 32], strides = [1, 1]} : vector<8x128xf32> to vector<8x32xf32>
    %71 = arith.truncf %70 : vector<8x32xf32> to vector<8x32xbf16>
    %72 = vector.extract_strided_slice %21 {offsets = [0, 64], sizes = [8, 32], strides = [1, 1]} : vector<8x128xf32> to vector<8x32xf32>
    %73 = arith.truncf %72 : vector<8x32xf32> to vector<8x32xbf16>
    %cst_25 = arith.constant dense<0.000000e+00> : vector<8x8xf32>
    %74 = tpu.matmul %69, %71, %cst_25 {dimension_numbers = #tpu.dot_dimension_numbers<[1], [1], [0], [0], [0, 0, 1, 0], [], []>} : vector<8x32xbf16>, vector<8x32xbf16>, vector<8x8xf32> -> vector<8x8xf32>
    %cst_26 = arith.constant 0.176776692 : f32
    %75 = vector.broadcast %cst_26 : f32 to vector<8x8xf32>
    %76 = arith.mulf %74, %75 : vector<8x8xf32>
    %cst_27 = arith.constant dense<0xFF800000> : vector<8xf32>
    %77 = vector.multi_reduction <maximumf>, %76, %cst_27 [1] : vector<8x8xf32> to vector<8xf32>
    %78 = vector.shape_cast %77 : vector<8xf32> to vector<8x1xf32>
    %79 = vector.broadcast %78 : vector<8x1xf32> to vector<8x8xf32>
    %80 = arith.subf %76, %79 : vector<8x8xf32>
    %81 = math.exp %80 : vector<8x8xf32>
    %cst_28 = arith.constant dense<0.000000e+00> : vector<8xf32>
    %82 = vector.multi_reduction <add>, %81, %cst_28 [1] : vector<8x8xf32> to vector<8xf32>
    %83 = vector.shape_cast %82 : vector<8xf32> to vector<8x1xf32>
    %84 = tpu.reciprocal %83 {approx = true} : vector<8x1xf32> -> vector<8x1xf32>
    %85 = vector.broadcast %84 : vector<8x1xf32> to vector<8x8xf32>
    %86 = arith.mulf %81, %85 : vector<8x8xf32>
    %87 = arith.truncf %86 : vector<8x8xf32> to vector<8x8xbf16>
    %cst_29 = arith.constant dense<0.000000e+00> : vector<8x32xf32>
    %88 = tpu.matmul %87, %73, %cst_29 {dimension_numbers = #tpu.dot_dimension_numbers<[1], [0], [0], [1], [0, 0, 1, 1], [], []>} : vector<8x8xbf16>, vector<8x32xbf16>, vector<8x32xf32> -> vector<8x32xf32>
    %89 = arith.truncf %88 : vector<8x32xf32> to vector<8x32xbf16>
    %c0_30 = arith.constant 0 : index
    %c64 = arith.constant 64 : index
    %90 = vector.load %arg10[%c0_30, %c64] : memref<8x128xbf16, #tpu.memory_space<vmem>>, vector<8x32xbf16>
    tpu.vector_store %arg10[%c0_30, %c64], %89 {strides = array<i32>} : memref<8x128xbf16, #tpu.memory_space<vmem>>, vector<8x32xbf16>,
    %91 = vector.extract_strided_slice %19 {offsets = [0, 96], sizes = [8, 32], strides = [1, 1]} : vector<8x128xf32> to vector<8x32xf32>
    %92 = arith.truncf %91 : vector<8x32xf32> to vector<8x32xbf16>
    %93 = vector.extract_strided_slice %20 {offsets = [0, 96], sizes = [8, 32], strides = [1, 1]} : vector<8x128xf32> to vector<8x32xf32>
    %94 = arith.truncf %93 : vector<8x32xf32> to vector<8x32xbf16>
    %95 = vector.extract_strided_slice %21 {offsets = [0, 96], sizes = [8, 32], strides = [1, 1]} : vector<8x128xf32> to vector<8x32xf32>
    %96 = arith.truncf %95 : vector<8x32xf32> to vector<8x32xbf16>
    %cst_31 = arith.constant dense<0.000000e+00> : vector<8x8xf32>
    %97 = tpu.matmul %92, %94, %cst_31 {dimension_numbers = #tpu.dot_dimension_numbers<[1], [1], [0], [0], [0, 0, 1, 0], [], []>} : vector<8x32xbf16>, vector<8x32xbf16>, vector<8x8xf32> -> vector<8x8xf32>
    %cst_32 = arith.constant 0.176776692 : f32
    %98 = vector.broadcast %cst_32 : f32 to vector<8x8xf32>
    %99 = arith.mulf %97, %98 : vector<8x8xf32>
    %cst_33 = arith.constant dense<0xFF800000> : vector<8xf32>
    %100 = vector.multi_reduction <maximumf>, %99, %cst_33 [1] : vector<8x8xf32> to vector<8xf32>
    %101 = vector.shape_cast %100 : vector<8xf32> to vector<8x1xf32>
    %102 = vector.broadcast %101 : vector<8x1xf32> to vector<8x8xf32>
    %103 = arith.subf %99, %102 : vector<8x8xf32>
    %104 = math.exp %103 : vector<8x8xf32>
    %cst_34 = arith.constant dense<0.000000e+00> : vector<8xf32>
    %105 = vector.multi_reduction <add>, %104, %cst_34 [1] : vector<8x8xf32> to vector<8xf32>
    %106 = vector.shape_cast %105 : vector<8xf32> to vector<8x1xf32>
    %107 = tpu.reciprocal %106 {approx = true} : vector<8x1xf32> -> vector<8x1xf32>
    %108 = vector.broadcast %107 : vector<8x1xf32> to vector<8x8xf32>
    %109 = arith.mulf %104, %108 : vector<8x8xf32>
    %110 = arith.truncf %109 : vector<8x8xf32> to vector<8x8xbf16>
    %cst_35 = arith.constant dense<0.000000e+00> : vector<8x32xf32>
    %111 = tpu.matmul %110, %96, %cst_35 {dimension_numbers = #tpu.dot_dimension_numbers<[1], [0], [0], [1], [0, 0, 1, 1], [], []>} : vector<8x8xbf16>, vector<8x32xbf16>, vector<8x32xf32> -> vector<8x32xf32>
    %112 = arith.truncf %111 : vector<8x32xf32> to vector<8x32xbf16>
    %c0_36 = arith.constant 0 : index
    %c96 = arith.constant 96 : index
    %113 = vector.load %arg10[%c0_36, %c96] : memref<8x128xbf16, #tpu.memory_space<vmem>>, vector<8x32xbf16>
    tpu.vector_store %arg10[%c0_36, %c96], %112 {strides = array<i32>} : memref<8x128xbf16, #tpu.memory_space<vmem>>, vector<8x32xbf16>,
    %c0_37 = arith.constant 0 : index
    %c0_38 = arith.constant 0 : index
    %114 = vector.load %arg10[%c0_37, %c0_38] : memref<8x128xbf16, #tpu.memory_space<vmem>>, vector<8x128xbf16>
    %c0_39 = arith.constant 0 : index
    %c0_40 = arith.constant 0 : index
    %c0_41 = arith.constant 0 : index
    %115 = vector.load %arg5[%c0_39, %c0_40, %c0_41] : memref<1x128x128xbf16, #tpu.memory_space<vmem>>, vector<1x128x128xbf16>
    %116 = vector.shape_cast %115 : vector<1x128x128xbf16> to vector<128x128xbf16>
    %cst_42 = arith.constant dense<0.000000e+00> : vector<8x128xf32>
    %117 = tpu.matmul %114, %116, %cst_42 {dimension_numbers = #tpu.dot_dimension_numbers<[1], [0], [0], [1], [0, 0, 1, 1], [], []>} : vector<8x128xbf16>, vector<128x128xbf16>, vector<8x128xf32> -> vector<8x128xf32>
    %118 = vector.broadcast %8 : vector<1x128xf32> to vector<8x128xf32>
    %119 = arith.addf %117, %118 : vector<8x128xf32>
    %120 = arith.addf %1, %119 : vector<8x128xf32>
    %cst_43 = arith.constant dense<0.000000e+00> : vector<8xf32>
    %121 = vector.multi_reduction <add>, %120, %cst_43 [1] : vector<8x128xf32> to vector<8xf32>
    %122 = vector.shape_cast %121 : vector<8xf32> to vector<8x1xf32>
    %cst_44 = arith.constant 1.280000e+02 : f32
    %123 = vector.broadcast %cst_44 : f32 to vector<8x1xf32>
    %124 = arith.divf %122, %123 : vector<8x1xf32>
    %125 = vector.broadcast %124 : vector<8x1xf32> to vector<8x128xf32>
    %126 = arith.subf %120, %125 : vector<8x128xf32>
    %127 = arith.mulf %126, %126 : vector<8x128xf32>
    %cst_45 = arith.constant dense<0.000000e+00> : vector<8xf32>
    %128 = vector.multi_reduction <add>, %127, %cst_45 [1] : vector<8x128xf32> to vector<8xf32>
    %129 = vector.shape_cast %128 : vector<8xf32> to vector<8x1xf32>
    %cst_46 = arith.constant 1.280000e+02 : f32
    %130 = vector.broadcast %cst_46 : f32 to vector<8x1xf32>
    %131 = arith.divf %129, %130 : vector<8x1xf32>
    %cst_47 = arith.constant 9.99999974E-6 : f32
    %132 = vector.broadcast %cst_47 : f32 to vector<8x1xf32>
    %133 = arith.addf %131, %132 : vector<8x1xf32>
    %134 = math.rsqrt %133 : vector<8x1xf32>
    %135 = vector.broadcast %134 : vector<8x1xf32> to vector<8x128xf32>
    %136 = arith.mulf %126, %135 : vector<8x128xf32>
    %137 = vector.broadcast %4 : vector<1x128xf32> to vector<8x128xf32>
    %138 = arith.mulf %136, %137 : vector<8x128xf32>
    %139 = vector.broadcast %5 : vector<1x128xf32> to vector<8x128xf32>
    %140 = arith.addf %138, %139 : vector<8x128xf32>
    %141 = arith.truncf %140 : vector<8x128xf32> to vector<8x128xbf16>
    %c0_48 = arith.constant 0 : index
    %c0_49 = arith.constant 0 : index
    %c0_50 = arith.constant 0 : index
    %142 = vector.load %arg6[%c0_48, %c0_49, %c0_50] : memref<1x128x128xbf16, #tpu.memory_space<vmem>>, vector<1x128x128xbf16>
    %143 = vector.shape_cast %142 : vector<1x128x128xbf16> to vector<128x128xbf16>
    %cst_51 = arith.constant dense<0.000000e+00> : vector<8x128xf32>
    %144 = tpu.matmul %141, %143, %cst_51 {dimension_numbers = #tpu.dot_dimension_numbers<[1], [0], [0], [1], [0, 0, 1, 1], [], []>} : vector<8x128xbf16>, vector<128x128xbf16>, vector<8x128xf32> -> vector<8x128xf32>
    %145 = vector.broadcast %9 : vector<1x128xf32> to vector<8x128xf32>
    %146 = arith.addf %144, %145 : vector<8x128xf32>
    %cst_52 = arith.constant 0.000000e+00 : f32
    %147 = vector.broadcast %cst_52 : f32 to vector<8x128xf32>
    %148 = arith.maximumf %146, %147 : vector<8x128xf32>
    %149 = arith.truncf %148 : vector<8x128xf32> to vector<8x128xbf16>
    %c0_53 = arith.constant 0 : index
    %c0_54 = arith.constant 0 : index
    %c0_55 = arith.constant 0 : index
    %150 = vector.load %arg7[%c0_53, %c0_54, %c0_55] : memref<1x128x128xbf16, #tpu.memory_space<vmem>>, vector<1x128x128xbf16>
    %151 = vector.shape_cast %150 : vector<1x128x128xbf16> to vector<128x128xbf16>
    %cst_56 = arith.constant dense<0.000000e+00> : vector<8x128xf32>
    %152 = tpu.matmul %149, %151, %cst_56 {dimension_numbers = #tpu.dot_dimension_numbers<[1], [0], [0], [1], [0, 0, 1, 1], [], []>} : vector<8x128xbf16>, vector<128x128xbf16>, vector<8x128xf32> -> vector<8x128xf32>
    %153 = vector.broadcast %10 : vector<1x128xf32> to vector<8x128xf32>
    %154 = arith.addf %152, %153 : vector<8x128xf32>
    %155 = arith.addf %140, %154 : vector<8x128xf32>
    %cst_57 = arith.constant dense<0.000000e+00> : vector<8xf32>
    %156 = vector.multi_reduction <add>, %155, %cst_57 [1] : vector<8x128xf32> to vector<8xf32>
    %157 = vector.shape_cast %156 : vector<8xf32> to vector<8x1xf32>
    %cst_58 = arith.constant 1.280000e+02 : f32
    %158 = vector.broadcast %cst_58 : f32 to vector<8x1xf32>
    %159 = arith.divf %157, %158 : vector<8x1xf32>
    %160 = vector.broadcast %159 : vector<8x1xf32> to vector<8x128xf32>
    %161 = arith.subf %155, %160 : vector<8x128xf32>
    %162 = arith.mulf %161, %161 : vector<8x128xf32>
    %cst_59 = arith.constant dense<0.000000e+00> : vector<8xf32>
    %163 = vector.multi_reduction <add>, %162, %cst_59 [1] : vector<8x128xf32> to vector<8xf32>
    %164 = vector.shape_cast %163 : vector<8xf32> to vector<8x1xf32>
    %cst_60 = arith.constant 1.280000e+02 : f32
    %165 = vector.broadcast %cst_60 : f32 to vector<8x1xf32>
    %166 = arith.divf %164, %165 : vector<8x1xf32>
    %cst_61 = arith.constant 9.99999974E-6 : f32
    %167 = vector.broadcast %cst_61 : f32 to vector<8x1xf32>
    %168 = arith.addf %166, %167 : vector<8x1xf32>
    %169 = math.rsqrt %168 : vector<8x1xf32>
    %170 = vector.broadcast %169 : vector<8x1xf32> to vector<8x128xf32>
    %171 = arith.mulf %161, %170 : vector<8x128xf32>
    %172 = vector.broadcast %6 : vector<1x128xf32> to vector<8x128xf32>
    %173 = arith.mulf %171, %172 : vector<8x128xf32>
    %174 = vector.broadcast %7 : vector<1x128xf32> to vector<8x128xf32>
    %175 = arith.addf %173, %174 : vector<8x128xf32>
    %c0_62 = arith.constant 0 : index
    %c0_63 = arith.constant 0 : index
    %c0_64 = arith.constant 0 : index
    %c0_65 = arith.constant 0 : index
    %176 = vector.load %arg9[%c0_62, %c0_63, %c0_64, %c0_65] : memref<1x1x8x128xf32, #tpu.memory_space<vmem>>, vector<1x1x8x128xf32>
    %177 = vector.shape_cast %176 : vector<1x1x8x128xf32> to vector<8x128xf32>
    %178 = vector.shape_cast %175 : vector<8x128xf32> to vector<1x1x8x128xf32>
    tpu.vector_store %arg9[%c0_62, %c0_63, %c0_64, %c0_65], %178 {strides = array<i32>} : memref<1x1x8x128xf32, #tpu.memory_space<vmem>>, vector<1x1x8x128xf32>,
    return
  }
  func.func @transform_0(%arg0: i32, %arg1: i32) -> (i32, i32, i32, i32) {
    %c0_i32 = arith.constant 0 : i32
    %c0_i32_0 = arith.constant 0 : i32
    %c0_i32_1 = arith.constant 0 : i32
    return %arg0, %arg1, %c0_i32, %c0_i32_0 : i32, i32, i32, i32
  }
  func.func @transform_1(%arg0: i32, %arg1: i32) -> (i32, i32, i32) {
    %c0_i32 = arith.constant 0 : i32
    %c0_i32_0 = arith.constant 0 : i32
    %c0_i32_1 = arith.constant 0 : i32
    return %arg0, %c0_i32, %c0_i32_0 : i32, i32, i32
  }
  func.func @transform_2(%arg0: i32, %arg1: i32) -> (i32, i32, i32) {
    %c0_i32 = arith.constant 0 : i32
    %c0_i32_0 = arith.constant 0 : i32
    %c0_i32_1 = arith.constant 0 : i32
    return %arg0, %c0_i32, %c0_i32_0 : i32, i32, i32
  }
  func.func @transform_3(%arg0: i32, %arg1: i32) -> (i32, i32, i32) {
    %c0_i32 = arith.constant 0 : i32
    %c0_i32_0 = arith.constant 0 : i32
    %c0_i32_1 = arith.constant 0 : i32
    return %arg0, %c0_i32, %c0_i32_0 : i32, i32, i32
  }
  func.func @transform_4(%arg0: i32, %arg1: i32) -> (i32, i32, i32) {
    %c0_i32 = arith.constant 0 : i32
    %c0_i32_0 = arith.constant 0 : i32
    %c0_i32_1 = arith.constant 0 : i32
    return %arg0, %c0_i32, %c0_i32_0 : i32, i32, i32
  }
  func.func @transform_5(%arg0: i32, %arg1: i32) -> (i32, i32, i32) {
    %c0_i32 = arith.constant 0 : i32
    %c0_i32_0 = arith.constant 0 : i32
    %c0_i32_1 = arith.constant 0 : i32
    return %arg0, %c0_i32, %c0_i32_0 : i32, i32, i32
  }
  func.func @transform_6(%arg0: i32, %arg1: i32) -> (i32, i32, i32) {
    %c0_i32 = arith.constant 0 : i32
    %c0_i32_0 = arith.constant 0 : i32
    %c0_i32_1 = arith.constant 0 : i32
    return %arg0, %c0_i32, %c0_i32_0 : i32, i32, i32
  }
  func.func @transform_7(%arg0: i32, %arg1: i32) -> (i32, i32, i32, i32) {
    %c0_i32 = arith.constant 0 : i32
    %c0_i32_0 = arith.constant 0 : i32
    %c0_i32_1 = arith.constant 0 : i32
    return %arg0, %arg1, %c0_i32, %c0_i32_0 : i32, i32, i32, i32
  }
}

module attributes {stable_mosaic.version = 11 : i64} {
  func.func @_cross_stage_kernel(%arg0: i32, %arg1: memref<1x8x128xf32, #tpu.memory_space<vmem>>, %arg2: memref<1x8x128xf32, #tpu.memory_space<vmem>>, %arg3: memref<128x384xbf16, #tpu.memory_space<vmem>>, %arg4: memref<128x384xbf16, #tpu.memory_space<vmem>>, %arg5: memref<128x384xbf16, #tpu.memory_space<vmem>>, %arg6: memref<128x384xbf16, #tpu.memory_space<vmem>>, %arg7: memref<3x384xf32, #tpu.memory_space<vmem>>, %arg8: memref<128x128xbf16, #tpu.memory_space<vmem>>, %arg9: memref<128x128xbf16, #tpu.memory_space<vmem>>, %arg10: memref<2x128xf32, #tpu.memory_space<vmem>>, %arg11: memref<1x8x384xf32, #tpu.memory_space<vmem>>, %arg12: memref<8x128xbf16, #tpu.memory_space<vmem>>) attributes {dimension_semantics = [#tpu.dimension_semantics<parallel>], iteration_bounds = array<i64: 2>, scalar_prefetch = 0 : i64, scratch_operands = 1 : i64, tpu.core_type = #tpu.core_type<tc>, window_params = [{transform_indices = @transform_0, window_bounds = array<i64: 1, 8, 128>}, {transform_indices = @transform_1, window_bounds = array<i64: 1, 8, 128>}, {pipeline_mode = #tpu.pipeline_mode<synchronous>, transform_indices = @transform_2, window_bounds = array<i64: 128, 384>}, {pipeline_mode = #tpu.pipeline_mode<synchronous>, transform_indices = @transform_3, window_bounds = array<i64: 128, 384>}, {pipeline_mode = #tpu.pipeline_mode<synchronous>, transform_indices = @transform_4, window_bounds = array<i64: 128, 384>}, {pipeline_mode = #tpu.pipeline_mode<synchronous>, transform_indices = @transform_5, window_bounds = array<i64: 128, 384>}, {pipeline_mode = #tpu.pipeline_mode<synchronous>, transform_indices = @transform_6, window_bounds = array<i64: 3, 384>}, {pipeline_mode = #tpu.pipeline_mode<synchronous>, transform_indices = @transform_7, window_bounds = array<i64: 128, 128>}, {pipeline_mode = #tpu.pipeline_mode<synchronous>, transform_indices = @transform_8, window_bounds = array<i64: 128, 128>}, {pipeline_mode = #tpu.pipeline_mode<synchronous>, transform_indices = @transform_9, window_bounds = array<i64: 2, 128>}, {transform_indices = @transform_10, window_bounds = array<i64: 1, 8, 384>}]} {
    %c0 = arith.constant 0 : index
    %c0_0 = arith.constant 0 : index
    %c0_1 = arith.constant 0 : index
    %0 = vector.load %arg1[%c0, %c0_0, %c0_1] : memref<1x8x128xf32, #tpu.memory_space<vmem>>, vector<1x8x128xf32>
    %1 = vector.shape_cast %0 : vector<1x8x128xf32> to vector<8x128xf32>
    %c0_2 = arith.constant 0 : index
    %c0_3 = arith.constant 0 : index
    %c0_4 = arith.constant 0 : index
    %2 = vector.load %arg2[%c0_2, %c0_3, %c0_4] : memref<1x8x128xf32, #tpu.memory_space<vmem>>, vector<1x8x128xf32>
    %3 = vector.shape_cast %2 : vector<1x8x128xf32> to vector<8x128xf32>
    %4 = arith.truncf %1 : vector<8x128xf32> to vector<8x128xbf16>
    %5 = arith.truncf %3 : vector<8x128xf32> to vector<8x128xbf16>
    %c0_5 = arith.constant 0 : index
    %c0_6 = arith.constant 0 : index
    %6 = vector.load %arg7[%c0_5, %c0_6] : memref<3x384xf32, #tpu.memory_space<vmem>>, vector<3x384xf32>
    %c0_7 = arith.constant 0 : index
    %c0_8 = arith.constant 0 : index
    %7 = vector.load %arg10[%c0_7, %c0_8] : memref<2x128xf32, #tpu.memory_space<vmem>>, vector<2x128xf32>
    %c0_9 = arith.constant 0 : index
    %c0_10 = arith.constant 0 : index
    %8 = vector.load %arg3[%c0_9, %c0_10] : memref<128x384xbf16, #tpu.memory_space<vmem>>, vector<128x384xbf16>
    %cst = arith.constant dense<0.000000e+00> : vector<8x384xf32>
    %9 = tpu.matmul %4, %8, %cst {dimension_numbers = #tpu.dot_dimension_numbers<[1], [0], [0], [1], [0, 0, 1, 1], [], []>} : vector<8x128xbf16>, vector<128x384xbf16>, vector<8x384xf32> -> vector<8x384xf32>
    %10 = vector.extract_strided_slice %6 {offsets = [0, 0], sizes = [1, 384], strides = [1, 1]} : vector<3x384xf32> to vector<1x384xf32>
    %11 = vector.broadcast %10 : vector<1x384xf32> to vector<8x384xf32>
    %12 = arith.addf %9, %11 : vector<8x384xf32>
    %c0_11 = arith.constant 0 : index
    %c0_12 = arith.constant 0 : index
    %13 = vector.load %arg4[%c0_11, %c0_12] : memref<128x384xbf16, #tpu.memory_space<vmem>>, vector<128x384xbf16>
    %cst_13 = arith.constant dense<0.000000e+00> : vector<8x384xf32>
    %14 = tpu.matmul %5, %13, %cst_13 {dimension_numbers = #tpu.dot_dimension_numbers<[1], [0], [0], [1], [0, 0, 1, 1], [], []>} : vector<8x128xbf16>, vector<128x384xbf16>, vector<8x384xf32> -> vector<8x384xf32>
    %15 = vector.extract_strided_slice %6 {offsets = [1, 0], sizes = [1, 384], strides = [1, 1]} : vector<3x384xf32> to vector<1x384xf32>
    %16 = vector.broadcast %15 : vector<1x384xf32> to vector<8x384xf32>
    %17 = arith.addf %14, %16 : vector<8x384xf32>
    %c0_14 = arith.constant 0 : index
    %c0_15 = arith.constant 0 : index
    %18 = vector.load %arg5[%c0_14, %c0_15] : memref<128x384xbf16, #tpu.memory_space<vmem>>, vector<128x384xbf16>
    %cst_16 = arith.constant dense<0.000000e+00> : vector<8x384xf32>
    %19 = tpu.matmul %4, %18, %cst_16 {dimension_numbers = #tpu.dot_dimension_numbers<[1], [0], [0], [1], [0, 0, 1, 1], [], []>} : vector<8x128xbf16>, vector<128x384xbf16>, vector<8x384xf32> -> vector<8x384xf32>
    %c0_17 = arith.constant 0 : index
    %c0_18 = arith.constant 0 : index
    %20 = vector.load %arg6[%c0_17, %c0_18] : memref<128x384xbf16, #tpu.memory_space<vmem>>, vector<128x384xbf16>
    %cst_19 = arith.constant dense<0.000000e+00> : vector<8x384xf32>
    %21 = tpu.matmul %5, %20, %cst_19 {dimension_numbers = #tpu.dot_dimension_numbers<[1], [0], [0], [1], [0, 0, 1, 1], [], []>} : vector<8x128xbf16>, vector<128x384xbf16>, vector<8x384xf32> -> vector<8x384xf32>
    %22 = arith.addf %19, %21 : vector<8x384xf32>
    %23 = vector.extract_strided_slice %6 {offsets = [2, 0], sizes = [1, 384], strides = [1, 1]} : vector<3x384xf32> to vector<1x384xf32>
    %24 = vector.broadcast %23 : vector<1x384xf32> to vector<8x384xf32>
    %25 = arith.addf %22, %24 : vector<8x384xf32>
    %26 = vector.extract_strided_slice %12 {offsets = [0, 0], sizes = [8, 128], strides = [1, 1]} : vector<8x384xf32> to vector<8x128xf32>
    %27 = vector.extract_strided_slice %12 {offsets = [0, 128], sizes = [8, 128], strides = [1, 1]} : vector<8x384xf32> to vector<8x128xf32>
    %28 = vector.extract_strided_slice %12 {offsets = [0, 256], sizes = [8, 128], strides = [1, 1]} : vector<8x384xf32> to vector<8x128xf32>
    %29 = vector.extract_strided_slice %17 {offsets = [0, 0], sizes = [8, 128], strides = [1, 1]} : vector<8x384xf32> to vector<8x128xf32>
    %30 = vector.extract_strided_slice %17 {offsets = [0, 128], sizes = [8, 128], strides = [1, 1]} : vector<8x384xf32> to vector<8x128xf32>
    %31 = vector.extract_strided_slice %17 {offsets = [0, 256], sizes = [8, 128], strides = [1, 1]} : vector<8x384xf32> to vector<8x128xf32>
    %32 = vector.extract_strided_slice %25 {offsets = [0, 0], sizes = [8, 128], strides = [1, 1]} : vector<8x384xf32> to vector<8x128xf32>
    %33 = vector.extract_strided_slice %25 {offsets = [0, 128], sizes = [8, 128], strides = [1, 1]} : vector<8x384xf32> to vector<8x128xf32>
    %34 = vector.extract_strided_slice %25 {offsets = [0, 256], sizes = [8, 128], strides = [1, 1]} : vector<8x384xf32> to vector<8x128xf32>
    %35 = vector.extract_strided_slice %29 {offsets = [0, 0], sizes = [8, 32], strides = [1, 1]} : vector<8x128xf32> to vector<8x32xf32>
    %36 = arith.truncf %35 : vector<8x32xf32> to vector<8x32xbf16>
    %37 = vector.extract_strided_slice %26 {offsets = [0, 0], sizes = [8, 32], strides = [1, 1]} : vector<8x128xf32> to vector<8x32xf32>
    %38 = arith.truncf %37 : vector<8x32xf32> to vector<8x32xbf16>
    %39 = vector.extract_strided_slice %27 {offsets = [0, 0], sizes = [8, 32], strides = [1, 1]} : vector<8x128xf32> to vector<8x32xf32>
    %40 = arith.truncf %39 : vector<8x32xf32> to vector<8x32xbf16>
    %cst_20 = arith.constant dense<0.000000e+00> : vector<8x8xf32>
    %41 = tpu.matmul %36, %38, %cst_20 {dimension_numbers = #tpu.dot_dimension_numbers<[1], [1], [0], [0], [0, 0, 1, 0], [], []>} : vector<8x32xbf16>, vector<8x32xbf16>, vector<8x8xf32> -> vector<8x8xf32>
    %cst_21 = arith.constant 0.176776692 : f32
    %42 = vector.broadcast %cst_21 : f32 to vector<8x8xf32>
    %43 = arith.mulf %41, %42 : vector<8x8xf32>
    %cst_22 = arith.constant dense<0xFF800000> : vector<8xf32>
    %44 = vector.multi_reduction <maximumf>, %43, %cst_22 [1] : vector<8x8xf32> to vector<8xf32>
    %45 = vector.shape_cast %44 : vector<8xf32> to vector<8x1xf32>
    %46 = vector.broadcast %45 : vector<8x1xf32> to vector<8x8xf32>
    %47 = arith.subf %43, %46 : vector<8x8xf32>
    %48 = math.exp %47 : vector<8x8xf32>
    %cst_23 = arith.constant dense<0.000000e+00> : vector<8xf32>
    %49 = vector.multi_reduction <add>, %48, %cst_23 [1] : vector<8x8xf32> to vector<8xf32>
    %50 = vector.shape_cast %49 : vector<8xf32> to vector<8x1xf32>
    %51 = tpu.reciprocal %50 {approx = true} : vector<8x1xf32> -> vector<8x1xf32>
    %52 = vector.broadcast %51 : vector<8x1xf32> to vector<8x8xf32>
    %53 = arith.mulf %48, %52 : vector<8x8xf32>
    %54 = arith.truncf %53 : vector<8x8xf32> to vector<8x8xbf16>
    %cst_24 = arith.constant dense<0.000000e+00> : vector<8x32xf32>
    %55 = tpu.matmul %54, %40, %cst_24 {dimension_numbers = #tpu.dot_dimension_numbers<[1], [0], [0], [1], [0, 0, 1, 1], [], []>} : vector<8x8xbf16>, vector<8x32xbf16>, vector<8x32xf32> -> vector<8x32xf32>
    %56 = arith.truncf %55 : vector<8x32xf32> to vector<8x32xbf16>
    %c0_25 = arith.constant 0 : index
    %c0_26 = arith.constant 0 : index
    %57 = vector.load %arg12[%c0_25, %c0_26] : memref<8x128xbf16, #tpu.memory_space<vmem>>, vector<8x32xbf16>
    tpu.vector_store %arg12[%c0_25, %c0_26], %56 {strides = array<i32>} : memref<8x128xbf16, #tpu.memory_space<vmem>>, vector<8x32xbf16>,
    %58 = vector.extract_strided_slice %29 {offsets = [0, 32], sizes = [8, 32], strides = [1, 1]} : vector<8x128xf32> to vector<8x32xf32>
    %59 = arith.truncf %58 : vector<8x32xf32> to vector<8x32xbf16>
    %60 = vector.extract_strided_slice %26 {offsets = [0, 32], sizes = [8, 32], strides = [1, 1]} : vector<8x128xf32> to vector<8x32xf32>
    %61 = arith.truncf %60 : vector<8x32xf32> to vector<8x32xbf16>
    %62 = vector.extract_strided_slice %27 {offsets = [0, 32], sizes = [8, 32], strides = [1, 1]} : vector<8x128xf32> to vector<8x32xf32>
    %63 = arith.truncf %62 : vector<8x32xf32> to vector<8x32xbf16>
    %cst_27 = arith.constant dense<0.000000e+00> : vector<8x8xf32>
    %64 = tpu.matmul %59, %61, %cst_27 {dimension_numbers = #tpu.dot_dimension_numbers<[1], [1], [0], [0], [0, 0, 1, 0], [], []>} : vector<8x32xbf16>, vector<8x32xbf16>, vector<8x8xf32> -> vector<8x8xf32>
    %cst_28 = arith.constant 0.176776692 : f32
    %65 = vector.broadcast %cst_28 : f32 to vector<8x8xf32>
    %66 = arith.mulf %64, %65 : vector<8x8xf32>
    %cst_29 = arith.constant dense<0xFF800000> : vector<8xf32>
    %67 = vector.multi_reduction <maximumf>, %66, %cst_29 [1] : vector<8x8xf32> to vector<8xf32>
    %68 = vector.shape_cast %67 : vector<8xf32> to vector<8x1xf32>
    %69 = vector.broadcast %68 : vector<8x1xf32> to vector<8x8xf32>
    %70 = arith.subf %66, %69 : vector<8x8xf32>
    %71 = math.exp %70 : vector<8x8xf32>
    %cst_30 = arith.constant dense<0.000000e+00> : vector<8xf32>
    %72 = vector.multi_reduction <add>, %71, %cst_30 [1] : vector<8x8xf32> to vector<8xf32>
    %73 = vector.shape_cast %72 : vector<8xf32> to vector<8x1xf32>
    %74 = tpu.reciprocal %73 {approx = true} : vector<8x1xf32> -> vector<8x1xf32>
    %75 = vector.broadcast %74 : vector<8x1xf32> to vector<8x8xf32>
    %76 = arith.mulf %71, %75 : vector<8x8xf32>
    %77 = arith.truncf %76 : vector<8x8xf32> to vector<8x8xbf16>
    %cst_31 = arith.constant dense<0.000000e+00> : vector<8x32xf32>
    %78 = tpu.matmul %77, %63, %cst_31 {dimension_numbers = #tpu.dot_dimension_numbers<[1], [0], [0], [1], [0, 0, 1, 1], [], []>} : vector<8x8xbf16>, vector<8x32xbf16>, vector<8x32xf32> -> vector<8x32xf32>
    %79 = arith.truncf %78 : vector<8x32xf32> to vector<8x32xbf16>
    %c0_32 = arith.constant 0 : index
    %c32 = arith.constant 32 : index
    %80 = vector.load %arg12[%c0_32, %c32] : memref<8x128xbf16, #tpu.memory_space<vmem>>, vector<8x32xbf16>
    tpu.vector_store %arg12[%c0_32, %c32], %79 {strides = array<i32>} : memref<8x128xbf16, #tpu.memory_space<vmem>>, vector<8x32xbf16>,
    %81 = vector.extract_strided_slice %29 {offsets = [0, 64], sizes = [8, 32], strides = [1, 1]} : vector<8x128xf32> to vector<8x32xf32>
    %82 = arith.truncf %81 : vector<8x32xf32> to vector<8x32xbf16>
    %83 = vector.extract_strided_slice %26 {offsets = [0, 64], sizes = [8, 32], strides = [1, 1]} : vector<8x128xf32> to vector<8x32xf32>
    %84 = arith.truncf %83 : vector<8x32xf32> to vector<8x32xbf16>
    %85 = vector.extract_strided_slice %27 {offsets = [0, 64], sizes = [8, 32], strides = [1, 1]} : vector<8x128xf32> to vector<8x32xf32>
    %86 = arith.truncf %85 : vector<8x32xf32> to vector<8x32xbf16>
    %cst_33 = arith.constant dense<0.000000e+00> : vector<8x8xf32>
    %87 = tpu.matmul %82, %84, %cst_33 {dimension_numbers = #tpu.dot_dimension_numbers<[1], [1], [0], [0], [0, 0, 1, 0], [], []>} : vector<8x32xbf16>, vector<8x32xbf16>, vector<8x8xf32> -> vector<8x8xf32>
    %cst_34 = arith.constant 0.176776692 : f32
    %88 = vector.broadcast %cst_34 : f32 to vector<8x8xf32>
    %89 = arith.mulf %87, %88 : vector<8x8xf32>
    %cst_35 = arith.constant dense<0xFF800000> : vector<8xf32>
    %90 = vector.multi_reduction <maximumf>, %89, %cst_35 [1] : vector<8x8xf32> to vector<8xf32>
    %91 = vector.shape_cast %90 : vector<8xf32> to vector<8x1xf32>
    %92 = vector.broadcast %91 : vector<8x1xf32> to vector<8x8xf32>
    %93 = arith.subf %89, %92 : vector<8x8xf32>
    %94 = math.exp %93 : vector<8x8xf32>
    %cst_36 = arith.constant dense<0.000000e+00> : vector<8xf32>
    %95 = vector.multi_reduction <add>, %94, %cst_36 [1] : vector<8x8xf32> to vector<8xf32>
    %96 = vector.shape_cast %95 : vector<8xf32> to vector<8x1xf32>
    %97 = tpu.reciprocal %96 {approx = true} : vector<8x1xf32> -> vector<8x1xf32>
    %98 = vector.broadcast %97 : vector<8x1xf32> to vector<8x8xf32>
    %99 = arith.mulf %94, %98 : vector<8x8xf32>
    %100 = arith.truncf %99 : vector<8x8xf32> to vector<8x8xbf16>
    %cst_37 = arith.constant dense<0.000000e+00> : vector<8x32xf32>
    %101 = tpu.matmul %100, %86, %cst_37 {dimension_numbers = #tpu.dot_dimension_numbers<[1], [0], [0], [1], [0, 0, 1, 1], [], []>} : vector<8x8xbf16>, vector<8x32xbf16>, vector<8x32xf32> -> vector<8x32xf32>
    %102 = arith.truncf %101 : vector<8x32xf32> to vector<8x32xbf16>
    %c0_38 = arith.constant 0 : index
    %c64 = arith.constant 64 : index
    %103 = vector.load %arg12[%c0_38, %c64] : memref<8x128xbf16, #tpu.memory_space<vmem>>, vector<8x32xbf16>
    tpu.vector_store %arg12[%c0_38, %c64], %102 {strides = array<i32>} : memref<8x128xbf16, #tpu.memory_space<vmem>>, vector<8x32xbf16>,
    %104 = vector.extract_strided_slice %29 {offsets = [0, 96], sizes = [8, 32], strides = [1, 1]} : vector<8x128xf32> to vector<8x32xf32>
    %105 = arith.truncf %104 : vector<8x32xf32> to vector<8x32xbf16>
    %106 = vector.extract_strided_slice %26 {offsets = [0, 96], sizes = [8, 32], strides = [1, 1]} : vector<8x128xf32> to vector<8x32xf32>
    %107 = arith.truncf %106 : vector<8x32xf32> to vector<8x32xbf16>
    %108 = vector.extract_strided_slice %27 {offsets = [0, 96], sizes = [8, 32], strides = [1, 1]} : vector<8x128xf32> to vector<8x32xf32>
    %109 = arith.truncf %108 : vector<8x32xf32> to vector<8x32xbf16>
    %cst_39 = arith.constant dense<0.000000e+00> : vector<8x8xf32>
    %110 = tpu.matmul %105, %107, %cst_39 {dimension_numbers = #tpu.dot_dimension_numbers<[1], [1], [0], [0], [0, 0, 1, 0], [], []>} : vector<8x32xbf16>, vector<8x32xbf16>, vector<8x8xf32> -> vector<8x8xf32>
    %cst_40 = arith.constant 0.176776692 : f32
    %111 = vector.broadcast %cst_40 : f32 to vector<8x8xf32>
    %112 = arith.mulf %110, %111 : vector<8x8xf32>
    %cst_41 = arith.constant dense<0xFF800000> : vector<8xf32>
    %113 = vector.multi_reduction <maximumf>, %112, %cst_41 [1] : vector<8x8xf32> to vector<8xf32>
    %114 = vector.shape_cast %113 : vector<8xf32> to vector<8x1xf32>
    %115 = vector.broadcast %114 : vector<8x1xf32> to vector<8x8xf32>
    %116 = arith.subf %112, %115 : vector<8x8xf32>
    %117 = math.exp %116 : vector<8x8xf32>
    %cst_42 = arith.constant dense<0.000000e+00> : vector<8xf32>
    %118 = vector.multi_reduction <add>, %117, %cst_42 [1] : vector<8x8xf32> to vector<8xf32>
    %119 = vector.shape_cast %118 : vector<8xf32> to vector<8x1xf32>
    %120 = tpu.reciprocal %119 {approx = true} : vector<8x1xf32> -> vector<8x1xf32>
    %121 = vector.broadcast %120 : vector<8x1xf32> to vector<8x8xf32>
    %122 = arith.mulf %117, %121 : vector<8x8xf32>
    %123 = arith.truncf %122 : vector<8x8xf32> to vector<8x8xbf16>
    %cst_43 = arith.constant dense<0.000000e+00> : vector<8x32xf32>
    %124 = tpu.matmul %123, %109, %cst_43 {dimension_numbers = #tpu.dot_dimension_numbers<[1], [0], [0], [1], [0, 0, 1, 1], [], []>} : vector<8x8xbf16>, vector<8x32xbf16>, vector<8x32xf32> -> vector<8x32xf32>
    %125 = arith.truncf %124 : vector<8x32xf32> to vector<8x32xbf16>
    %c0_44 = arith.constant 0 : index
    %c96 = arith.constant 96 : index
    %126 = vector.load %arg12[%c0_44, %c96] : memref<8x128xbf16, #tpu.memory_space<vmem>>, vector<8x32xbf16>
    tpu.vector_store %arg12[%c0_44, %c96], %125 {strides = array<i32>} : memref<8x128xbf16, #tpu.memory_space<vmem>>, vector<8x32xbf16>,
    %c0_45 = arith.constant 0 : index
    %c0_46 = arith.constant 0 : index
    %127 = vector.load %arg12[%c0_45, %c0_46] : memref<8x128xbf16, #tpu.memory_space<vmem>>, vector<8x128xbf16>
    %c0_47 = arith.constant 0 : index
    %c0_48 = arith.constant 0 : index
    %128 = vector.load %arg8[%c0_47, %c0_48] : memref<128x128xbf16, #tpu.memory_space<vmem>>, vector<128x128xbf16>
    %cst_49 = arith.constant dense<0.000000e+00> : vector<8x128xf32>
    %129 = tpu.matmul %127, %128, %cst_49 {dimension_numbers = #tpu.dot_dimension_numbers<[1], [0], [0], [1], [0, 0, 1, 1], [], []>} : vector<8x128xbf16>, vector<128x128xbf16>, vector<8x128xf32> -> vector<8x128xf32>
    %130 = vector.extract_strided_slice %7 {offsets = [0, 0], sizes = [1, 128], strides = [1, 1]} : vector<2x128xf32> to vector<1x128xf32>
    %131 = vector.broadcast %130 : vector<1x128xf32> to vector<8x128xf32>
    %132 = arith.addf %129, %131 : vector<8x128xf32>
    %c0_50 = arith.constant 0 : index
    %c0_51 = arith.constant 0 : index
    %c0_52 = arith.constant 0 : index
    %133 = vector.load %arg11[%c0_50, %c0_51, %c0_52] : memref<1x8x384xf32, #tpu.memory_space<vmem>>, vector<1x8x128xf32>
    %134 = vector.shape_cast %133 : vector<1x8x128xf32> to vector<8x128xf32>
    %135 = vector.shape_cast %132 : vector<8x128xf32> to vector<1x8x128xf32>
    tpu.vector_store %arg11[%c0_50, %c0_51, %c0_52], %135 {strides = array<i32>} : memref<1x8x384xf32, #tpu.memory_space<vmem>>, vector<1x8x128xf32>,
    %136 = vector.extract_strided_slice %28 {offsets = [0, 0], sizes = [8, 32], strides = [1, 1]} : vector<8x128xf32> to vector<8x32xf32>
    %137 = arith.truncf %136 : vector<8x32xf32> to vector<8x32xbf16>
    %138 = vector.extract_strided_slice %30 {offsets = [0, 0], sizes = [8, 32], strides = [1, 1]} : vector<8x128xf32> to vector<8x32xf32>
    %139 = arith.truncf %138 : vector<8x32xf32> to vector<8x32xbf16>
    %140 = vector.extract_strided_slice %31 {offsets = [0, 0], sizes = [8, 32], strides = [1, 1]} : vector<8x128xf32> to vector<8x32xf32>
    %141 = arith.truncf %140 : vector<8x32xf32> to vector<8x32xbf16>
    %cst_53 = arith.constant dense<0.000000e+00> : vector<8x8xf32>
    %142 = tpu.matmul %137, %139, %cst_53 {dimension_numbers = #tpu.dot_dimension_numbers<[1], [1], [0], [0], [0, 0, 1, 0], [], []>} : vector<8x32xbf16>, vector<8x32xbf16>, vector<8x8xf32> -> vector<8x8xf32>
    %cst_54 = arith.constant 0.176776692 : f32
    %143 = vector.broadcast %cst_54 : f32 to vector<8x8xf32>
    %144 = arith.mulf %142, %143 : vector<8x8xf32>
    %cst_55 = arith.constant dense<0xFF800000> : vector<8xf32>
    %145 = vector.multi_reduction <maximumf>, %144, %cst_55 [1] : vector<8x8xf32> to vector<8xf32>
    %146 = vector.shape_cast %145 : vector<8xf32> to vector<8x1xf32>
    %147 = vector.broadcast %146 : vector<8x1xf32> to vector<8x8xf32>
    %148 = arith.subf %144, %147 : vector<8x8xf32>
    %149 = math.exp %148 : vector<8x8xf32>
    %cst_56 = arith.constant dense<0.000000e+00> : vector<8xf32>
    %150 = vector.multi_reduction <add>, %149, %cst_56 [1] : vector<8x8xf32> to vector<8xf32>
    %151 = vector.shape_cast %150 : vector<8xf32> to vector<8x1xf32>
    %152 = tpu.reciprocal %151 {approx = true} : vector<8x1xf32> -> vector<8x1xf32>
    %153 = vector.broadcast %152 : vector<8x1xf32> to vector<8x8xf32>
    %154 = arith.mulf %149, %153 : vector<8x8xf32>
    %155 = arith.truncf %154 : vector<8x8xf32> to vector<8x8xbf16>
    %cst_57 = arith.constant dense<0.000000e+00> : vector<8x32xf32>
    %156 = tpu.matmul %155, %141, %cst_57 {dimension_numbers = #tpu.dot_dimension_numbers<[1], [0], [0], [1], [0, 0, 1, 1], [], []>} : vector<8x8xbf16>, vector<8x32xbf16>, vector<8x32xf32> -> vector<8x32xf32>
    %157 = arith.truncf %156 : vector<8x32xf32> to vector<8x32xbf16>
    %c0_58 = arith.constant 0 : index
    %c0_59 = arith.constant 0 : index
    %158 = vector.load %arg12[%c0_58, %c0_59] : memref<8x128xbf16, #tpu.memory_space<vmem>>, vector<8x32xbf16>
    tpu.vector_store %arg12[%c0_58, %c0_59], %157 {strides = array<i32>} : memref<8x128xbf16, #tpu.memory_space<vmem>>, vector<8x32xbf16>,
    %159 = vector.extract_strided_slice %28 {offsets = [0, 32], sizes = [8, 32], strides = [1, 1]} : vector<8x128xf32> to vector<8x32xf32>
    %160 = arith.truncf %159 : vector<8x32xf32> to vector<8x32xbf16>
    %161 = vector.extract_strided_slice %30 {offsets = [0, 32], sizes = [8, 32], strides = [1, 1]} : vector<8x128xf32> to vector<8x32xf32>
    %162 = arith.truncf %161 : vector<8x32xf32> to vector<8x32xbf16>
    %163 = vector.extract_strided_slice %31 {offsets = [0, 32], sizes = [8, 32], strides = [1, 1]} : vector<8x128xf32> to vector<8x32xf32>
    %164 = arith.truncf %163 : vector<8x32xf32> to vector<8x32xbf16>
    %cst_60 = arith.constant dense<0.000000e+00> : vector<8x8xf32>
    %165 = tpu.matmul %160, %162, %cst_60 {dimension_numbers = #tpu.dot_dimension_numbers<[1], [1], [0], [0], [0, 0, 1, 0], [], []>} : vector<8x32xbf16>, vector<8x32xbf16>, vector<8x8xf32> -> vector<8x8xf32>
    %cst_61 = arith.constant 0.176776692 : f32
    %166 = vector.broadcast %cst_61 : f32 to vector<8x8xf32>
    %167 = arith.mulf %165, %166 : vector<8x8xf32>
    %cst_62 = arith.constant dense<0xFF800000> : vector<8xf32>
    %168 = vector.multi_reduction <maximumf>, %167, %cst_62 [1] : vector<8x8xf32> to vector<8xf32>
    %169 = vector.shape_cast %168 : vector<8xf32> to vector<8x1xf32>
    %170 = vector.broadcast %169 : vector<8x1xf32> to vector<8x8xf32>
    %171 = arith.subf %167, %170 : vector<8x8xf32>
    %172 = math.exp %171 : vector<8x8xf32>
    %cst_63 = arith.constant dense<0.000000e+00> : vector<8xf32>
    %173 = vector.multi_reduction <add>, %172, %cst_63 [1] : vector<8x8xf32> to vector<8xf32>
    %174 = vector.shape_cast %173 : vector<8xf32> to vector<8x1xf32>
    %175 = tpu.reciprocal %174 {approx = true} : vector<8x1xf32> -> vector<8x1xf32>
    %176 = vector.broadcast %175 : vector<8x1xf32> to vector<8x8xf32>
    %177 = arith.mulf %172, %176 : vector<8x8xf32>
    %178 = arith.truncf %177 : vector<8x8xf32> to vector<8x8xbf16>
    %cst_64 = arith.constant dense<0.000000e+00> : vector<8x32xf32>
    %179 = tpu.matmul %178, %164, %cst_64 {dimension_numbers = #tpu.dot_dimension_numbers<[1], [0], [0], [1], [0, 0, 1, 1], [], []>} : vector<8x8xbf16>, vector<8x32xbf16>, vector<8x32xf32> -> vector<8x32xf32>
    %180 = arith.truncf %179 : vector<8x32xf32> to vector<8x32xbf16>
    %c0_65 = arith.constant 0 : index
    %c32_66 = arith.constant 32 : index
    %181 = vector.load %arg12[%c0_65, %c32_66] : memref<8x128xbf16, #tpu.memory_space<vmem>>, vector<8x32xbf16>
    tpu.vector_store %arg12[%c0_65, %c32_66], %180 {strides = array<i32>} : memref<8x128xbf16, #tpu.memory_space<vmem>>, vector<8x32xbf16>,
    %182 = vector.extract_strided_slice %28 {offsets = [0, 64], sizes = [8, 32], strides = [1, 1]} : vector<8x128xf32> to vector<8x32xf32>
    %183 = arith.truncf %182 : vector<8x32xf32> to vector<8x32xbf16>
    %184 = vector.extract_strided_slice %30 {offsets = [0, 64], sizes = [8, 32], strides = [1, 1]} : vector<8x128xf32> to vector<8x32xf32>
    %185 = arith.truncf %184 : vector<8x32xf32> to vector<8x32xbf16>
    %186 = vector.extract_strided_slice %31 {offsets = [0, 64], sizes = [8, 32], strides = [1, 1]} : vector<8x128xf32> to vector<8x32xf32>
    %187 = arith.truncf %186 : vector<8x32xf32> to vector<8x32xbf16>
    %cst_67 = arith.constant dense<0.000000e+00> : vector<8x8xf32>
    %188 = tpu.matmul %183, %185, %cst_67 {dimension_numbers = #tpu.dot_dimension_numbers<[1], [1], [0], [0], [0, 0, 1, 0], [], []>} : vector<8x32xbf16>, vector<8x32xbf16>, vector<8x8xf32> -> vector<8x8xf32>
    %cst_68 = arith.constant 0.176776692 : f32
    %189 = vector.broadcast %cst_68 : f32 to vector<8x8xf32>
    %190 = arith.mulf %188, %189 : vector<8x8xf32>
    %cst_69 = arith.constant dense<0xFF800000> : vector<8xf32>
    %191 = vector.multi_reduction <maximumf>, %190, %cst_69 [1] : vector<8x8xf32> to vector<8xf32>
    %192 = vector.shape_cast %191 : vector<8xf32> to vector<8x1xf32>
    %193 = vector.broadcast %192 : vector<8x1xf32> to vector<8x8xf32>
    %194 = arith.subf %190, %193 : vector<8x8xf32>
    %195 = math.exp %194 : vector<8x8xf32>
    %cst_70 = arith.constant dense<0.000000e+00> : vector<8xf32>
    %196 = vector.multi_reduction <add>, %195, %cst_70 [1] : vector<8x8xf32> to vector<8xf32>
    %197 = vector.shape_cast %196 : vector<8xf32> to vector<8x1xf32>
    %198 = tpu.reciprocal %197 {approx = true} : vector<8x1xf32> -> vector<8x1xf32>
    %199 = vector.broadcast %198 : vector<8x1xf32> to vector<8x8xf32>
    %200 = arith.mulf %195, %199 : vector<8x8xf32>
    %201 = arith.truncf %200 : vector<8x8xf32> to vector<8x8xbf16>
    %cst_71 = arith.constant dense<0.000000e+00> : vector<8x32xf32>
    %202 = tpu.matmul %201, %187, %cst_71 {dimension_numbers = #tpu.dot_dimension_numbers<[1], [0], [0], [1], [0, 0, 1, 1], [], []>} : vector<8x8xbf16>, vector<8x32xbf16>, vector<8x32xf32> -> vector<8x32xf32>
    %203 = arith.truncf %202 : vector<8x32xf32> to vector<8x32xbf16>
    %c0_72 = arith.constant 0 : index
    %c64_73 = arith.constant 64 : index
    %204 = vector.load %arg12[%c0_72, %c64_73] : memref<8x128xbf16, #tpu.memory_space<vmem>>, vector<8x32xbf16>
    tpu.vector_store %arg12[%c0_72, %c64_73], %203 {strides = array<i32>} : memref<8x128xbf16, #tpu.memory_space<vmem>>, vector<8x32xbf16>,
    %205 = vector.extract_strided_slice %28 {offsets = [0, 96], sizes = [8, 32], strides = [1, 1]} : vector<8x128xf32> to vector<8x32xf32>
    %206 = arith.truncf %205 : vector<8x32xf32> to vector<8x32xbf16>
    %207 = vector.extract_strided_slice %30 {offsets = [0, 96], sizes = [8, 32], strides = [1, 1]} : vector<8x128xf32> to vector<8x32xf32>
    %208 = arith.truncf %207 : vector<8x32xf32> to vector<8x32xbf16>
    %209 = vector.extract_strided_slice %31 {offsets = [0, 96], sizes = [8, 32], strides = [1, 1]} : vector<8x128xf32> to vector<8x32xf32>
    %210 = arith.truncf %209 : vector<8x32xf32> to vector<8x32xbf16>
    %cst_74 = arith.constant dense<0.000000e+00> : vector<8x8xf32>
    %211 = tpu.matmul %206, %208, %cst_74 {dimension_numbers = #tpu.dot_dimension_numbers<[1], [1], [0], [0], [0, 0, 1, 0], [], []>} : vector<8x32xbf16>, vector<8x32xbf16>, vector<8x8xf32> -> vector<8x8xf32>
    %cst_75 = arith.constant 0.176776692 : f32
    %212 = vector.broadcast %cst_75 : f32 to vector<8x8xf32>
    %213 = arith.mulf %211, %212 : vector<8x8xf32>
    %cst_76 = arith.constant dense<0xFF800000> : vector<8xf32>
    %214 = vector.multi_reduction <maximumf>, %213, %cst_76 [1] : vector<8x8xf32> to vector<8xf32>
    %215 = vector.shape_cast %214 : vector<8xf32> to vector<8x1xf32>
    %216 = vector.broadcast %215 : vector<8x1xf32> to vector<8x8xf32>
    %217 = arith.subf %213, %216 : vector<8x8xf32>
    %218 = math.exp %217 : vector<8x8xf32>
    %cst_77 = arith.constant dense<0.000000e+00> : vector<8xf32>
    %219 = vector.multi_reduction <add>, %218, %cst_77 [1] : vector<8x8xf32> to vector<8xf32>
    %220 = vector.shape_cast %219 : vector<8xf32> to vector<8x1xf32>
    %221 = tpu.reciprocal %220 {approx = true} : vector<8x1xf32> -> vector<8x1xf32>
    %222 = vector.broadcast %221 : vector<8x1xf32> to vector<8x8xf32>
    %223 = arith.mulf %218, %222 : vector<8x8xf32>
    %224 = arith.truncf %223 : vector<8x8xf32> to vector<8x8xbf16>
    %cst_78 = arith.constant dense<0.000000e+00> : vector<8x32xf32>
    %225 = tpu.matmul %224, %210, %cst_78 {dimension_numbers = #tpu.dot_dimension_numbers<[1], [0], [0], [1], [0, 0, 1, 1], [], []>} : vector<8x8xbf16>, vector<8x32xbf16>, vector<8x32xf32> -> vector<8x32xf32>
    %226 = arith.truncf %225 : vector<8x32xf32> to vector<8x32xbf16>
    %c0_79 = arith.constant 0 : index
    %c96_80 = arith.constant 96 : index
    %227 = vector.load %arg12[%c0_79, %c96_80] : memref<8x128xbf16, #tpu.memory_space<vmem>>, vector<8x32xbf16>
    tpu.vector_store %arg12[%c0_79, %c96_80], %226 {strides = array<i32>} : memref<8x128xbf16, #tpu.memory_space<vmem>>, vector<8x32xbf16>,
    %c0_81 = arith.constant 0 : index
    %c0_82 = arith.constant 0 : index
    %228 = vector.load %arg12[%c0_81, %c0_82] : memref<8x128xbf16, #tpu.memory_space<vmem>>, vector<8x128xbf16>
    %c0_83 = arith.constant 0 : index
    %c0_84 = arith.constant 0 : index
    %229 = vector.load %arg9[%c0_83, %c0_84] : memref<128x128xbf16, #tpu.memory_space<vmem>>, vector<128x128xbf16>
    %cst_85 = arith.constant dense<0.000000e+00> : vector<8x128xf32>
    %230 = tpu.matmul %228, %229, %cst_85 {dimension_numbers = #tpu.dot_dimension_numbers<[1], [0], [0], [1], [0, 0, 1, 1], [], []>} : vector<8x128xbf16>, vector<128x128xbf16>, vector<8x128xf32> -> vector<8x128xf32>
    %231 = vector.extract_strided_slice %7 {offsets = [1, 0], sizes = [1, 128], strides = [1, 1]} : vector<2x128xf32> to vector<1x128xf32>
    %232 = vector.broadcast %231 : vector<1x128xf32> to vector<8x128xf32>
    %233 = arith.addf %230, %232 : vector<8x128xf32>
    %c0_86 = arith.constant 0 : index
    %c0_87 = arith.constant 0 : index
    %c128 = arith.constant 128 : index
    %234 = vector.load %arg11[%c0_86, %c0_87, %c128] : memref<1x8x384xf32, #tpu.memory_space<vmem>>, vector<1x8x128xf32>
    %235 = vector.shape_cast %234 : vector<1x8x128xf32> to vector<8x128xf32>
    %236 = vector.shape_cast %233 : vector<8x128xf32> to vector<1x8x128xf32>
    tpu.vector_store %arg11[%c0_86, %c0_87, %c128], %236 {strides = array<i32>} : memref<1x8x384xf32, #tpu.memory_space<vmem>>, vector<1x8x128xf32>,
    %237 = vector.extract_strided_slice %32 {offsets = [0, 0], sizes = [8, 32], strides = [1, 1]} : vector<8x128xf32> to vector<8x32xf32>
    %238 = arith.truncf %237 : vector<8x32xf32> to vector<8x32xbf16>
    %239 = vector.extract_strided_slice %33 {offsets = [0, 0], sizes = [8, 32], strides = [1, 1]} : vector<8x128xf32> to vector<8x32xf32>
    %240 = arith.truncf %239 : vector<8x32xf32> to vector<8x32xbf16>
    %241 = vector.extract_strided_slice %34 {offsets = [0, 0], sizes = [8, 32], strides = [1, 1]} : vector<8x128xf32> to vector<8x32xf32>
    %242 = arith.truncf %241 : vector<8x32xf32> to vector<8x32xbf16>
    %cst_88 = arith.constant dense<0.000000e+00> : vector<8x8xf32>
    %243 = tpu.matmul %238, %240, %cst_88 {dimension_numbers = #tpu.dot_dimension_numbers<[1], [1], [0], [0], [0, 0, 1, 0], [], []>} : vector<8x32xbf16>, vector<8x32xbf16>, vector<8x8xf32> -> vector<8x8xf32>
    %cst_89 = arith.constant 0.176776692 : f32
    %244 = vector.broadcast %cst_89 : f32 to vector<8x8xf32>
    %245 = arith.mulf %243, %244 : vector<8x8xf32>
    %cst_90 = arith.constant dense<0xFF800000> : vector<8xf32>
    %246 = vector.multi_reduction <maximumf>, %245, %cst_90 [1] : vector<8x8xf32> to vector<8xf32>
    %247 = vector.shape_cast %246 : vector<8xf32> to vector<8x1xf32>
    %248 = vector.broadcast %247 : vector<8x1xf32> to vector<8x8xf32>
    %249 = arith.subf %245, %248 : vector<8x8xf32>
    %250 = math.exp %249 : vector<8x8xf32>
    %cst_91 = arith.constant dense<0.000000e+00> : vector<8xf32>
    %251 = vector.multi_reduction <add>, %250, %cst_91 [1] : vector<8x8xf32> to vector<8xf32>
    %252 = vector.shape_cast %251 : vector<8xf32> to vector<8x1xf32>
    %253 = tpu.reciprocal %252 {approx = true} : vector<8x1xf32> -> vector<8x1xf32>
    %254 = vector.broadcast %253 : vector<8x1xf32> to vector<8x8xf32>
    %255 = arith.mulf %250, %254 : vector<8x8xf32>
    %256 = arith.truncf %255 : vector<8x8xf32> to vector<8x8xbf16>
    %cst_92 = arith.constant dense<0.000000e+00> : vector<8x32xf32>
    %257 = tpu.matmul %256, %242, %cst_92 {dimension_numbers = #tpu.dot_dimension_numbers<[1], [0], [0], [1], [0, 0, 1, 1], [], []>} : vector<8x8xbf16>, vector<8x32xbf16>, vector<8x32xf32> -> vector<8x32xf32>
    %258 = arith.truncf %257 : vector<8x32xf32> to vector<8x32xbf16>
    %c0_93 = arith.constant 0 : index
    %c0_94 = arith.constant 0 : index
    %259 = vector.load %arg12[%c0_93, %c0_94] : memref<8x128xbf16, #tpu.memory_space<vmem>>, vector<8x32xbf16>
    tpu.vector_store %arg12[%c0_93, %c0_94], %258 {strides = array<i32>} : memref<8x128xbf16, #tpu.memory_space<vmem>>, vector<8x32xbf16>,
    %260 = vector.extract_strided_slice %32 {offsets = [0, 32], sizes = [8, 32], strides = [1, 1]} : vector<8x128xf32> to vector<8x32xf32>
    %261 = arith.truncf %260 : vector<8x32xf32> to vector<8x32xbf16>
    %262 = vector.extract_strided_slice %33 {offsets = [0, 32], sizes = [8, 32], strides = [1, 1]} : vector<8x128xf32> to vector<8x32xf32>
    %263 = arith.truncf %262 : vector<8x32xf32> to vector<8x32xbf16>
    %264 = vector.extract_strided_slice %34 {offsets = [0, 32], sizes = [8, 32], strides = [1, 1]} : vector<8x128xf32> to vector<8x32xf32>
    %265 = arith.truncf %264 : vector<8x32xf32> to vector<8x32xbf16>
    %cst_95 = arith.constant dense<0.000000e+00> : vector<8x8xf32>
    %266 = tpu.matmul %261, %263, %cst_95 {dimension_numbers = #tpu.dot_dimension_numbers<[1], [1], [0], [0], [0, 0, 1, 0], [], []>} : vector<8x32xbf16>, vector<8x32xbf16>, vector<8x8xf32> -> vector<8x8xf32>
    %cst_96 = arith.constant 0.176776692 : f32
    %267 = vector.broadcast %cst_96 : f32 to vector<8x8xf32>
    %268 = arith.mulf %266, %267 : vector<8x8xf32>
    %cst_97 = arith.constant dense<0xFF800000> : vector<8xf32>
    %269 = vector.multi_reduction <maximumf>, %268, %cst_97 [1] : vector<8x8xf32> to vector<8xf32>
    %270 = vector.shape_cast %269 : vector<8xf32> to vector<8x1xf32>
    %271 = vector.broadcast %270 : vector<8x1xf32> to vector<8x8xf32>
    %272 = arith.subf %268, %271 : vector<8x8xf32>
    %273 = math.exp %272 : vector<8x8xf32>
    %cst_98 = arith.constant dense<0.000000e+00> : vector<8xf32>
    %274 = vector.multi_reduction <add>, %273, %cst_98 [1] : vector<8x8xf32> to vector<8xf32>
    %275 = vector.shape_cast %274 : vector<8xf32> to vector<8x1xf32>
    %276 = tpu.reciprocal %275 {approx = true} : vector<8x1xf32> -> vector<8x1xf32>
    %277 = vector.broadcast %276 : vector<8x1xf32> to vector<8x8xf32>
    %278 = arith.mulf %273, %277 : vector<8x8xf32>
    %279 = arith.truncf %278 : vector<8x8xf32> to vector<8x8xbf16>
    %cst_99 = arith.constant dense<0.000000e+00> : vector<8x32xf32>
    %280 = tpu.matmul %279, %265, %cst_99 {dimension_numbers = #tpu.dot_dimension_numbers<[1], [0], [0], [1], [0, 0, 1, 1], [], []>} : vector<8x8xbf16>, vector<8x32xbf16>, vector<8x32xf32> -> vector<8x32xf32>
    %281 = arith.truncf %280 : vector<8x32xf32> to vector<8x32xbf16>
    %c0_100 = arith.constant 0 : index
    %c32_101 = arith.constant 32 : index
    %282 = vector.load %arg12[%c0_100, %c32_101] : memref<8x128xbf16, #tpu.memory_space<vmem>>, vector<8x32xbf16>
    tpu.vector_store %arg12[%c0_100, %c32_101], %281 {strides = array<i32>} : memref<8x128xbf16, #tpu.memory_space<vmem>>, vector<8x32xbf16>,
    %283 = vector.extract_strided_slice %32 {offsets = [0, 64], sizes = [8, 32], strides = [1, 1]} : vector<8x128xf32> to vector<8x32xf32>
    %284 = arith.truncf %283 : vector<8x32xf32> to vector<8x32xbf16>
    %285 = vector.extract_strided_slice %33 {offsets = [0, 64], sizes = [8, 32], strides = [1, 1]} : vector<8x128xf32> to vector<8x32xf32>
    %286 = arith.truncf %285 : vector<8x32xf32> to vector<8x32xbf16>
    %287 = vector.extract_strided_slice %34 {offsets = [0, 64], sizes = [8, 32], strides = [1, 1]} : vector<8x128xf32> to vector<8x32xf32>
    %288 = arith.truncf %287 : vector<8x32xf32> to vector<8x32xbf16>
    %cst_102 = arith.constant dense<0.000000e+00> : vector<8x8xf32>
    %289 = tpu.matmul %284, %286, %cst_102 {dimension_numbers = #tpu.dot_dimension_numbers<[1], [1], [0], [0], [0, 0, 1, 0], [], []>} : vector<8x32xbf16>, vector<8x32xbf16>, vector<8x8xf32> -> vector<8x8xf32>
    %cst_103 = arith.constant 0.176776692 : f32
    %290 = vector.broadcast %cst_103 : f32 to vector<8x8xf32>
    %291 = arith.mulf %289, %290 : vector<8x8xf32>
    %cst_104 = arith.constant dense<0xFF800000> : vector<8xf32>
    %292 = vector.multi_reduction <maximumf>, %291, %cst_104 [1] : vector<8x8xf32> to vector<8xf32>
    %293 = vector.shape_cast %292 : vector<8xf32> to vector<8x1xf32>
    %294 = vector.broadcast %293 : vector<8x1xf32> to vector<8x8xf32>
    %295 = arith.subf %291, %294 : vector<8x8xf32>
    %296 = math.exp %295 : vector<8x8xf32>
    %cst_105 = arith.constant dense<0.000000e+00> : vector<8xf32>
    %297 = vector.multi_reduction <add>, %296, %cst_105 [1] : vector<8x8xf32> to vector<8xf32>
    %298 = vector.shape_cast %297 : vector<8xf32> to vector<8x1xf32>
    %299 = tpu.reciprocal %298 {approx = true} : vector<8x1xf32> -> vector<8x1xf32>
    %300 = vector.broadcast %299 : vector<8x1xf32> to vector<8x8xf32>
    %301 = arith.mulf %296, %300 : vector<8x8xf32>
    %302 = arith.truncf %301 : vector<8x8xf32> to vector<8x8xbf16>
    %cst_106 = arith.constant dense<0.000000e+00> : vector<8x32xf32>
    %303 = tpu.matmul %302, %288, %cst_106 {dimension_numbers = #tpu.dot_dimension_numbers<[1], [0], [0], [1], [0, 0, 1, 1], [], []>} : vector<8x8xbf16>, vector<8x32xbf16>, vector<8x32xf32> -> vector<8x32xf32>
    %304 = arith.truncf %303 : vector<8x32xf32> to vector<8x32xbf16>
    %c0_107 = arith.constant 0 : index
    %c64_108 = arith.constant 64 : index
    %305 = vector.load %arg12[%c0_107, %c64_108] : memref<8x128xbf16, #tpu.memory_space<vmem>>, vector<8x32xbf16>
    tpu.vector_store %arg12[%c0_107, %c64_108], %304 {strides = array<i32>} : memref<8x128xbf16, #tpu.memory_space<vmem>>, vector<8x32xbf16>,
    %306 = vector.extract_strided_slice %32 {offsets = [0, 96], sizes = [8, 32], strides = [1, 1]} : vector<8x128xf32> to vector<8x32xf32>
    %307 = arith.truncf %306 : vector<8x32xf32> to vector<8x32xbf16>
    %308 = vector.extract_strided_slice %33 {offsets = [0, 96], sizes = [8, 32], strides = [1, 1]} : vector<8x128xf32> to vector<8x32xf32>
    %309 = arith.truncf %308 : vector<8x32xf32> to vector<8x32xbf16>
    %310 = vector.extract_strided_slice %34 {offsets = [0, 96], sizes = [8, 32], strides = [1, 1]} : vector<8x128xf32> to vector<8x32xf32>
    %311 = arith.truncf %310 : vector<8x32xf32> to vector<8x32xbf16>
    %cst_109 = arith.constant dense<0.000000e+00> : vector<8x8xf32>
    %312 = tpu.matmul %307, %309, %cst_109 {dimension_numbers = #tpu.dot_dimension_numbers<[1], [1], [0], [0], [0, 0, 1, 0], [], []>} : vector<8x32xbf16>, vector<8x32xbf16>, vector<8x8xf32> -> vector<8x8xf32>
    %cst_110 = arith.constant 0.176776692 : f32
    %313 = vector.broadcast %cst_110 : f32 to vector<8x8xf32>
    %314 = arith.mulf %312, %313 : vector<8x8xf32>
    %cst_111 = arith.constant dense<0xFF800000> : vector<8xf32>
    %315 = vector.multi_reduction <maximumf>, %314, %cst_111 [1] : vector<8x8xf32> to vector<8xf32>
    %316 = vector.shape_cast %315 : vector<8xf32> to vector<8x1xf32>
    %317 = vector.broadcast %316 : vector<8x1xf32> to vector<8x8xf32>
    %318 = arith.subf %314, %317 : vector<8x8xf32>
    %319 = math.exp %318 : vector<8x8xf32>
    %cst_112 = arith.constant dense<0.000000e+00> : vector<8xf32>
    %320 = vector.multi_reduction <add>, %319, %cst_112 [1] : vector<8x8xf32> to vector<8xf32>
    %321 = vector.shape_cast %320 : vector<8xf32> to vector<8x1xf32>
    %322 = tpu.reciprocal %321 {approx = true} : vector<8x1xf32> -> vector<8x1xf32>
    %323 = vector.broadcast %322 : vector<8x1xf32> to vector<8x8xf32>
    %324 = arith.mulf %319, %323 : vector<8x8xf32>
    %325 = arith.truncf %324 : vector<8x8xf32> to vector<8x8xbf16>
    %cst_113 = arith.constant dense<0.000000e+00> : vector<8x32xf32>
    %326 = tpu.matmul %325, %311, %cst_113 {dimension_numbers = #tpu.dot_dimension_numbers<[1], [0], [0], [1], [0, 0, 1, 1], [], []>} : vector<8x8xbf16>, vector<8x32xbf16>, vector<8x32xf32> -> vector<8x32xf32>
    %327 = arith.truncf %326 : vector<8x32xf32> to vector<8x32xbf16>
    %c0_114 = arith.constant 0 : index
    %c96_115 = arith.constant 96 : index
    %328 = vector.load %arg12[%c0_114, %c96_115] : memref<8x128xbf16, #tpu.memory_space<vmem>>, vector<8x32xbf16>
    tpu.vector_store %arg12[%c0_114, %c96_115], %327 {strides = array<i32>} : memref<8x128xbf16, #tpu.memory_space<vmem>>, vector<8x32xbf16>,
    %c0_116 = arith.constant 0 : index
    %c0_117 = arith.constant 0 : index
    %329 = vector.load %arg12[%c0_116, %c0_117] : memref<8x128xbf16, #tpu.memory_space<vmem>>, vector<8x128xbf16>
    %c0_118 = arith.constant 0 : index
    %c0_119 = arith.constant 0 : index
    %330 = vector.load %arg9[%c0_118, %c0_119] : memref<128x128xbf16, #tpu.memory_space<vmem>>, vector<128x128xbf16>
    %cst_120 = arith.constant dense<0.000000e+00> : vector<8x128xf32>
    %331 = tpu.matmul %329, %330, %cst_120 {dimension_numbers = #tpu.dot_dimension_numbers<[1], [0], [0], [1], [0, 0, 1, 1], [], []>} : vector<8x128xbf16>, vector<128x128xbf16>, vector<8x128xf32> -> vector<8x128xf32>
    %332 = vector.extract_strided_slice %7 {offsets = [1, 0], sizes = [1, 128], strides = [1, 1]} : vector<2x128xf32> to vector<1x128xf32>
    %333 = vector.broadcast %332 : vector<1x128xf32> to vector<8x128xf32>
    %334 = arith.addf %331, %333 : vector<8x128xf32>
    %c0_121 = arith.constant 0 : index
    %c0_122 = arith.constant 0 : index
    %c256 = arith.constant 256 : index
    %335 = vector.load %arg11[%c0_121, %c0_122, %c256] : memref<1x8x384xf32, #tpu.memory_space<vmem>>, vector<1x8x128xf32>
    %336 = vector.shape_cast %335 : vector<1x8x128xf32> to vector<8x128xf32>
    %337 = vector.shape_cast %334 : vector<8x128xf32> to vector<1x8x128xf32>
    tpu.vector_store %arg11[%c0_121, %c0_122, %c256], %337 {strides = array<i32>} : memref<1x8x384xf32, #tpu.memory_space<vmem>>, vector<1x8x128xf32>,
    return
  }
  func.func @transform_0(%arg0: i32) -> (i32, i32, i32) {
    %c0_i32 = arith.constant 0 : i32
    %c0_i32_0 = arith.constant 0 : i32
    %c0_i32_1 = arith.constant 0 : i32
    return %arg0, %c0_i32, %c0_i32_0 : i32, i32, i32
  }
  func.func @transform_1(%arg0: i32) -> (i32, i32, i32) {
    %c0_i32 = arith.constant 0 : i32
    %c0_i32_0 = arith.constant 0 : i32
    %c0_i32_1 = arith.constant 0 : i32
    return %arg0, %c0_i32, %c0_i32_0 : i32, i32, i32
  }
  func.func @transform_2(%arg0: i32) -> (i32, i32) {
    %c0_i32 = arith.constant 0 : i32
    %c0_i32_0 = arith.constant 0 : i32
    %c0_i32_1 = arith.constant 0 : i32
    return %c0_i32, %c0_i32_0 : i32, i32
  }
  func.func @transform_3(%arg0: i32) -> (i32, i32) {
    %c0_i32 = arith.constant 0 : i32
    %c0_i32_0 = arith.constant 0 : i32
    %c0_i32_1 = arith.constant 0 : i32
    return %c0_i32, %c0_i32_0 : i32, i32
  }
  func.func @transform_4(%arg0: i32) -> (i32, i32) {
    %c0_i32 = arith.constant 0 : i32
    %c0_i32_0 = arith.constant 0 : i32
    %c0_i32_1 = arith.constant 0 : i32
    return %c0_i32, %c0_i32_0 : i32, i32
  }
  func.func @transform_5(%arg0: i32) -> (i32, i32) {
    %c0_i32 = arith.constant 0 : i32
    %c0_i32_0 = arith.constant 0 : i32
    %c0_i32_1 = arith.constant 0 : i32
    return %c0_i32, %c0_i32_0 : i32, i32
  }
  func.func @transform_6(%arg0: i32) -> (i32, i32) {
    %c0_i32 = arith.constant 0 : i32
    %c0_i32_0 = arith.constant 0 : i32
    %c0_i32_1 = arith.constant 0 : i32
    return %c0_i32, %c0_i32_0 : i32, i32
  }
  func.func @transform_7(%arg0: i32) -> (i32, i32) {
    %c0_i32 = arith.constant 0 : i32
    %c0_i32_0 = arith.constant 0 : i32
    %c0_i32_1 = arith.constant 0 : i32
    return %c0_i32, %c0_i32_0 : i32, i32
  }
  func.func @transform_8(%arg0: i32) -> (i32, i32) {
    %c0_i32 = arith.constant 0 : i32
    %c0_i32_0 = arith.constant 0 : i32
    %c0_i32_1 = arith.constant 0 : i32
    return %c0_i32, %c0_i32_0 : i32, i32
  }
  func.func @transform_9(%arg0: i32) -> (i32, i32) {
    %c0_i32 = arith.constant 0 : i32
    %c0_i32_0 = arith.constant 0 : i32
    %c0_i32_1 = arith.constant 0 : i32
    return %c0_i32, %c0_i32_0 : i32, i32
  }
  func.func @transform_10(%arg0: i32) -> (i32, i32, i32) {
    %c0_i32 = arith.constant 0 : i32
    %c0_i32_0 = arith.constant 0 : i32
    %c0_i32_1 = arith.constant 0 : i32
    return %arg0, %c0_i32, %c0_i32_0 : i32, i32, i32
  }
}

</mosaic_0001>

<bundles_post_ra>
// kernel: mutual_transformer_forward.3
= control target key start
LH: loop header
LB: loop body
LE: loop exit
PB: predicated region body
PF: predicated region fallthrough
CT: control target
= control target key end

     0   :  { %s3495_s0 = inlined_call_operand.hbm [shape: f32[2,2,8,128], index: 0, kind: input, shape index: {}]   ;;  %s3496_s1 = inlined_call_operand.hbm [shape: bf16[2,128,384], index: 1, kind: input, shape index: {}]   ;;  %s3497_s2 = inlined_call_operand.hbm [shape: f32[2,1,384], index: 2, kind: input, shape index: {}]   ;;  %s3498_s3 = inlined_call_operand.hbm [shape: bf16[2,128,128], index: 3, kind: input, shape index: {}]   ;;  %s3499_s4 = inlined_call_operand.hbm [shape: bf16[2,128,128], index: 4, kind: input, shape index: {}]   ;;  %s3500_s5 = inlined_call_operand.hbm [shape: bf16[2,128,128], index: 5, kind: input, shape index: {}]   ;;  %s3501_s6 = inlined_call_operand.hbm [shape: f32[2,8,128], index: 6, kind: input, shape index: {}]   ;;  %s3502_s7 = inlined_call_operand.hbm [shape: f32[2,2,8,128], index: 7, kind: output, shape index: {}]  }
   0x1   :  { %3525 = sst [smem:[#allocation32_spill]] %s3496_s1 }
   0x2   :  { %3526 = sst [smem:[#allocation33_spill]] %s3498_s3 }
   0x3   :  { %3527 = sst [smem:[#allocation34_spill]] %s3500_s5 }
   0x4   :  { %3528 = sst [smem:[#allocation35_spill]] %s3501_s6 }
   0x5   :  { %3529 = sst [smem:[#allocation36_spill]] %s3502_s7 }
   0x6   :  { %12 = vsyncpa [#allocation4], 0 }
   0x7   :  { %14 = vsyncpa [#allocation4 + $0x1], 0 }
   0x8   :  { %15 = vsyncpa [#allocation7], 0 }
   0x9   :  { %17 = vsyncpa [#allocation7 + $0x1], 0 }
   0xa   :  { %18 = vsyncpa [#allocation10], 0 }
   0xb   :  { %20 = vsyncpa [#allocation10 + $0x1], 0 }
   0xc   :  { %21 = vsyncpa [#allocation13], 0 }
   0xd   :  { %23 = vsyncpa [#allocation13 + $0x1], 0 }
   0xe   :  { %24 = vsyncpa [#allocation5], 0 }
   0xf   :  { %26 = vsyncpa [#allocation5 + $0x1], 0  ;;  %s2786_s24 = smov 0   ;;  %s2788_s25 = smov 0  }
  0x10   :  { %s2790_s26 = smov 0   ;;  %s2792_s27 = smov 0  }
  0x11   :  { %s2794_s28 = smov 0   ;;  %s2796_s29 = smov 0  }
  0x12   :  { %s2798_s30 = smov 0   ;;  %s2800_s8 = smov 0  }
  0x13   :  { %s2802_s9 = smov 0   ;;  %s2804_s10 = smov 0  }
  0x14   :  { %s2806_s11 = smov 0  }
  0x15 LB: > { %3530 = sst [smem:[#allocation21_spill]] %s2694_s26  ;;  %p3505_p0 = scmp.eq.s32.totalorder %s2726_s11, 0  ;;  %s2726_s11 = sphi %s2806_s11, %s32_s11   ;;  %s2722_s10 = sphi %s2804_s10, %s3587_s10   ;;  %s2718_s9 = sphi %s2802_s9, %s3580_s9   ;;  %s2714_s8 = sphi %s2800_s8, %s3586_s8   ;;  %s2710_s30 = sphi %s2798_s30, %s3579_s30   ;;  %s2706_s29 = sphi %s2796_s29, %s3578_s29   ;;  %s2702_s28 = sphi %s2794_s28, %s3585_s28   ;;  %s2698_s27 = sphi %s2792_s27, %s3584_s27   ;;  %s2694_s26 = sphi %s2790_s26, %s3576_s26   ;;  %s2690_s25 = sphi %s2788_s25, %s3583_s25   ;;  %s2686_s24 = sphi %s2786_s24, %s3582_s24  }
  0x16   : > { %3531 = sst [smem:[#allocation22_spill]] %s2706_s29  ;;  %p86_p1 = scmp.ne.s32.totalorder %s2694_s26, %s2690_s25 }
  0x17   : > { %3532 = sst [smem:[#allocation23_spill]] %s2710_s30  ;;  %p3504_p2 = scmp.lt.s32.totalorder %s2726_s11, 4 }
  0x18   : > { %3533 = sst [smem:[#allocation24_spill]] %s2714_s8  ;;  %p88_p3 = por %p86_p1, %p3505_p0 }
  0x19   : > { %3534 = sst [smem:[#allocation25_spill]] %s2718_s9  ;;  %s2848_s12 = sand.u32 1, %s2726_s11  }
  0x1a   : > { %s2851_s13 = sand.u32 1, %s2694_s26   ;;  %p2856_p4 = pnand %p3504_p2, %p88_p3 }
  0x1b   : > { %s2158_s14 = smul.u32 192, %s2851_s13  ;;  %s3536_s1 = sld [smem:[#allocation32_spill]] }
  0x1c   : > { %s3535_s15 = scalar_select %p2856_p4, 1, 0 }
  0x1d   : > { %s2159_s16 = smul.u32 3072, %s2722_s10  ;;  %s298_s20 = scalar_lea.vmem [#allocation6], %s2158_s14 }
  0x1e   : > { %s305_s21 = sshll.u32 %s298_s20, 4  ;;  %p2873_p6 = pneg %p2856_p4  ;;  %s2866_s21 = int_to_ptr.vmem [resolvable:$true] %s305_s21 }
  0x21   : > { %s2864_s19 = scalar_lea.hbm %s3536_s1, %s2159_s16  ;;  %s2387_s18 = scalar_lea.hbm %s3536_s1, 6144 }
  0x22   : > { %s2382_s23 = scalar_lea.hbm %s2864_s19, 3072  ;;  %p2388_p9 = scmp.lt.u32.totalorder %s2864_s19, %s3536_s1 }
  0x23   : > { %p2383_p5 = scmp.ne.s32.totalorder %s2864_s19, %s2382_s23  ;;  %p2389_p10 = scmp.lt.u32.totalorder %s2387_s18, %s2382_s23 }
  0x24   : > { %p2391_p12 = scmp.lt.u32.totalorder %s2382_s23, %s2864_s19 }
  0x25   : > { %p2385_p7 = pnand %p2873_p6, %p2383_p5  ;;  %p2390_p11 = por %p2389_p10, %p2388_p9 }
  0x27   : > { %p2386_p8 = pneg %p2385_p7  ;;  %p2392_p13 = por %p2391_p12, %p2390_p11 }
  0x29   : > { %p2393_p1 = pnand %p2392_p13, %p2386_p8 }
  0x2b   : > { %2396 = shalt.err (!%p2393_p1)
}
  0x2c   : > { %s2397_s22 = scalar_lea.vmem %s2866_s21, 3072  ;;  %s2728_s16 = smov [#allocation6]  }
  0x2d   : > { %p2398_p3 = scmp.ne.s32.totalorder %s2866_s21, %s2397_s22  ;;  %s2402_s17 = sshll.u32 %s2728_s16, 4  ;;  %s2403_s17 = int_to_ptr.vmem [resolvable:$false] %s2402_s17 }
  0x2e   : > { %s2404_s14 = scalar_lea.vmem %s2403_s17, 6144  ;;  %p2405_p2 = scmp.lt.s32.totalorder %s2866_s21, %s2403_s17 }
  0x2f   : > { %p2400_p5 = pnand %p2398_p3, %p2873_p6  ;;  %p2406_p0 = scmp.lt.s32.totalorder %s2404_s14, %s2397_s22 }
  0x31   : > { %p2401_p7 = pneg %p2400_p5  ;;  %p2407_p9 = por %p2406_p0, %p2405_p2 }
  0x33   : > { %p2408_p10 = pnand %p2407_p9, %p2401_p7 }
  0x35   : > { %2411 = shalt.err (!%p2408_p10)
}
  0x36   : > { %s2729_s23 = smov 192   ;;  %s2730_s18 = smov 12  }
  0x37   : > { %s3538_s20 = scalar_lea.sflag [#allocation7], %s2848_s12  ;;  %p1901_p8 = scmp.ge.s32.totalorder %s2726_s11, 1 }
  0x38   : > { %2186 = dma.hbm_to_vmem [thread:$0]  (!%p2856_p4), %s2864_s19, 3072, %s2866_s21, %s3538_s20, %s2729_s23, %s2729_s23, %s2730_s18  }
  0x39   : > { %p413_p11 = scmp.lt.s32.totalorder %s2726_s11, 5  ;;  %s2901_s22 = sshll.u32 %s2851_s13, 6 }
  0x3a   : > { %s2908_s17 = sshll.u32 %s2722_s10, 10  ;;  %s338_s14 = scalar_lea.vmem [#allocation9], %s2901_s22 }
  0x3b   : > { %p2903_p0 = pnand %p1901_p8, %p413_p11  ;;  %s345_s1 = sshll.u32 %s338_s14, 4  ;;  %s2917_s1 = int_to_ptr.vmem [resolvable:$true] %s345_s1 }
  0x3c   : > { %s3541_s3 = sld [smem:[#allocation33_spill]]  ;;  %s3508_s19 = scalar_lea.sflag [#allocation10], %s2848_s12 }
  0x3d   : > { %s3539_s16 = scalar_select %p2903_p0, 1, 0 }
  0x3f   : > { %3540 = sst [smem:[#allocation26_spill]] %s3539_s16 }
  0x42   : > { %s2915_s6 = scalar_lea.hbm %s3541_s3, %s2908_s17  ;;  %s2417_s20 = scalar_lea.hbm %s3541_s3, 2048 }
  0x43   : > { %s2412_s21 = scalar_lea.hbm %s2915_s6, 1024  ;;  %p2418_p1 = scmp.lt.u32.totalorder %s2915_s6, %s3541_s3 }
  0x44   : > { %p2413_p2 = scmp.ne.s32.totalorder %s2915_s6, %s2412_s21  ;;  %p2419_p3 = scmp.lt.u32.totalorder %s2417_s20, %s2412_s21 }
  0x45   : > { %p2421_p7 = scmp.lt.u32.totalorder %s2412_s21, %s2915_s6 }
  0x46   : > { %p2415_p12 = pnand %p2413_p2, %p2873_p6  ;;  %p2420_p5 = por %p2419_p3, %p2418_p1 }
  0x48   : > { %p2416_p13 = pneg %p2415_p12  ;;  %p2422_p9 = por %p2421_p7, %p2420_p5 }
  0x4a   : > { %p2423_p10 = pnand %p2422_p9, %p2416_p13 }
  0x4c   : > { %2426 = shalt.err (!%p2423_p10)
}
  0x4d   : > { %s2427_s8 = scalar_lea.vmem %s2917_s1, 1024  ;;  %s2731_s23 = smov [#allocation9]  }
  0x4e   : > { %p2428_p8 = scmp.ne.s32.totalorder %s2917_s1, %s2427_s8  ;;  %s2432_s18 = sshll.u32 %s2731_s23, 4  ;;  %s2433_s18 = int_to_ptr.vmem [resolvable:$false] %s2432_s18 }
  0x4f   : > { %s2434_s14 = scalar_lea.vmem %s2433_s18, 2048  ;;  %p2435_p12 = scmp.lt.s32.totalorder %s2917_s1, %s2433_s18 }
  0x50   : > { %p2430_p11 = pnand %p2428_p8, %p2873_p6  ;;  %p2436_p0 = scmp.lt.s32.totalorder %s2434_s14, %s2427_s8 }
  0x52   : > { %p2431_p2 = pneg %p2430_p11  ;;  %p2437_p1 = por %p2436_p0, %p2435_p12 }
  0x54   : > { %p2438_p3 = pnand %p2437_p1, %p2431_p2 }
  0x56   : > { %2441 = shalt.err (!%p2438_p3)
}
  0x57   : > { %s3510_s21 = smov 64   ;;  %s3511_s20 = smov 4  }
  0x58   : > { %2192 = dma.hbm_to_vmem [thread:$0]  (!%p2856_p4), %s2915_s6, 1024, %s2917_s1, %s3508_s19, %s3510_s21, %s3510_s21, %s3511_s20  }
  0x59   : > { %s3542_s5 = sld [smem:[#allocation34_spill]]  ;;  %s380_s18 = scalar_lea.vmem [#allocation12], %s2901_s22 }
  0x5a   : > { %s387_s14 = sshll.u32 %s380_s18, 4  ;;  %s3509_s3 = scalar_lea.sflag [#allocation13], %s2848_s12  ;;  %s2953_s14 = int_to_ptr.vmem [resolvable:$true] %s387_s14 }
  0x5f   : > { %s2950_s23 = scalar_lea.hbm %s3542_s5, %s2908_s17  ;;  %s2447_s30 = scalar_lea.hbm %s3542_s5, 2048 }
  0x60   : > { %s2442_s16 = scalar_lea.hbm %s2950_s23, 1024  ;;  %p2448_p7 = scmp.lt.u32.totalorder %s2950_s23, %s3542_s5 }
  0x61   : > { %p2443_p0 = scmp.ne.s32.totalorder %s2950_s23, %s2442_s16  ;;  %p2449_p9 = scmp.lt.u32.totalorder %s2447_s30, %s2442_s16 }
  0x62   : > { %p2451_p8 = scmp.lt.u32.totalorder %s2442_s16, %s2950_s23 }
  0x63   : > { %p2445_p13 = pnand %p2443_p0, %p2873_p6  ;;  %p2450_p10 = por %p2449_p9, %p2448_p7 }
  0x65   : > { %p2446_p5 = pneg %p2445_p13  ;;  %p2452_p11 = por %p2451_p8, %p2450_p10 }
  0x67   : > { %p2453_p2 = pnand %p2452_p11, %p2446_p5 }
  0x69   : > { %2456 = shalt.err (!%p2453_p2)
}
  0x6a   : > { %s2457_s18 = scalar_lea.vmem %s2953_s14, 1024  ;;  %s2734_s1 = smov [#allocation12]  }
  0x6b   : > { %p2458_p12 = scmp.ne.s32.totalorder %s2953_s14, %s2457_s18  ;;  %s2462_s6 = sshll.u32 %s2734_s1, 4  ;;  %s2463_s6 = int_to_ptr.vmem [resolvable:$false] %s2462_s6 }
  0x6c   : > { %s2464_s19 = scalar_lea.vmem %s2463_s6, 2048  ;;  %p2465_p0 = scmp.lt.s32.totalorder %s2953_s14, %s2463_s6 }
  0x6d   : > { %p2460_p1 = pnand %p2458_p12, %p2873_p6  ;;  %p2466_p13 = scmp.lt.s32.totalorder %s2464_s19, %s2457_s18 }
  0x6f   : > { %p2461_p3 = pneg %p2460_p1  ;;  %p2467_p7 = por %p2466_p13, %p2465_p0 }
  0x71   : > { %p2468_p9 = pnand %p2467_p7, %p2461_p3 }
  0x73   : > { %2471 = shalt.err (!%p2468_p9)
}
  0x74   : > { %2198 = dma.hbm_to_vmem [thread:$0]  (!%p2856_p4), %s2950_s23, 1024, %s2953_s14, %s3509_s3, %s3510_s21, %s3510_s21, %s3511_s20  }
  0x75   : > { %s2983_s16 = sadd.s32 4294967295, %s2726_s11   ;;  %s1882_s30 = sadd.s32 4294967294, %s2726_s11  }
  0x76   : > { %s41_s8 = sadd.s32 1, %s2718_s9  ;;  %s44_s18 = sadd.s32 1, %s2722_s10 }
  0x77   : > { %p42_p5 = scmp.ge.s32.totalorder %s41_s8, 2  ;;  %s53_s1 = sadd.s32 1, %s2706_s29 }
  0x78   : > { %p60_p10 = scmp.ne.s32.totalorder %s2706_s29, %s2702_s28  ;;  %p3544_p8 = scmp.eq.s32.totalorder %s2726_s11, 0 }
  0x79   : > { %s3589_s8 = smov (%p42_p5, %s41_s8), 0  ;;  %s3591_s18 = smov (!%p42_p5, %s44_s18), %s2722_s10 }
  0x7a   : > { %3543 = sst [smem:[#allocation27_spill]] %s3589_s8  ;;  %s49_s23 = ssub.s32 %s2718_s9, %s3589_s8 }
  0x7b   : > { %p3001_p11 = por %p3544_p8, %p60_p10  ;;  %p46_p2 = scmp.ge.s32.totalorder %s3591_s18, 2 }
  0x7c   : > { %p66_p12 = scmp.ne.s32.totalorder %s2702_s28, %s2698_s27  ;;  %p67_p1 = scmp.eq.s32.totalorder %s2983_s16, 0 }
  0x7d   : > { %s79_s6 = sadd.s32 1, %s2694_s26  ;;  %s3593_s18 = smov (%p46_p2, %s3591_s18), 0 }
  0x7e   : > { %3546 = sst [smem:[#allocation28_spill]] %s3593_s18  ;;  %p3014_p3 = por %p67_p1, %p66_p12 }
  0x7f   : > { %p92_p0 = scmp.ne.s32.totalorder %s2690_s25, %s2686_s24  ;;  %s48_s3 = ssub.s32 %s2722_s10, %s3593_s18 }
  0x80   : > { %s3547_s19 = scalar_select %p3014_p3, 1, 0 }
  0x81   : > { %p248_p13 = scmp.eq.s32.totalorder %s2983_s16, 3  ;;  %s50_s21 = sor.u32 %s49_s23, %s48_s3 }
  0x82   : > { %p77_p7 = scmp.eq.s32.totalorder %s48_s3, 0  ;;  %p51_p9 = scmp.eq.s32.totalorder %s50_s21, 0 }
  0x83   : > { %p3023_p5 = por %p92_p0, %p67_p1  ;;  %p3036_p8 = por %p248_p13, %p60_p10 }
  0x84   : > { %s3028_s5 = scalar_select %p77_p7, %s2694_s26, %s79_s6  }
  0x85   : > { %s3548_s20 = scalar_select %p3023_p5, 1, 0 }
  0x86   : > { %3550 = sst [smem:[#allocation30_spill]] %s3028_s5  ;;  %p254_p2 = scmp.eq.s32.totalorder %s1882_s30, 3 }
  0x87   : > { %3549 = sst [smem:[#allocation29_spill]] %s3548_s20  ;;  %s274_s3 = sand.u32 1, %s2706_s29  }
  0x88   : > { %s3031_s8 = scalar_select %p51_p9, %s2706_s29, %s53_s1  }
  0x89   : > { %s3552_s24 = scalar_select %p3036_p8, 1, 0 }
  0x8a   : > { %3551 = sst [smem:[#allocation31_spill]] %s3031_s8  ;;  %s1886_s21 = sshll.u32 %s2722_s10, 1 }
  0x8b   : > { %p3045_p3 = por %p254_p2, %p66_p12  ;;  %s1885_s18 = sshll.u32 %s274_s3, 3 }
  0x8c   : > { %s283_s20 = sadd.s32 %s2718_s9, %s1886_s21  ;;  %s278_s8 = scalar_lea.vmem [#allocation3], %s1885_s18 }
  0x8d   : > { %s3553_s23 = scalar_select %p3045_p3, 1, 0 }
  0x8e   : > { %s1887_s6 = sshll.u32 %s283_s20, 7  ;;  %s287_s30 = sshll.u32 %s278_s8, 4  ;;  %s3055_s30 = int_to_ptr.vmem [resolvable:$true] %s287_s30 }
  0x8f   : > { %s3053_s1 = scalar_lea.hbm %s3495_s0, %s1887_s6  ;;  %p3554_p10 = scmp.lt.s32.totalorder %s2726_s11, 4 }
  0x90   : > { %s2160_s20 = smul.u32 3, %s2851_s13  ;;  %s275_s26 = scalar_lea.sflag [#allocation4], %s274_s3 }
  0x91   : > { %p3061_p12 = pnand %p3554_p10, %p3001_p11  ;;  %s2161_s5 = smul.u32 48, %s2722_s10 }
  0x92   : > { %s2472_s21 = scalar_lea.hbm %s3053_s1, 128  ;;  %s2477_s14 = scalar_lea.hbm %s3495_s0, 512 }
  0x93   : > { %p2473_p1 = scmp.ne.s32.totalorder %s3053_s1, %s2472_s21  ;;  %p2474_p0 = pneg %p3061_p12 }
  0x94   : > { %p2478_p11 = scmp.lt.u32.totalorder %s3053_s1, %s3495_s0  ;;  %p2479_p9 = scmp.lt.u32.totalorder %s2477_s14, %s2472_s21 }
  0x95   : > { %p2475_p13 = pnand %p2474_p0, %p2473_p1  ;;  %p2481_p10 = scmp.lt.u32.totalorder %s2472_s21, %s3053_s1 }
  0x96   : > { %p2480_p2 = por %p2479_p9, %p2478_p11 }
  0x97   : > { %p2476_p7 = pneg %p2475_p13 }
  0x98   : > { %p2482_p3 = por %p2481_p10, %p2480_p2 }
  0x9a   : > { %p2483_p8 = pnand %p2482_p3, %p2476_p7 }
  0x9c   : > { %2486 = shalt.err (!%p2483_p8)
}
  0x9d   : > { %s2487_s3 = scalar_lea.vmem %s3055_s30, 128  ;;  %s2735_s8 = smov [#allocation3]  }
  0x9e   : > { %p2488_p1 = scmp.ne.s32.totalorder %s3055_s30, %s2487_s3  ;;  %s2492_s18 = sshll.u32 %s2735_s8, 4  ;;  %s2493_s18 = int_to_ptr.vmem [resolvable:$false] %s2492_s18 }
  0x9f   : > { %s2494_s9 = scalar_lea.vmem %s2493_s18, 256  ;;  %p2495_p4 = scmp.lt.s32.totalorder %s3055_s30, %s2493_s18 }
  0xa0   : > { %p2490_p13 = pnand %p2488_p1, %p2474_p0  ;;  %p2496_p11 = scmp.lt.s32.totalorder %s2494_s9, %s2487_s3 }
  0xa2   : > { %p2491_p5 = pneg %p2490_p13  ;;  %p2497_p9 = por %p2496_p11, %p2495_p4 }
  0xa4   : > { %p2498_p2 = pnand %p2497_p9, %p2491_p5 }
  0xa6   : > { %2501 = shalt.err (!%p2498_p2)
}
  0xa7   : > { %2183 = dma.hbm_to_vmem [thread:$0]  (!%p3061_p12), %s3053_s1, 128, %s3055_s30, %s275_s26  }
  0xa8   : > { %s3097_s6 = scalar_lea.hbm %s3497_s2, %s2161_s5  ;;  %s319_s29 = scalar_lea.vmem [#allocation8], %s2160_s20 }
  0xa9   : > { %s327_s3 = sshll.u32 %s319_s29, 4  ;;  %s3105_s9 = scalar_lea.hbm %s3499_s4, %s2908_s17  ;;  %s3107_s3 = int_to_ptr.vmem [resolvable:$true] %s327_s3 }
  0xaa   : > { %s359_s1 = scalar_lea.vmem [#allocation11], %s2901_s22  ;;  %s2502_s26 = scalar_lea.hbm %s3097_s6, 48 }
  0xab   : > { %s366_s30 = sshll.u32 %s359_s1, 4  ;;  %p2503_p4 = scmp.ne.s32.totalorder %s3097_s6, %s2502_s26  ;;  %s3133_s30 = int_to_ptr.vmem [resolvable:$true] %s366_s30 }
  0xac   : > { %s2507_s14 = scalar_lea.hbm %s3497_s2, 96  ;;  %p2508_p8 = scmp.lt.u32.totalorder %s3097_s6, %s3497_s2 }
  0xad   : > { %p2505_p3 = pnand %p2503_p4, %p2873_p6  ;;  %p2509_p12 = scmp.lt.u32.totalorder %s2507_s14, %s2502_s26 }
  0xae   : > { %p2511_p7 = scmp.lt.u32.totalorder %s2502_s26, %s3097_s6 }
  0xaf   : > { %p2506_p5 = pneg %p2505_p3  ;;  %p2510_p0 = por %p2509_p12, %p2508_p8 }
  0xb1   : > { %p2512_p10 = por %p2511_p7, %p2510_p0 }
  0xb3   : > { %p2513_p1 = pnand %p2512_p10, %p2506_p5 }
  0xb5   : > { %2516 = shalt.err (!%p2513_p1)
}
  0xb6   : > { %s2517_s22 = scalar_lea.vmem %s3107_s3, 48  ;;  %s2736_s17 = smov [#allocation8]  }
  0xb7   : > { %p2518_p13 = scmp.ne.s32.totalorder %s3107_s3, %s2517_s22  ;;  %s2522_s8 = sshll.u32 %s2736_s17, 4  ;;  %s2523_s8 = int_to_ptr.vmem [resolvable:$false] %s2522_s8 }
  0xb8   : > { %s2524_s18 = scalar_lea.vmem %s2523_s8, 96  ;;  %p2525_p2 = scmp.lt.s32.totalorder %s3107_s3, %s2523_s8 }
  0xb9   : > { %p2520_p11 = pnand %p2518_p13, %p2873_p6  ;;  %p2526_p4 = scmp.lt.s32.totalorder %s2524_s18, %s2517_s22 }
  0xbb   : > { %p2521_p9 = pneg %p2520_p11  ;;  %p2527_p3 = por %p2526_p4, %p2525_p2 }
  0xbd   : > { %p2528_p8 = pnand %p2527_p3, %p2521_p9 }
  0xbf   : > { %2531 = shalt.err (!%p2528_p8)
}
  0xc0   : > { %p3556_p5 = scmp.ne.s32.totalorder %s3535_s15, 0  ;;  %s3557_s1 = scalar_lea.sflag [#allocation7], %s2848_s12 }
  0xc1   : > { %s1899_s26 = sshll.u32 %s2851_s13, 3  ;;  %s2532_s5 = scalar_lea.hbm %s3105_s9, 1024 }
  0xc2   : > { %2189 = dma.hbm_to_vmem [thread:$0]  (!%p3556_p5), %s3097_s6, 48, %s3107_s3, %s3557_s1  }
  0xc3   : > { %p2533_p12 = scmp.ne.s32.totalorder %s3105_s9, %s2532_s5  ;;  %s2537_s20 = scalar_lea.hbm %s3499_s4, 2048 }
  0xc4   : > { %p2538_p10 = scmp.lt.u32.totalorder %s3105_s9, %s3499_s4  ;;  %p2539_p1 = scmp.lt.u32.totalorder %s2537_s20, %s2532_s5 }
  0xc5   : > { %p2535_p0 = pnand %p2533_p12, %p2873_p6  ;;  %p2541_p11 = scmp.lt.u32.totalorder %s2532_s5, %s3105_s9 }
  0xc6   : > { %p2540_p13 = por %p2539_p1, %p2538_p10 }
  0xc7   : > { %p2536_p7 = pneg %p2535_p0 }
  0xc8   : > { %p2542_p9 = por %p2541_p11, %p2540_p13 }
  0xca   : > { %p2543_p2 = pnand %p2542_p9, %p2536_p7 }
  0xcc   : > { %2546 = shalt.err (!%p2543_p2)
}
  0xcd   : > { %s2547_s6 = scalar_lea.vmem %s3133_s30, 1024  ;;  %s2737_s3 = smov [#allocation11]  }
  0xce   : > { %p2548_p4 = scmp.ne.s32.totalorder %s3133_s30, %s2547_s6  ;;  %s2552_s17 = sshll.u32 %s2737_s3, 4  ;;  %s2553_s17 = int_to_ptr.vmem [resolvable:$false] %s2552_s17 }
  0xcf   : > { %s2554_s8 = scalar_lea.vmem %s2553_s17, 2048  ;;  %p2555_p12 = scmp.lt.s32.totalorder %s3133_s30, %s2553_s17 }
  0xd0   : > { %p2550_p3 = pnand %p2548_p4, %p2873_p6  ;;  %p2556_p0 = scmp.lt.s32.totalorder %s2554_s8, %s2547_s6 }
  0xd2   : > { %p2551_p8 = pneg %p2550_p3  ;;  %p2557_p10 = por %p2556_p0, %p2555_p12 }
  0xd4   : > { %p2558_p1 = pnand %p2557_p10, %p2551_p8 }
  0xd6   : > { %2561 = shalt.err (!%p2558_p1)
}
  0xd7   : > { %s3558_s18 = smov 4   ;;  %s3559_s1 = smov 64  }
  0xd8   : > { %s3560_s5 = scalar_lea.sflag [#allocation10], %s2848_s12  ;;  %s1900_s21 = sshll.u32 %s2722_s10, 7 }
  0xd9   : > { %2195 = dma.hbm_to_vmem [thread:$0]  (!%p3556_p5), %s3105_s9, 1024, %s3133_s30, %s3560_s5, %s3559_s1, %s3559_s1, %s3558_s18  }
  0xda   : > { %s3561_s29 = sld [smem:[#allocation35_spill]]  ;;  %s401_s3 = scalar_lea.vmem [#allocation14], %s1899_s26 }
  0xdb   : > { %s408_s17 = sshll.u32 %s401_s3, 4  ;;  %s409_s17 = int_to_ptr.vmem [resolvable:$true] %s408_s17 }
  0xe0   : > { %s3562_s22 = smov %s3561_s29  ;;  %s3166_s6 = scalar_lea.hbm %s3561_s29, %s1900_s21 }
  0xe1   : > { %s2562_s8 = scalar_lea.hbm %s3166_s6, 128  ;;  %s2567_s18 = scalar_lea.hbm %s3562_s22, 256 }
  0xe2   : > { %p2563_p7 = scmp.ne.s32.totalorder %s3166_s6, %s2562_s8  ;;  %p2568_p9 = scmp.lt.u32.totalorder %s3166_s6, %s3562_s22 }
  0xe3   : > { %p2569_p2 = scmp.lt.u32.totalorder %s2567_s18, %s2562_s8  ;;  %p2571_p3 = scmp.lt.u32.totalorder %s2562_s8, %s3166_s6 }
  0xe4   : > { %p2565_p13 = pnand %p2563_p7, %p2873_p6 }
  0xe5   : > { %p2570_p4 = por %p2569_p2, %p2568_p9 }
  0xe6   : > { %p2566_p11 = pneg %p2565_p13 }
  0xe7   : > { %p2572_p8 = por %p2571_p3, %p2570_p4 }
  0xe9   : > { %p2573_p12 = pnand %p2572_p8, %p2566_p11 }
  0xeb   : > { %2576 = shalt.err (!%p2573_p12)
}
  0xec   : > { %s2577_s13 = scalar_lea.vmem %s409_s17, 128  ;;  %s2738_s26 = smov [#allocation14]  }
  0xed   : > { %p2578_p0 = scmp.ne.s32.totalorder %s409_s17, %s2577_s13  ;;  %s2582_s21 = sshll.u32 %s2738_s26, 4  ;;  %s2583_s21 = int_to_ptr.vmem [resolvable:$false] %s2582_s21 }
  0xee   : > { %s2584_s14 = scalar_lea.vmem %s2583_s21, 256  ;;  %p2585_p7 = scmp.lt.s32.totalorder %s409_s17, %s2583_s21 }
  0xef   : > { %p2580_p10 = pnand %p2578_p0, %p2873_p6  ;;  %p2586_p13 = scmp.lt.s32.totalorder %s2584_s14, %s2577_s13 }
  0xf1   : > { %p2581_p1 = pneg %p2580_p10  ;;  %p2587_p5 = por %p2586_p13, %p2585_p7 }
  0xf3   : > { %p2588_p2 = pnand %p2587_p5, %p2581_p1 }
  0xf5   : > { %2591 = shalt.err (!%p2588_p2)
}
  0xf6   : > { %p3563_p9 = scmp.ne.s32.totalorder %s3535_s15, 0  ;;  %s3564_s20 = scalar_lea.sflag [#allocation13], %s2848_s12 }
  0xf7   : > { %s3565_s29 = sld [smem:[#allocation26_spill]] }
  0xf8   : > { %2201 = dma.hbm_to_vmem [thread:$0]  (!%p3563_p9), %s3166_s6, 128, %s409_s17, %s3564_s20  }
  0xfd   : > { %p3566_p11 = scmp.ne.s32.totalorder %s3565_s29, 0 }
  0xfe   : > { %s3192_s7 = sand.u32 (!%p3566_p11), 1, %s2702_s28   ;;  %p3567_p6 = scmp.ne.s32.totalorder (!%p3566_p11), %s3547_s19, 0 }
  0xff   : > { %417 = sbr.rel (%p3566_p11) target bundleno = 3255 (0xcb7), region = 48  ;;  %s1902_s3 = sshll.u32 (!%p3566_p11), %s3192_s7, 3 }
 0x100   : > { %s420_s8 = scalar_lea.sflag (!%p3566_p11), [#allocation4], %s3192_s7  ;;  %s3198_s9 = scalar_lea.vmem (!%p3566_p11), [#allocation3], %s1902_s3 }
 0x106   : > { %2665 = dma.done.wait (%p3567_p6), %s420_s8, 128  }
 0x107   : > { %2667 = vsyncadd (%p3567_p6), %s420_s8, 4294967168  ;;  %s3568_s12 = sld [smem:[#allocation29_spill]]  ;;  %s428_s15 = sand.u32 1, %s2983_s16  }
 0x108   : > { %s3206_s6 = sand.u32 1, %s2690_s25   ;;  %s429_s30 = scalar_lea.sflag [#allocation7], %s428_s15 }
 0x109   : > { %s2162_s17 = smul.u32 192, %s3206_s6 }
 0x10b   : > { %s3209_s18 = scalar_lea.vmem [#allocation6], %s2162_s17 }
 0x10d   : > { %p3569_p5 = scmp.ne.s32.totalorder %s3568_s12, 0 }
 0x10f   : > { %2669 = dma.done.wait (%p3569_p5), %s429_s30, 3120  }
 0x110   : > { %2671 = vsyncadd (%p3569_p5), %s429_s30, 4294964176  ;;  %s2163_s19 = smul.u32 3, %s3206_s6  ;;  %s1903_s1 = sshll.u32 %s3206_s6, 6 }
 0x111   : > { %s447_s16 = scalar_lea.sflag [#allocation10], %s428_s15  ;;  %s3219_s13 = scalar_lea.vmem [#allocation9], %s1903_s1 }
 0x112   : > { %s3217_s5 = scalar_lea.vmem [#allocation8], %s2163_s19 }
 0x113   : > { %2673 = dma.done.wait (%p3569_p5), %s447_s16, 2048  }
 0x114   : > { %2675 = vsyncadd (%p3569_p5), %s447_s16, 4294965248  ;;  %s3225_s26 = scalar_lea.vmem [#allocation11], %s1903_s1  ;;  %s465_s21 = scalar_lea.sflag [#allocation13], %s428_s15 }
 0x115   : > { %s3227_s14 = scalar_lea.vmem [#allocation12], %s1903_s1 }
 0x116   : > { %2677 = dma.done.wait (%p3569_p5), %s465_s21, 1152  }
 0x117   : > { %2679 = vsyncadd (%p3569_p5), %s465_s21, 4294966144  ;;  %v2739_v0 = vmov 0   ;;  %v2740_v1 = vmov 0.0   ;;  %v2306_v2 = vld [vmem:[%s3209_s18 + $0x4] ss:$12 sps:$4 sm:$0xff]   ;;  %vm2741_vm0 = vmmov 0   ;;  %v576_v28 = vlaneseq }
 0x118   : > { %751 = vmatprep.mubr.bf16.mxu0 %v2739_v0  ;;  %2030 = vmatprep.subr.bf16.mxu1 %v2740_v1  ;;  %v2308_v3 = vld [vmem:[%s3209_s18] ss:$12 sps:$4 sm:$0xff]   ;;  %v2309_v4 = vld [vmem:[%s3209_s18 + $0x1c] ss:$12 sps:$4 sm:$0xff]   ;;  %v2311_v5 = vld [vmem:[%s3209_s18 + $0x18] ss:$12 sps:$4 sm:$0xff]  }
 0x119   : > { %719 = vmatprep.subr.bf16.mxu0 %v2306_v2  ;;  %v2312_v6 = vld [vmem:[%s3209_s18 + $0x34] ss:$12 sps:$4 sm:$0xff]   ;;  %v2314_v7 = vld [vmem:[%s3209_s18 + $0x30] ss:$12 sps:$4 sm:$0xff]   ;;  %v2315_v8 = vld [vmem:[%s3209_s18 + $0x4c] ss:$12 sps:$4 sm:$0xff]   ;;  %2046 = vmatprep.mubr.msk.bf16.mxu1 %vm2741_vm0, %v2740_v1 }
 0x11a   : > { %720 = vmatpush1.bf16.msra.mxu0 %v2308_v3  ;;  %v2317_v9 = vld [vmem:[%s3209_s18 + $0x48] ss:$12 sps:$4 sm:$0xff]   ;;  %v2318_v11 = vld [vmem:[%s3209_s18 + $0x64] ss:$12 sps:$4 sm:$0xff]   ;;  %v2331_v12 = vld [vmem:[%s3209_s18 + $0x20] ss:$12 sps:$4 sm:$0xff]  }
 0x11b   : > { %721 = vmatprep.subr.bf16.mxu0 %v2309_v4  ;;  %v2330_v10 = vld [vmem:[%s3209_s18 + $0x8] ss:$12 sps:$4 sm:$0xff]   ;;  %v2320_v13 = vld [vmem:[%s3209_s18 + $0x60] ss:$12 sps:$4 sm:$0xff]   ;;  %v2332_v15 = vld [vmem:[%s3209_s18 + $0x38] ss:$12 sps:$4 sm:$0xff]  }
 0x11c   : > { %2031 = vmatpush3.bf16.msra.mxu1 %v2330_v10  ;;  %v2321_v14 = vld [vmem:[%s3209_s18 + $0x7c] ss:$12 sps:$4 sm:$0xff]   ;;  %v2323_v16 = vld [vmem:[%s3209_s18 + $0x78] ss:$12 sps:$4 sm:$0xff]   ;;  %v2324_v17 = vld [vmem:[%s3209_s18 + $0x94] ss:$12 sps:$4 sm:$0xff]  }
 0x11d   : > { %2032 = vmatprep.subr.bf16.mxu1 %v2740_v1  ;;  %v2333_v18 = vld [vmem:[%s3209_s18 + $0x50] ss:$12 sps:$4 sm:$0xff]   ;;  %v2327_v20 = vld [vmem:[%s3209_s18 + $0xac] ss:$12 sps:$4 sm:$0xff]   ;;  %v2334_v21 = vld [vmem:[%s3209_s18 + $0x68] ss:$12 sps:$4 sm:$0xff]  }
 0x11e   : > { %722 = vmatpush1.bf16.msra.mxu0 %v2311_v5  ;;  %v2326_v19 = vld [vmem:[%s3209_s18 + $0x90] ss:$12 sps:$4 sm:$0xff]   ;;  %v2329_v22 = vld [vmem:[%s3209_s18 + $0xa8] ss:$12 sps:$4 sm:$0xff]   ;;  %v2335_v24 = vld [vmem:[%s3209_s18 + $0x80] ss:$12 sps:$4 sm:$0xff]  }
 0x11f   : > { %723 = vmatprep.subr.bf16.mxu0 %v2312_v6  ;;  %v3259_v23 = vld [vmem:[%s3198_s9] sm:$0xff]  ;;  %v3278_v29 = vshrl.u32 %v576_v28, 7  ;;  %v574_v31 = vld [vmem:[%s3217_s5] sm:$0x7]  ;;  %vm803_vm1 = vcmask 261120   ;;  %s2742_s20 = smov 96  }
 0x120   : > { %2033 = vmatpush3.bf16.msra.mxu1 %v2331_v12  ;;  %v541_v25 = vpack.c.bf16 %v3259_v23, %v3259_v23  ;;  %v2336_v26 = vld [vmem:[%s3209_s18 + $0x98] ss:$12 sps:$4 sm:$0xff]   ;;  %v2337_v27 = vld [vmem:[%s3209_s18 + $0xb0] ss:$12 sps:$4 sm:$0xff]   ;;  %s2743_s29 = smov 64   ;;  %s2744_s8 = smov 32  }
 0x121   : > { %2034 = vmatprep.subr.bf16.mxu1 %v2740_v1  ;;  %v582_v30 = vsub.s32 1, %v3278_v29  ;;  %v578_v32 = vsub.s32 0, %v3278_v29  ;;  %v586_v44 = vsub.s32 2, %v3278_v29  ;;  %vm867_vm2 = vcmask 1043456   ;;  %s1906_s9 = sshll.u32 %s3206_s6, 3  ;;  %s3570_s15 = sld [smem:[#allocation24_spill]] }
 0x122   : > { %724 = vmatpush1.bf16.msra.mxu0 %v2314_v7  ;;  %vm851_vm3 = vcmask 64512   ;;  %vm912_vm4 = vcmask 257024   ;;  %vm1035_vm5 = vcmask 519424   ;;  %vm1155_vm6 = vcmask 781824   ;;  %s477_s12 = scalar_lea.vmem [#allocation14], %s1906_s9  ;;  %s3571_s6 = sld [smem:[#allocation23_spill]] }
 0x123   : > { %725 = vmatprep.subr.bf16.mxu0 %v2315_v8  ;;  %v583_v33 = vrot.slane %v574_v31, %v582_v30  ;;  %v579_v34 = vrot.slane %v574_v31, %v578_v32  ;;  %v587_v45 = vrot.slane %v574_v31, %v586_v44  ;;  %vm1275_vm7 = vcmask 1044224   ;;  %s537_s19 = scalar_lea.vmem [#allocation15], %s1902_s3  ;;  %s1652_s21 = scalar_lea.sflag [#allocation5], %s3192_s7 }
 0x124   : > { %2035 = vmatpush3.bf16.msra.mxu1 %v2332_v15  ;;  %s1667_s1 = sshll.u32 %s537_s19, 4  ;;  %p3573_p3 = scmp.ne.s32.totalorder %s3552_s24, 0  ;;  %s3434_s1 = int_to_ptr.vmem [resolvable:$true] %s1667_s1 }
 0x125   : > { %2036 = vmatprep.subr.bf16.mxu1 %v2740_v1  ;;  %s2745_s3 = smov [#allocation15]  }
 0x126   : > { %726 = vmatpush1.bf16.msra.mxu0 %v2317_v9 }
 0x127   : > { %727 = vmatprep.subr.bf16.mxu0 %v2318_v11  ;;  %s1968_s17 = sshll.u32 %s3570_s15, 1 }
 0x128   : > { %2037 = vmatpush3.bf16.msra.mxu1 %v2333_v18  ;;  %s1663_s30 = sadd.s32 %s3571_s6, %s1968_s17 }
 0x129   : > { %2038 = vmatprep.subr.bf16.mxu1 %v2740_v1  ;;  %s1969_s18 = sshll.u32 %s1663_s30, 7 }
 0x12a   : > { %728 = vmatpush1.bf16.msra.mxu0 %v2320_v13 }
 0x12b   : > { %729 = vmatprep.subr.bf16.mxu0 %v2321_v14 }
 0x12c   : > { %2039 = vmatpush3.bf16.msra.mxu1 %v2334_v21 }
 0x12d   : > { %2040 = vmatprep.subr.bf16.mxu1 %v2740_v1 }
 0x12e   : > { %730 = vmatpush1.bf16.msra.mxu0 %v2323_v16 }
 0x12f   : > { %731 = vmatprep.subr.bf16.mxu0 %v2324_v17 }
 0x130   : > { %2041 = vmatpush3.bf16.msra.mxu1 %v2335_v24 }
 0x131   : > { %2042 = vmatprep.subr.bf16.mxu1 %v2740_v1 }
 0x132   : > { %732 = vmatpush1.bf16.msra.mxu0 %v2326_v19 }
 0x133   : > { %733 = vmatprep.subr.bf16.mxu0 %v2327_v20 }
 0x134   : > { %2043 = vmatpush3.bf16.msra.mxu1 %v2336_v26 }
 0x135   : > { %2044 = vmatprep.subr.bf16.mxu1 %v2740_v1 }
 0x136   : > { %734 = vmatpush1.bf16.msra.mxu0 %v2329_v22 }
 0x137   : > { %2074 = vmatprep.subr.bf16.mxu0 %v2740_v1 }
 0x138   : > { %2045 = vmatpush3.bf16.msra.mxu1 %v2337_v27 }
 0x139   : > { %752 = vmatmul.mubr.bf16.vlgmr.msra.gmra.mrb[0].mxu0 %v541_v25  ;;  %2050 = vmatprep.subr.bf16.mxu1 %v2740_v1 }
 0x13a   : > { %2076 = vmatprep.mubr.msk.bf16.mxu0 %vm2741_vm0, %v2740_v1 }
 0x13b   : > { %2047 = vmatmul.mubr.bf16.vlgmr.msra.gmra.mrb[0].mxu1 %v541_v25 }
 0x13c   : > { %2052 = vmatprep.mubr.msk.bf16.mxu1 %vm2741_vm0, %v2740_v1 }
 0x20c   : > { %v753_v35 = vpop.f32.mrb[0].mxu0 }
 0x20d   : > { %v755_v36 = vpop.f32.mrb[1].mxu0  ;;  %v754_v40 = vadd.f32 %v753_v35, %v579_v34 }
 0x20e   : > { %v756_v37 = vadd.f32 %v755_v36, %v583_v33  ;;  %v757_v38 = vpop.f32.mrb[2].mxu0  ;;  %v794_v46 = vpop.f32.mrb[0].mxu1 }
 0x20f   : > { %v758_v39 = vpop.f32.mrb[3].mxu0  ;;  %v800_v43 = vpack.c.bf16 %v754_v40, %v754_v40  ;;  %v795_v47 = vadd.f32 %v794_v46, %v587_v45  ;;  %v2048_v48 = vpop.f32.mrb[1].mxu1 }
 0x210   : > { %v801_v41 = vpack.c.bf16 %v756_v37, %v756_v37  ;;  %v797_v49 = vpop.f32.mrb[2].mxu1 }
 0x211   : > { %v3300_v50 = vpack.c.bf16 %v795_v47, %v795_v47  ;;  %v2049_v51 = vpop.f32.mrb[3].mxu1 }
 0x212   : > { %918 = vrot.lane.b32.xlu1 %v801_v41, %s2742_s20  ;;  %v808_v42 = vsel %vm803_vm1, %v801_v41, 0 }
 0x213   : > { %2051 = vmatpush3.bf16.xpose.msra.mxu1 %v808_v42  ;;  %v869_v52 = vsel %vm867_vm2, %v3300_v50, 0 }
 0x214   : > { %2056 = vmatprep.subr.bf16.mxu1 %v2740_v1 }
 0x216   : > { %915 = vrot.lane.b32.xlu1 %v800_v43, %s2742_s20 }
 0x21a   : > { %1037 = vrot.lane.b32.xlu1 %v800_v43, %s2743_s29  ;;  %2053 = vmatmul.mubr.msk.bf16.vlgmr.msra.gmra.mrb[4].mxu1 %vm803_vm1, %v800_v43 }
 0x21b   : > { %2058 = vmatprep.mubr.msk.bf16.mxu1 %vm2741_vm0, %v2740_v1  ;;  %2057 = vmatpush3.bf16.msra.mxu1 %v869_v52 }
 0x21c   : > { %2062 = vmatprep.subr.bf16.mxu1 %v2740_v1 }
 0x21e   : > { %1159 = vrot.lane.b32.xlu1 %v801_v41, %s2744_s8 }
 0x222   : > { %1157 = vrot.lane.b32.xlu1 %v800_v43, %s2744_s8 }
 0x284   : > { %v919_v0 = vpop.permute.xlu1 %918 }
 0x285   : > { %v924_v12 = vsel %vm803_vm1, %v919_v0, 0 }
 0x288   : > { %v916_v2 = vpop.permute.xlu1 %915 }
 0x28c   : > { %v1038_v4 = vpop.permute.xlu1 %1037 }
 0x290   : > { %v1160_v7 = vpop.permute.xlu1 %1159 }
 0x291   : > { %v1165_v10 = vsel %vm803_vm1, %v1160_v7, 0 }
 0x294   : > { %v1158_v13 = vpop.permute.xlu1 %1157 }
 0x2ed   : > { %v844_v53 = vpop.f32.mrb[4].mxu1 }
 0x2ee   : > { %v850_v54 = vmul.f32 0.17677669, %v844_v53  ;;  %v2054_v55 = vpop.f32.mrb[5].mxu1 }
 0x2ef   : > { %v847_v56 = vpop.f32.mrb[6].mxu1 }
 0x2f0   : > { %v2055_v57 = vpop.f32.mrb[7].mxu1  ;;  %v852_v58 = vsel %vm851_vm3, %v850_v54, -inf }
 0x2f1   : > { %853 = vmax.xlane.f32.xlu0 %v852_v58 }
 0x37e   : > { %v854_v59 = vpop.xlane.xlu0 %853 }
 0x37f   : > { %v855_v60 = vsub.f32 %v850_v54, %v854_v59 }
 0x381   : > { %v856_v61 = vmul.f32 1.442695, %v855_v60 }
 0x383   : > { %2362 = vpow2.f32 %v856_v61 }
 0x38d   : > { %v2363_v62 = vpop.eup %2362 }
 0x38e   : > { %v858_v63 = vsel %vm851_vm3, %v2363_v62, 0.0 }
 0x38f   : > { %859 = vadd.xlane.f32.xlu0 %v858_v63 }
 0x3a5   : > { %1039 = vrot.lane.b32.xlu0 %v801_v41, %s2743_s29 }
 0x41c   : > { %v860_v3 = vpop.xlane.xlu0 %859 }
 0x41d   : > { %2364 = vrcp.f32 %v860_v3 }
 0x420   : > { %v1040_v5 = vpop.permute.xlu0 %1039 }
 0x421   : > { %v1045_v6 = vsel %vm803_vm1, %v1040_v5, 0 }
 0x422   : > { %2075 = vmatpush3.bf16.xpose.msra.mxu0 %v1045_v6 }
 0x423   : > { %2086 = vmatprep.subr.bf16.mxu0 %v2740_v1 }
 0x427   : > { %v2365_v8 = vpop.eup %2364 }
 0x428   : > { %v862_v9 = vmul.f32 %v2365_v8, %v2363_v62 }
 0x429   : > { %2077 = vmatmul.mubr.msk.bf16.vlgmr.msra.gmra.mrb[4].mxu0 %vm803_vm1, %v1038_v4 }
 0x42a   : > { %2087 = vmatpush3.bf16.xpose.msra.mxu0 %v1165_v10  ;;  %v863_v11 = vpack.c.bf16 %v862_v9, %v862_v9  ;;  %2088 = vmatprep.mubr.msk.bf16.mxu0 %vm2741_vm0, %v2740_v1 }
 0x42b   : > { %2098 = vmatprep.subr.bf16.mxu0 %v2740_v1 }
 0x42c   : > { %2059 = vmatmul.mubr.msk.bf16.vlgmr.msra.gmra.mrb[8].mxu1 %vm851_vm3, %v863_v11 }
 0x42d   : > { %2063 = vmatpush3.bf16.xpose.msra.mxu1 %v924_v12  ;;  %2064 = vmatprep.mubr.msk.bf16.mxu1 %vm2741_vm0, %v2740_v1  ;;  %v2338_v12 = vld [vmem:[%s3219_s13] sm:$0xff]  }
 0x42e   : > { %2068 = vmatprep.subr.bf16.mxu1 %v2740_v1 }
 0x431   : > { %2089 = vmatmul.mubr.msk.bf16.vlgmr.msra.gmra.mrb[8].mxu0 %vm803_vm1, %v1158_v13  ;;  %v2339_v13 = vld [vmem:[%s3219_s13 + $0x8] sm:$0xff]  }
 0x432   : > { %2114 = vmatprep.mubr.msk.bf16.mxu0 %vm2741_vm0, %v2740_v1  ;;  %2099 = vmatpush3.bf16.msra.mxu0 %v2338_v12 }
 0x433   : > { %2100 = vmatprep.subr.bf16.mxu0 %v2740_v1 }
 0x434   : > { %2065 = vmatmul.mubr.msk.bf16.vlgmr.msra.gmra.mrb[12].mxu1 %vm803_vm1, %v916_v2 }
 0x435   : > { %2070 = vmatprep.mubr.msk.bf16.mxu1 %vm2741_vm0, %v2740_v1 }
 0x436   : > { %2101 = vmatpush3.bf16.msra.mxu0 %v2339_v13 }
 0x437   : > { %2102 = vmatprep.subr.bf16.mxu0 %v2740_v1 }
 0x4fc   : > { %v1081_v14 = vpop.f32.mrb[4].mxu0 }
 0x4fd   : > { %v1087_v15 = vmul.f32 0.17677669, %v1081_v14  ;;  %v2078_v16 = vpop.f32.mrb[5].mxu0  ;;  %v2340_v14 = vld [vmem:[%s3219_s13 + $0x10] sm:$0xff]  }
 0x4fe   : > { %v1084_v17 = vpop.f32.mrb[6].mxu0  ;;  %2103 = vmatpush3.bf16.msra.mxu0 %v2340_v14  ;;  %v2342_v16 = vld [vmem:[%s3219_s13 + $0x20] sm:$0xff]  }
 0x4ff   : > { %v905_v18 = vpop.f32.mrb[8].mxu1  ;;  %v2079_v19 = vpop.f32.mrb[7].mxu0  ;;  %v1088_v20 = vsel %vm851_vm3, %v1087_v15, -inf  ;;  %2104 = vmatprep.subr.bf16.mxu0 %v2740_v1 }
 0x500   : > { %v911_v21 = vpack.c.bf16 %v905_v18, %v905_v18  ;;  %1089 = vmax.xlane.f32.xlu0 %v1088_v20  ;;  %v2060_v22 = vpop.f32.mrb[9].mxu1  ;;  %v2343_v18 = vld [vmem:[%s3219_s13 + $0x28] sm:$0xff]  }
 0x501   : > { %v908_v24 = vpop.f32.mrb[10].mxu1 }
 0x502   : > { %913 = vst.msk [vmem:[#allocation2] sm:$0xf] %vm912_vm4, %v911_v21  ;;  %v2061_v25 = vpop.f32.mrb[11].mxu1  ;;  %v2344_v24 = vld [vmem:[%s3219_s13 + $0x30] sm:$0xff]  }
 0x504   : > { %v1201_v26 = vpop.f32.mrb[8].mxu0 }
 0x505   : > { %v2090_v27 = vpop.f32.mrb[9].mxu0  ;;  %v1207_v37 = vmul.f32 0.17677669, %v1201_v26  ;;  %v2345_v26 = vld [vmem:[%s3219_s13 + $0x38] sm:$0xff]  }
 0x506   : > { %v1204_v28 = vpop.f32.mrb[10].mxu0 }
 0x507   : > { %v960_v31 = vpop.f32.mrb[12].mxu1  ;;  %v2091_v33 = vpop.f32.mrb[11].mxu0  ;;  %v1208_v40 = vsel %vm851_vm3, %v1207_v37, -inf }
 0x508   : > { %v966_v34 = vmul.f32 0.17677669, %v960_v31  ;;  %v2066_v35 = vpop.f32.mrb[13].mxu1 }
 0x509   : > { %v963_v36 = vpop.f32.mrb[14].mxu1 }
 0x50a   : > { %v2067_v38 = vpop.f32.mrb[15].mxu1  ;;  %v967_v39 = vsel %vm851_vm3, %v966_v34, -inf }
 0x50b   : > { %968 = vmax.xlane.f32.xlu1 %v967_v39 }
 0x50f   : > { %1209 = vmax.xlane.f32.xlu1 %v1208_v40 }
 0x58d   : > { %v1090_v41 = vpop.xlane.xlu0 %1089 }
 0x58e   : > { %v1091_v42 = vsub.f32 %v1087_v15, %v1090_v41  ;;  %v2341_v15 = vld [vmem:[%s3219_s13 + $0x18] sm:$0xff]   ;;  %s3572_s13 = sld [smem:[#allocation36_spill]] }
 0x58f   : > { %2105 = vmatpush3.bf16.msra.mxu0 %v2341_v15 }
 0x590   : > { %v1092_v43 = vmul.f32 1.442695, %v1091_v42  ;;  %2106 = vmatprep.subr.bf16.mxu0 %v2740_v1 }
 0x592   : > { %2366 = vpow2.f32 %v1092_v43  ;;  %v1296_v43 = vsub.s32 4, %v3278_v29 }
 0x593   : > { %2107 = vmatpush3.bf16.msra.mxu0 %v2342_v16 }
 0x594   : > { %2108 = vmatprep.subr.bf16.mxu0 %v2740_v1 }
 0x597   : > { %2109 = vmatpush3.bf16.msra.mxu0 %v2343_v18  ;;  %v2361_v18 = vld [vmem:[%s3227_s14 + $0x38] sm:$0xff]  }
 0x598   : > { %v969_v45 = vpop.xlane.xlu1 %968  ;;  %2110 = vmatprep.subr.bf16.mxu0 %v2740_v1 }
 0x599   : > { %v970_v46 = vsub.f32 %v966_v34, %v969_v45  ;;  %v3376_v45 = vld [vmem:[%s477_s12] sm:$0xff] }
 0x59a   : > { %v1407_v12 = vrot.slane %v3376_v45, %v582_v30 }
 0x59b   : > { %v971_v52 = vmul.f32 1.442695, %v970_v46  ;;  %2111 = vmatpush3.bf16.msra.mxu0 %v2344_v24  ;;  %v1297_v46 = vrot.slane %v3376_v45, %v1296_v43 }
 0x59c   : > { %v2367_v47 = vpop.eup %2366  ;;  %v1210_v48 = vpop.xlane.xlu1 %1209  ;;  %2112 = vmatprep.subr.bf16.mxu0 %v2740_v1 }
 0x59d   : > { %v1211_v49 = vsub.f32 %v1207_v37, %v1210_v48  ;;  %v1094_v51 = vsel %vm851_vm3, %v2367_v47, 0.0 }
 0x59e   : > { %1095 = vadd.xlane.f32.xlu0 %v1094_v51 }
 0x59f   : > { %v1212_v53 = vmul.f32 1.442695, %v1211_v49  ;;  %2113 = vmatpush3.bf16.msra.mxu0 %v2345_v26 }
 0x5a0   : > { %2138 = vmatprep.subr.bf16.mxu0 %v2740_v1 }
 0x5a1   : > { %2368 = vpow2.f32 %v1212_v53 }
 0x5a2   : > { %2370 = vpow2.f32 %v971_v52 }
 0x5ab   : > { %v2369_v54 = vpop.eup %2368 }
 0x5ac   : > { %v1214_v55 = vsel %vm851_vm3, %v2369_v54, 0.0  ;;  %v2371_v56 = vpop.eup %2370 }
 0x5ad   : > { %1215 = vadd.xlane.f32.xlu1 %v1214_v55  ;;  %v973_v57 = vsel %vm851_vm3, %v2371_v56, 0.0  ;;  %v2347_v55 = vld [vmem:[%s3225_s26 + $0x8] sm:$0xff]  }
 0x5b1   : > { %974 = vadd.xlane.f32.xlu1 %v973_v57 }
 0x5b4   : > { %980 = vrot.lane.b32.xlu0 %v3300_v50, %s2742_s20 }
 0x5c2   : > { %1100 = vrot.lane.b32.xlu1 %v3300_v50, %s2743_s29 }
 0x5c6   : > { %1220 = vrot.lane.b32.xlu1 %v3300_v50, %s2744_s8 }
 0x62b   : > { %v1096_v58 = vpop.xlane.xlu0 %1095 }
 0x62f   : > { %v981_v59 = vpop.permute.xlu0 %980 }
 0x630   : > { %v986_v60 = vsel %vm867_vm2, %v981_v59, 0 }
 0x631   : > { %2069 = vmatpush3.bf16.msra.mxu1 %v986_v60  ;;  %v2349_v60 = vld [vmem:[%s3225_s26 + $0x18] sm:$0xff]  }
 0x632   : > { %2080 = vmatprep.subr.bf16.mxu1 %v2740_v1 }
 0x63a   : > { %v1216_v61 = vpop.xlane.xlu1 %1215 }
 0x63e   : > { %v975_v62 = vpop.xlane.xlu1 %974 }
 0x63f   : > { %2372 = vrcp.f32 %v975_v62  ;;  %v2351_v62 = vld [vmem:[%s3225_s26 + $0x28] sm:$0xff]  }
 0x640   : > { %2374 = vrcp.f32 %v1096_v58 }
 0x641   : > { %2376 = vrcp.f32 %v1216_v61  ;;  %v2350_v61 = vld [vmem:[%s3225_s26 + $0x20] sm:$0xff]  }
 0x642   : > { %v1101_v2 = vpop.permute.xlu1 %1100 }
 0x643   : > { %v1106_v5 = vsel %vm867_vm2, %v1101_v2, 0  ;;  %v2354_v2 = vld [vmem:[%s3227_s14] sm:$0xff]  }
 0x646   : > { %v1221_v6 = vpop.permute.xlu1 %1220 }
 0x647   : > { %v1226_v9 = vsel %vm867_vm2, %v1221_v6, 0  ;;  %v2359_v6 = vld [vmem:[%s3227_s14 + $0x28] sm:$0xff]  }
 0x649   : > { %v2373_v63 = vpop.eup %2372 }
 0x64a   : > { %v977_v0 = vmul.f32 %v2373_v63, %v2371_v56  ;;  %v2375_v4 = vpop.eup %2374  ;;  %v2352_v63 = vld [vmem:[%s3225_s26 + $0x30] sm:$0xff]  }
 0x64b   : > { %v1098_v50 = vmul.f32 %v2375_v4, %v2367_v47  ;;  %v2377_v8 = vpop.eup %2376  ;;  %v2356_v4 = vld [vmem:[%s3227_s14 + $0x10] sm:$0xff]  }
 0x64c   : > { %v978_v3 = vpack.c.bf16 %v977_v0, %v977_v0  ;;  %v1218_v10 = vmul.f32 %v2377_v8, %v2369_v54  ;;  %v2346_v54 = vld [vmem:[%s3225_s26] sm:$0xff]   ;;  %v2353_v0 = vld [vmem:[%s3225_s26 + $0x38] sm:$0xff]  }
 0x64d   : > { %v1099_v7 = vpack.c.bf16 %v1098_v50, %v1098_v50  ;;  %v2358_v50 = vld [vmem:[%s3227_s14 + $0x20] sm:$0xff]  }
 0x64e   : > { %2071 = vmatmul.mubr.msk.bf16.vlgmr.msra.gmra.mrb[16].mxu1 %vm851_vm3, %v978_v3  ;;  %v1219_v11 = vpack.c.bf16 %v1218_v10, %v1218_v10  ;;  %v2355_v3 = vld [vmem:[%s3227_s14 + $0x8] sm:$0xff]   ;;  %v1402_v10 = vrot.slane %v3376_v45, %v578_v32 }
 0x64f   : > { %2081 = vmatpush3.bf16.msra.mxu1 %v1106_v5  ;;  %2082 = vmatprep.mubr.msk.bf16.mxu1 %vm2741_vm0, %v2740_v1  ;;  %v2357_v5 = vld [vmem:[%s3227_s14 + $0x18] sm:$0xff]  }
 0x650   : > { %2092 = vmatprep.subr.bf16.mxu1 %v2740_v1 }
 0x656   : > { %2083 = vmatmul.mubr.msk.bf16.vlgmr.msra.gmra.mrb[20].mxu1 %vm851_vm3, %v1099_v7 }
 0x657   : > { %2093 = vmatpush3.bf16.msra.mxu1 %v1226_v9  ;;  %2094 = vmatprep.mubr.msk.bf16.mxu1 %vm2741_vm0, %v2740_v1 }
 0x658   : > { %2118 = vmatprep.subr.bf16.mxu1 %v2740_v1 }
 0x65e   : > { %2095 = vmatmul.mubr.msk.bf16.vlgmr.msra.gmra.mrb[24].mxu1 %vm851_vm3, %v1219_v11 }
 0x65f   : > { %2134 = vmatprep.mubr.msk.bf16.mxu1 %vm2741_vm0, %v2740_v1  ;;  %2119 = vmatpush3.bf16.msra.mxu1 %v2346_v54 }
 0x660   : > { %2120 = vmatprep.subr.bf16.mxu1 %v2740_v1 }
 0x663   : > { %2121 = vmatpush3.bf16.msra.mxu1 %v2347_v55 }
 0x664   : > { %2122 = vmatprep.subr.bf16.mxu1 %v2740_v1 }
 0x721   : > { %v1022_v17 = vpop.f32.mrb[16].mxu1 }
 0x722   : > { %v1975_v19 = vpack.c.bf16 %v1022_v17, %v1022_v17  ;;  %v2072_v20 = vpop.f32.mrb[17].mxu1  ;;  %v2360_v17 = vld [vmem:[%s3227_s14 + $0x30] sm:$0xff]   ;;  %s2592_s14 = scalar_lea.vmem %s3434_s1, 128 }
 0x723   : > { %v1025_v21 = vpop.f32.mrb[18].mxu1  ;;  %p2593_p4 = scmp.ne.s32.totalorder %s3434_s1, %s2592_s14 }
 0x724   : > { %1032 = vrot.lane.b32.xlu0 %v1975_v19, %s2744_s8  ;;  %v2073_v22 = vpop.f32.mrb[19].mxu1  ;;  %v1428_v19 = vsub.s32 5, %v3278_v29 }
 0x725   : > { %p2594_p8 = pnand %p2593_p4, %p3573_p3 }
 0x726   : > { %v1429_v32 = vrot.slane %v3376_v45, %v1428_v19 }
 0x727   : > { %p2595_p12 = pneg %p2594_p8 }
 0x729   : > { %v1142_v25 = vpop.f32.mrb[20].mxu1 }
 0x72a   : > { %v1976_v27 = vpack.c.bf16 %v1142_v25, %v1142_v25  ;;  %v2084_v28 = vpop.f32.mrb[21].mxu1 }
 0x72b   : > { %v1145_v31 = vpop.f32.mrb[22].mxu1 }
 0x72c   : > { %1152 = vrot.lane.b32.xlu1 %v1976_v27, %s2743_s29  ;;  %v2085_v33 = vpop.f32.mrb[23].mxu1  ;;  %v1538_v27 = vsub.s32 6, %v3278_v29 }
 0x72e   : > { %v1539_v28 = vrot.slane %v3376_v45, %v1538_v27 }
 0x731   : > { %v1262_v34 = vpop.f32.mrb[24].mxu1 }
 0x732   : > { %v1977_v35 = vpack.c.bf16 %v1262_v34, %v1262_v34  ;;  %v2096_v36 = vpop.f32.mrb[25].mxu1 }
 0x733   : > { %v1265_v37 = vpop.f32.mrb[26].mxu1 }
 0x734   : > { %1272 = vrot.lane.b32.xlu0 %v1977_v35, %s2742_s20  ;;  %v2097_v38 = vpop.f32.mrb[27].mxu1  ;;  %s2596_s20 = sshll.u32 %s2745_s3, 4  ;;  %s2597_s20 = int_to_ptr.vmem [resolvable:$false] %s2596_s20 }
 0x735   : > { %s2598_s29 = scalar_lea.vmem %s2597_s20, 256  ;;  %p2599_p0 = scmp.lt.s32.totalorder %s3434_s1, %s2597_s20 }
 0x736   : > { %p2600_p10 = scmp.lt.s32.totalorder %s2598_s29, %s2592_s14 }
 0x738   : > { %p2601_p1 = por %p2600_p10, %p2599_p0 }
 0x73a   : > { %p2602_p7 = pnand %p2601_p1, %p2595_p12 }
 0x796   : > { %v1033_v39 = vpop.permute.xlu0 %1032 }
 0x797   : > { %1036 = vst.msk [vmem:[#allocation2] sm:$0xf] %vm1035_vm5, %v1033_v39 }
 0x79e   : > { %v1153_v40 = vpop.permute.xlu1 %1152 }
 0x79f   : > { %1156 = vst.msk [vmem:[#allocation2] sm:$0xf] %vm1155_vm6, %v1153_v40 }
 0x7a6   : > { %v1273_v41 = vpop.permute.xlu0 %1272 }
 0x7a7   : > { %1276 = vst.msk [vmem:[#allocation2] sm:$0xf] %vm1275_vm7, %v1273_v41 }
 0x7ae   : > { %v1277_v42 = vld [vmem:[#allocation2] sm:$0xf] }
 0x7af   : > { %2115 = vmatmul.mubr.bf16.vlgmr.msra.gmra.mrb[12].mxu0 %v1277_v42 }
 0x7b0   : > { %2154 = vmatprep.mubr.msk.bf16.mxu0 %vm2741_vm0, %v2740_v1  ;;  %2139 = vmatpush3.bf16.msra.mxu0 %v2354_v2 }
 0x7b1   : > { %2140 = vmatprep.subr.bf16.mxu0 %v2740_v1 }
 0x7b4   : > { %2141 = vmatpush3.bf16.msra.mxu0 %v2355_v3 }
 0x7b5   : > { %2142 = vmatprep.subr.bf16.mxu0 %v2740_v1 }
 0x7b8   : > { %2143 = vmatpush3.bf16.msra.mxu0 %v2356_v4 }
 0x7b9   : > { %2144 = vmatprep.subr.bf16.mxu0 %v2740_v1 }
 0x7bc   : > { %2145 = vmatpush3.bf16.msra.mxu0 %v2357_v5 }
 0x7bd   : > { %2146 = vmatprep.subr.bf16.mxu0 %v2740_v1 }
 0x7c0   : > { %2147 = vmatpush3.bf16.msra.mxu0 %v2358_v50 }
 0x7c1   : > { %2148 = vmatprep.subr.bf16.mxu0 %v2740_v1 }
 0x7c4   : > { %2149 = vmatpush3.bf16.msra.mxu0 %v2359_v6 }
 0x7c5   : > { %2150 = vmatprep.subr.bf16.mxu0 %v2740_v1 }
 0x7c8   : > { %2151 = vmatpush3.bf16.msra.mxu0 %v2360_v17 }
 0x7c9   : > { %2152 = vmatprep.subr.bf16.mxu0 %v2740_v1 }
 0x7cc   : > { %2153 = vmatpush3.bf16.msra.mxu0 %v2361_v18 }
 0x882   : > { %v1380_v47 = vpop.f32.mrb[12].mxu0 }
 0x883   : > { %v1381_v48 = vadd.f32 %v1380_v47, %v1297_v46  ;;  %v2116_v49 = vpop.f32.mrb[13].mxu0  ;;  %v1647_v46 = vsub.s32 3, %v3278_v29  ;;  %v1643_v47 = vrot.slane %v3376_v45, %v586_v44 }
 0x884   : > { %v1383_v51 = vpop.f32.mrb[14].mxu0 }
 0x885   : > { %v2117_v52 = vpop.f32.mrb[15].mxu0  ;;  %v1386_v53 = vadd.f32 %v1381_v48, %v3259_v23  ;;  %v2348_v23 = vld [vmem:[%s3225_s26 + $0x10] sm:$0xff]   ;;  %v1648_v51 = vrot.slane %v3376_v45, %v1647_v46  ;;  %s3432_s26 = scalar_lea.hbm %s3572_s13, %s1969_s18 }
 0x886   : > { %2123 = vmatpush3.bf16.msra.mxu1 %v2348_v23 }
 0x887   : > { %1387 = vadd.xlane.f32.xlu1 %v1386_v53  ;;  %2124 = vmatprep.subr.bf16.mxu1 %v2740_v1 }
 0x88a   : > { %2125 = vmatpush3.bf16.msra.mxu1 %v2349_v60 }
 0x88b   : > { %2126 = vmatprep.subr.bf16.mxu1 %v2740_v1 }
 0x88e   : > { %2127 = vmatpush3.bf16.msra.mxu1 %v2350_v61 }
 0x88f   : > { %2128 = vmatprep.subr.bf16.mxu1 %v2740_v1 }
 0x892   : > { %2129 = vmatpush3.bf16.msra.mxu1 %v2351_v62 }
 0x893   : > { %2130 = vmatprep.subr.bf16.mxu1 %v2740_v1 }
 0x896   : > { %2131 = vmatpush3.bf16.msra.mxu1 %v2352_v63 }
 0x897   : > { %2132 = vmatprep.subr.bf16.mxu1 %v2740_v1 }
 0x89a   : > { %2133 = vmatpush3.bf16.msra.mxu1 %v2353_v0 }
 0x914   : > { %v1388_v56 = vpop.xlane.xlu1 %1387 }
 0x915   : > { %v1390_v57 = vmul.f32 0.0078125, %v1388_v56 }
 0x917   : > { %v1391_v58 = vsub.f32 %v1386_v53, %v1390_v57 }
 0x919   : > { %v1392_v59 = vmul.f32 %v1391_v58, %v1391_v58 }
 0x91b   : > { %1393 = vadd.xlane.f32.xlu0 %v1392_v59 }
 0x9a8   : > { %v1394_v7 = vpop.xlane.xlu0 %1393 }
 0x9a9   : > { %v1395_v8 = vmul.f32 0.0078125, %v1394_v7 }
 0x9ab   : > { %v1396_v9 = vadd.f32 1e-05, %v1395_v8 }
 0x9ad   : > { %2378 = vrsqrt.f32 %v1396_v9 }
 0x9b7   : > { %v2379_v11 = vpop.eup %2378 }
 0x9b8   : > { %v1398_v13 = vmul.f32 %v2379_v11, %v1391_v58 }
 0x9ba   : > { %v1403_v14 = vmul.f32 %v1402_v10, %v1398_v13 }
 0x9bc   : > { %v1408_v15 = vadd.f32 %v1407_v12, %v1403_v14 }
 0x9be   : > { %v1409_v16 = vpack.c.bf16 %v1408_v15, %v1408_v15 }
 0x9c0   : > { %2135 = vmatmul.mubr.bf16.vlgmr.msra.gmra.mrb[28].mxu1 %v1409_v16 }
 0xa93   : > { %v1512_v20 = vpop.f32.mrb[28].mxu1 }
 0xa94   : > { %v1513_v21 = vadd.f32 %v1512_v20, %v1429_v32  ;;  %v2136_v22 = vpop.f32.mrb[29].mxu1 }
 0xa95   : > { %v1515_v24 = vpop.f32.mrb[30].mxu1 }
 0xa96   : > { %v1518_v30 = vmax.f32 %v1513_v21, 0.0  ;;  %v2137_v25 = vpop.f32.mrb[31].mxu1 }
 0xa98   : > { %v1519_v26 = vpack.c.bf16 %v1518_v30, %v1518_v30 }
 0xa9a   : > { %2155 = vmatmul.mubr.bf16.vlgmr.msra.gmra.mrb[16].mxu0 %v1519_v26 }
 0xb6d   : > { %v1622_v31 = vpop.f32.mrb[16].mxu0 }
 0xb6e   : > { %v1623_v1 = vadd.f32 %v1622_v31, %v1539_v28  ;;  %v2156_v33 = vpop.f32.mrb[17].mxu0 }
 0xb6f   : > { %v1625_v34 = vpop.f32.mrb[18].mxu0 }
 0xb70   : > { %v2157_v35 = vpop.f32.mrb[19].mxu0  ;;  %v1628_v36 = vadd.f32 %v1623_v1, %v1408_v15 }
 0xb72   : > { %1629 = vadd.xlane.f32.xlu0 %v1628_v36 }
 0xbff   : > { %v1630_v37 = vpop.xlane.xlu0 %1629 }
 0xc00   : > { %v1631_v38 = vmul.f32 0.0078125, %v1630_v37 }
 0xc02   : > { %v1632_v39 = vsub.f32 %v1628_v36, %v1631_v38 }
 0xc04   : > { %v1633_v40 = vmul.f32 %v1632_v39, %v1632_v39 }
 0xc06   : > { %1634 = vadd.xlane.f32.xlu1 %v1633_v40 }
 0xc93   : > { %v1635_v41 = vpop.xlane.xlu1 %1634 }
 0xc94   : > { %v1636_v42 = vmul.f32 0.0078125, %v1635_v41 }
 0xc96   : > { %v1637_v43 = vadd.f32 1e-05, %v1636_v42 }
 0xc98   : > { %2380 = vrsqrt.f32 %v1637_v43 }
 0xca2   : > { %v2381_v48 = vpop.eup %2380 }
 0xca3   : > { %v1639_v49 = vmul.f32 %v2381_v48, %v1632_v39 }
 0xca5   : > { %v1644_v52 = vmul.f32 %v1643_v47, %v1639_v49 }
 0xca7   : > { %v1649_v53 = vadd.f32 %v1648_v51, %v1644_v52 }
 0xca9   : > { %1650 = vst [vmem:[%s537_s19] sm:$0xff] %v1649_v53 }
 0xcaa   : > { %2605 = shalt.err (!%p2602_p7)
}
 0xcab   : > { %s2606_s7 = scalar_lea.hbm %s3432_s26, 128  ;;  %s2610_s12 = scalar_lea.hbm %s3572_s13, 512 }
 0xcac   : > { %p2607_p13 = scmp.ne.s32.totalorder %s3432_s26, %s2606_s7  ;;  %p2611_p11 = scmp.lt.u32.totalorder %s3432_s26, %s3572_s13 }
 0xcad   : > { %p2612_p6 = scmp.lt.u32.totalorder %s2610_s12, %s2606_s7  ;;  %p2614_p4 = scmp.lt.u32.totalorder %s2606_s7, %s3432_s26 }
 0xcae   : > { %p2608_p2 = pnand %p2607_p13, %p3573_p3 }
 0xcaf   : > { %p2613_p5 = por %p2612_p6, %p2611_p11 }
 0xcb0   : > { %p2609_p9 = pneg %p2608_p2 }
 0xcb1   : > { %p2615_p8 = por %p2614_p4, %p2613_p5 }
 0xcb3   : > { %p2616_p12 = pnand %p2615_p8, %p2609_p9 }
 0xcb5   : > { %2619 = shalt.err (!%p2616_p12)
}
 0xcb6   : > { %2178 = dma.vmem_to_hbm [thread:$0]  (%p3573_p3), %s3434_s1, 128, %s3432_s26, %s1652_s21  }
 0xcb7 PF: > { %p2207_p0 = scmp.ge.s32.totalorder %s2726_s11, 2  ;;  %s1679_s17 = sand.u32 1, %s2698_s27  }
 0xcb8   : > { %p3574_p10 = scmp.ne.s32.totalorder %s3553_s23, 0  ;;  %s1680_s30 = scalar_lea.sflag [#allocation5], %s1679_s17 }
 0xcba   : > { %p2203_p1 = pnand %p2207_p0, %p3574_p10 }
 0xcbc   : > { %2681 = dma.done.wait (!%p2203_p1), %s1680_s30, 128  }
 0xcbd   : > { %2683 = vsyncadd (!%p2203_p1), %s1680_s30, 4294967168  ;;  %s32_s11 = sadd.s32 1, %s2726_s11   ;;  %s3575_s18 = sld [smem:[#allocation21_spill]] }
 0xcbe   : > { %p29_p7 = scmp.ge.s32.totalorder %s32_s11, 6   ;;  %s3576_s26 = sld [smem:[#allocation30_spill]] }
 0xcbf   : > { %s3577_s19 = sld [smem:[#allocation22_spill]]  ;;  %s3578_s29 = sld [smem:[#allocation31_spill]] }
 0xcc0   : > { %s3579_s30 = sld [smem:[#allocation25_spill]]  ;;  %s3580_s9 = sld [smem:[#allocation27_spill]] }
 0xcc1   : > { %s3581_s1 = sld [smem:[#allocation28_spill]]  ;;  %s3582_s24 = smov %s2690_s25 }
 0xcc2   : > { %s3584_s27 = smov %s2702_s28  ;;  %s3586_s8 = smov %s2722_s10 }
 0xcc3   : > { %s3583_s25 = smov %s3575_s18  ;;  %31 = sbr.rel (!%p29_p7) target bundleno = 21 (0x15), region = 165 }
 0xcc5   : > { %s3585_s28 = smov %s3577_s19 }
 0xcc7   : > { %s3587_s10 = smov %s3581_s1 }
 0xcca   :  { %1685 = vsyncpa [#allocation4], 1 }
 0xccb   :  { %1687 = vsyncpa [#allocation4 + $0x1], 1 }
 0xccc   :  { %1688 = vsyncpa [#allocation7], 1 }
 0xccd   :  { %1690 = vsyncpa [#allocation7 + $0x1], 1 }
 0xcce   :  { %1691 = vsyncpa [#allocation10], 1 }
 0xccf   :  { %1693 = vsyncpa [#allocation10 + $0x1], 1 }
 0xcd0   :  { %1694 = vsyncpa [#allocation13], 1 }
 0xcd1   :  { %1696 = vsyncpa [#allocation13 + $0x1], 1 }
 0xcd2   :  { %1697 = vsyncpa [#allocation5], 1 }
 0xcd3   :  { %1699 = vsyncpa [#allocation5 + $0x1], 1 }

// kernel: mutual_transformer_forward.5
= control target key start
LH: loop header
LB: loop body
LE: loop exit
PB: predicated region body
PF: predicated region fallthrough
CT: control target
= control target key end

     0   :  { %s5725_s0 = inlined_call_operand.hbm [shape: f32[2,8,128], index: 0, kind: input, shape index: {}]   ;;  %s5726_s1 = inlined_call_operand.hbm [shape: f32[2,8,128], index: 1, kind: input, shape index: {}]   ;;  %s5727_s2 = inlined_call_operand.hbm [shape: bf16[128,384], index: 2, kind: input, shape index: {}]   ;;  %s5728_s3 = inlined_call_operand.hbm [shape: bf16[128,384], index: 3, kind: input, shape index: {}]   ;;  %s5729_s4 = inlined_call_operand.hbm [shape: bf16[128,384], index: 4, kind: input, shape index: {}]   ;;  %s5730_s5 = inlined_call_operand.hbm [shape: bf16[128,384], index: 5, kind: input, shape index: {}]   ;;  %s5731_s6 = inlined_call_operand.hbm [shape: f32[3,384], index: 6, kind: input, shape index: {}]   ;;  %s5732_s7 = inlined_call_operand.hbm [shape: bf16[128,128], index: 7, kind: input, shape index: {}]   ;;  %s5733_s8 = inlined_call_operand.hbm [shape: bf16[128,128], index: 8, kind: input, shape index: {}]   ;;  %s5734_s9 = inlined_call_operand.hbm [shape: f32[2,128], index: 9, kind: input, shape index: {}]   ;;  %s5735_s10 = inlined_call_operand.hbm [shape: f32[2,8,384], index: 10, kind: output, shape index: {}]  }
   0x1   :  { %5745 = sst [smem:[#allocation30_spill]] %s5727_s2 }
   0x2   :  { %5746 = sst [smem:[#allocation31_spill]] %s5728_s3 }
   0x3   :  { %5747 = sst [smem:[#allocation32_spill]] %s5729_s4 }
   0x4   :  { %5748 = sst [smem:[#allocation33_spill]] %s5730_s5 }
   0x5   :  { %5749 = sst [smem:[#allocation34_spill]] %s5731_s6 }
   0x6   :  { %5750 = sst [smem:[#allocation35_spill]] %s5735_s10 }
   0x7   :  { %15 = vsyncpa [#allocation4], 0 }
   0x8   :  { %17 = vsyncpa [#allocation4 + $0x1], 0 }
   0x9   :  { %18 = vsyncpa [#allocation7], 0 }
   0xa   :  { %20 = vsyncpa [#allocation7 + $0x1], 0 }
   0xb   :  { %21 = vsyncpa [#allocation10], 0 }
   0xc   :  { %22 = vsyncpa [#allocation13], 0 }
   0xd   :  { %23 = vsyncpa [#allocation16], 0 }
   0xe   :  { %24 = vsyncpa [#allocation19], 0 }
   0xf   :  { %25 = vsyncpa [#allocation5], 0 }
  0x10   :  { %27 = vsyncpa [#allocation5 + $0x1], 0  ;;  %s4891_s13 = smov 0   ;;  %s4893_s14 = smov 0  }
  0x11   :  { %s4895_s15 = smov 0   ;;  %s4897_s16 = smov 0  }
  0x12 LB: > { %s4815_s17 = smov [#allocation8]   ;;  %s4912_s19 = sadd.s32 4294967295, %s4813_s16   ;;  %s4813_s16 = sphi %s4897_s16, %s5789_s16   ;;  %s4809_s15 = sphi %s4895_s15, %s5788_s15   ;;  %s4805_s14 = sphi %s4893_s14, %s5787_s14   ;;  %s4801_s13 = sphi %s4891_s13, %s5786_s13  }
  0x13   : > { %s296_s18 = sshll.u32 %s4815_s17, 4  ;;  %p3510_p0 = scmp.ge.s32.totalorder %s4813_s16, 1  ;;  %s4917_s18 = int_to_ptr.vmem [resolvable:$true] %s296_s18 }
  0x14   : > { %p5738_p1 = scmp.eq.s32.totalorder %s4912_s19, 0  ;;  %p284_p2 = scmp.lt.s32.totalorder %s4813_s16, 3 }
  0x15   : > { %s4816_s21 = smov [#allocation9]   ;;  %s4817_s24 = smov [#allocation12]  }
  0x16   : > { %p4919_p3 = pnand %p3510_p0, %p284_p2  ;;  %s309_s22 = sshll.u32 %s4816_s21, 4  ;;  %s4932_s22 = int_to_ptr.vmem [resolvable:$true] %s309_s22 }
  0x17   : > { %s335_s25 = sshll.u32 %s4817_s24, 4  ;;  %s5754_s2 = sld [smem:[#allocation30_spill]]  ;;  %s4934_s25 = int_to_ptr.vmem [resolvable:$true] %s335_s25 }
  0x18   : > { %s5751_s20 = scalar_select %p4919_p3, 1, 0 }
  0x19   : > { %p4135_p5 = pneg %p4919_p3 }
  0x1a   : > { %5752 = sst [smem:[#allocation29_spill]] %s5751_s20 }
  0x1b   : > { %p4928_p6 = pnand %p4135_p5, %p5738_p1 }
  0x1d   : > { %s4439_s28 = scalar_lea.hbm %s5754_s2, 3072  ;;  %p4944_p8 = pneg %p4928_p6 }
  0x1e   : > { %p4440_p7 = scmp.ne.s32.totalorder %s5754_s2, %s4439_s28  ;;  %p4446_p11 = scmp.lt.u32.totalorder %s4439_s28, %s5754_s2 }
  0x20   : > { %p4442_p9 = pnand %p4944_p8, %p4440_p7 }
  0x22   : > { %p4443_p10 = pneg %p4442_p9 }
  0x24   : > { %p4448_p12 = pnand %p4446_p11, %p4443_p10 }
  0x26   : > { %4451 = shalt.err (!%p4448_p12)
}
  0x27   : > { %s4452_s21 = scalar_lea.vmem %s4917_s18, 3072  ;;  %p4460_p5 = scmp.lt.s32.totalorder %s4917_s18, %s4917_s18 }
  0x28   : > { %p4453_p13 = scmp.ne.s32.totalorder %s4917_s18, %s4452_s21  ;;  %p4461_p4 = scmp.lt.s32.totalorder %s4452_s21, %s4452_s21 }
  0x2a   : > { %p4455_p0 = pnand %p4453_p13, %p4944_p8  ;;  %p4462_p7 = por %p4461_p4, %p4460_p5 }
  0x2c   : > { %p4456_p2 = pneg %p4455_p0 }
  0x2e   : > { %p4463_p9 = pnand %p4462_p7, %p4456_p2 }
  0x30   : > { %4466 = shalt.err (!%p4463_p9)
}
  0x31   : > { %s5740_s24 = smov 192   ;;  %s5741_s26 = smov 12  }
  0x32   : > { %4138 = dma.hbm_to_vmem [thread:$0]  (!%p4928_p6), %s5754_s2, 3072, %s4917_s18, [#allocation7], %s5740_s24, %s5740_s24, %s5741_s26  }
  0x33   : > { %s5756_s3 = sld [smem:[#allocation31_spill]] }
  0x39   : > { %s4467_s12 = scalar_lea.hbm %s5756_s3, 3072 }
  0x3a   : > { %p4468_p4 = scmp.ne.s32.totalorder %s5756_s3, %s4467_s12  ;;  %p4474_p12 = scmp.lt.u32.totalorder %s4467_s12, %s5756_s3 }
  0x3c   : > { %p4470_p10 = pnand %p4468_p4, %p4944_p8 }
  0x3e   : > { %p4471_p11 = pneg %p4470_p10 }
  0x40   : > { %p4476_p13 = pnand %p4474_p12, %p4471_p11 }
  0x42   : > { %4479 = shalt.err (!%p4476_p13)
}
  0x43   : > { %s4480_s18 = scalar_lea.vmem %s4932_s22, 3072  ;;  %p4488_p7 = scmp.lt.s32.totalorder %s4932_s22, %s4932_s22 }
  0x44   : > { %p4481_p0 = scmp.ne.s32.totalorder %s4932_s22, %s4480_s18  ;;  %p4489_p9 = scmp.lt.s32.totalorder %s4480_s18, %s4480_s18 }
  0x46   : > { %p4483_p2 = pnand %p4481_p0, %p4944_p8  ;;  %p4490_p4 = por %p4489_p9, %p4488_p7 }
  0x48   : > { %p4484_p5 = pneg %p4483_p2 }
  0x4a   : > { %p4491_p10 = pnand %p4490_p4, %p4484_p5 }
  0x4c   : > { %4494 = shalt.err (!%p4491_p10)
}
  0x4d   : > { %4141 = dma.hbm_to_vmem [thread:$0]  (!%p4928_p6), %s5756_s3, 3072, %s4932_s22, [#allocation10], %s5740_s24, %s5740_s24, %s5741_s26  }
  0x4e   : > { %s5757_s5 = sld [smem:[#allocation33_spill]] }
  0x54   : > { %s4495_s29 = scalar_lea.hbm %s5757_s5, 3072 }
  0x55   : > { %p4496_p11 = scmp.ne.s32.totalorder %s5757_s5, %s4495_s29  ;;  %p4502_p0 = scmp.lt.u32.totalorder %s4495_s29, %s5757_s5 }
  0x57   : > { %p4498_p12 = pnand %p4496_p11, %p4944_p8 }
  0x59   : > { %p4499_p13 = pneg %p4498_p12 }
  0x5b   : > { %p4504_p2 = pnand %p4502_p0, %p4499_p13 }
  0x5d   : > { %4507 = shalt.err (!%p4504_p2)
}
  0x5e   : > { %s4508_s22 = scalar_lea.vmem %s4934_s25, 3072  ;;  %p4516_p4 = scmp.lt.s32.totalorder %s4934_s25, %s4934_s25 }
  0x5f   : > { %p4509_p5 = scmp.ne.s32.totalorder %s4934_s25, %s4508_s22  ;;  %p4517_p10 = scmp.lt.s32.totalorder %s4508_s22, %s4508_s22 }
  0x61   : > { %p4511_p7 = pnand %p4509_p5, %p4944_p8  ;;  %p4518_p11 = por %p4517_p10, %p4516_p4 }
  0x63   : > { %p4512_p9 = pneg %p4511_p7 }
  0x65   : > { %p4519_p12 = pnand %p4518_p11, %p4512_p9 }
  0x67   : > { %4522 = shalt.err (!%p4519_p12)
}
  0x68   : > { %4147 = dma.hbm_to_vmem [thread:$0]  (!%p4928_p6), %s5757_s5, 3072, %s4934_s25, [#allocation13], %s5740_s24, %s5740_s24, %s5741_s26  }
  0x69   : > { %s4820_s20 = smov [#allocation15]   ;;  %s4523_s30 = scalar_lea.hbm %s5732_s7, 1024 }
  0x6a   : > { %s359_s27 = sshll.u32 %s4820_s20, 4  ;;  %p4524_p13 = scmp.ne.s32.totalorder %s5732_s7, %s4523_s30  ;;  %s360_s27 = int_to_ptr.vmem [resolvable:$true] %s359_s27 }
  0x6b   : > { %p4530_p5 = scmp.lt.u32.totalorder %s4523_s30, %s5732_s7 }
  0x6c   : > { %p4526_p0 = pnand %p4524_p13, %p4944_p8 }
  0x6e   : > { %p4527_p2 = pneg %p4526_p0 }
  0x70   : > { %p4532_p7 = pnand %p4530_p5, %p4527_p2 }
  0x72   : > { %4535 = shalt.err (!%p4532_p7)
}
  0x73   : > { %s4536_s25 = scalar_lea.vmem %s360_s27, 1024  ;;  %p4544_p11 = scmp.lt.s32.totalorder %s360_s27, %s360_s27 }
  0x74   : > { %p4537_p9 = scmp.ne.s32.totalorder %s360_s27, %s4536_s25  ;;  %p4545_p12 = scmp.lt.s32.totalorder %s4536_s25, %s4536_s25 }
  0x76   : > { %p4539_p4 = pnand %p4537_p9, %p4944_p8  ;;  %p4546_p1 = por %p4545_p12, %p4544_p11 }
  0x78   : > { %p4540_p10 = pneg %p4539_p4 }
  0x7a   : > { %p4547_p3 = pnand %p4546_p1, %p4540_p10 }
  0x7c   : > { %4550 = shalt.err (!%p4547_p3)
}
  0x7d   : > { %s5742_s18 = smov 64   ;;  %s4822_s10 = smov 4  }
  0x7e   : > { %4153 = dma.hbm_to_vmem [thread:$0]  (!%p4928_p6), %s5732_s7, 1024, %s360_s27, [#allocation16], %s5742_s18, %s5742_s18, %s4822_s10  }
  0x7f   : > { %s4823_s29 = smov [#allocation11]   ;;  %s4824_s12 = smov [#allocation14]  }
  0x80   : > { %s322_s30 = sshll.u32 %s4823_s29, 4  ;;  %s349_s17 = sshll.u32 %s4824_s12, 4  ;;  %s323_s30 = int_to_ptr.vmem [resolvable:$true] %s322_s30  ;;  %s5041_s17 = int_to_ptr.vmem [resolvable:$true] %s349_s17 }
  0x81   : > { %s5758_s4 = sld [smem:[#allocation32_spill]] }
  0x87   : > { %s4551_s25 = scalar_lea.hbm %s5758_s4, 3072 }
  0x88   : > { %p4552_p1 = scmp.ne.s32.totalorder %s5758_s4, %s4551_s25  ;;  %p4558_p0 = scmp.lt.u32.totalorder %s4551_s25, %s5758_s4 }
  0x8a   : > { %p4554_p3 = pnand %p4552_p1, %p4944_p8 }
  0x8c   : > { %p4555_p13 = pneg %p4554_p3 }
  0x8e   : > { %p4560_p2 = pnand %p4558_p0, %p4555_p13 }
  0x90   : > { %4563 = shalt.err (!%p4560_p2)
}
  0x91   : > { %s4564_s28 = scalar_lea.vmem %s323_s30, 3072  ;;  %p4572_p4 = scmp.lt.s32.totalorder %s323_s30, %s323_s30 }
  0x92   : > { %p4565_p5 = scmp.ne.s32.totalorder %s323_s30, %s4564_s28  ;;  %p4573_p10 = scmp.lt.s32.totalorder %s4564_s28, %s4564_s28 }
  0x94   : > { %p4567_p7 = pnand %p4565_p5, %p4944_p8  ;;  %p4574_p11 = por %p4573_p10, %p4572_p4 }
  0x96   : > { %p4568_p9 = pneg %p4567_p7 }
  0x98   : > { %p4575_p12 = pnand %p4574_p11, %p4568_p9 }
  0x9a   : > { %4578 = shalt.err (!%p4575_p12)
}
  0x9b   : > { %s5759_s24 = smov 12   ;;  %s5760_s26 = smov 192  }
  0x9c   : > { %4144 = dma.hbm_to_vmem [thread:$0]  (!%p4928_p6), %s5758_s4, 3072, %s323_s30, [#allocation10], %s5760_s26, %s5760_s26, %s5759_s24  }
  0x9d   : > { %s5761_s6 = sld [smem:[#allocation34_spill]] }
  0xa3   : > { %s4579_s25 = scalar_lea.hbm %s5761_s6, 192 }
  0xa4   : > { %p4580_p1 = scmp.ne.s32.totalorder %s5761_s6, %s4579_s25  ;;  %p4586_p0 = scmp.lt.u32.totalorder %s4579_s25, %s5761_s6 }
  0xa6   : > { %p4582_p3 = pnand %p4580_p1, %p4944_p8 }
  0xa8   : > { %p4583_p13 = pneg %p4582_p3 }
  0xaa   : > { %p4588_p2 = pnand %p4586_p0, %p4583_p13 }
  0xac   : > { %4591 = shalt.err (!%p4588_p2)
}
  0xad   : > { %s4592_s30 = scalar_lea.vmem %s5041_s17, 192  ;;  %p4600_p4 = scmp.lt.s32.totalorder %s5041_s17, %s5041_s17 }
  0xae   : > { %p4593_p5 = scmp.ne.s32.totalorder %s5041_s17, %s4592_s30  ;;  %p4601_p10 = scmp.lt.s32.totalorder %s4592_s30, %s4592_s30 }
  0xb0   : > { %p4595_p7 = pnand %p4593_p5, %p4944_p8  ;;  %p4602_p11 = por %p4601_p10, %p4600_p4 }
  0xb2   : > { %p4596_p9 = pneg %p4595_p7 }
  0xb4   : > { %p4603_p12 = pnand %p4602_p11, %p4596_p9 }
  0xb6   : > { %4606 = shalt.err (!%p4603_p12)
}
  0xb7   : > { %4150 = dma.hbm_to_vmem [thread:$0]  (!%p4928_p6), %s5761_s6, 192, %s5041_s17, [#allocation13]  }
  0xb8   : > { %s4825_s26 = smov [#allocation17]   ;;  %s4826_s12 = smov [#allocation18]  }
  0xb9   : > { %s372_s29 = sshll.u32 %s4825_s26, 4  ;;  %s386_s21 = sshll.u32 %s4826_s12, 4  ;;  %s373_s29 = int_to_ptr.vmem [resolvable:$true] %s372_s29  ;;  %s5087_s21 = int_to_ptr.vmem [resolvable:$true] %s386_s21 }
  0xba   : > { %s4607_s20 = scalar_lea.hbm %s5733_s8, 1024 }
  0xbb   : > { %p4608_p1 = scmp.ne.s32.totalorder %s5733_s8, %s4607_s20  ;;  %p4614_p0 = scmp.lt.u32.totalorder %s4607_s20, %s5733_s8 }
  0xbd   : > { %p4610_p3 = pnand %p4608_p1, %p4944_p8 }
  0xbf   : > { %p4611_p13 = pneg %p4610_p3 }
  0xc1   : > { %p4616_p2 = pnand %p4614_p0, %p4611_p13 }
  0xc3   : > { %4619 = shalt.err (!%p4616_p2)
}
  0xc4   : > { %s4620_s18 = scalar_lea.vmem %s373_s29, 1024  ;;  %p4628_p4 = scmp.lt.s32.totalorder %s373_s29, %s373_s29 }
  0xc5   : > { %p4621_p5 = scmp.ne.s32.totalorder %s373_s29, %s4620_s18  ;;  %p4629_p10 = scmp.lt.s32.totalorder %s4620_s18, %s4620_s18 }
  0xc7   : > { %p4623_p7 = pnand %p4621_p5, %p4944_p8  ;;  %p4630_p11 = por %p4629_p10, %p4628_p4 }
  0xc9   : > { %p4624_p9 = pneg %p4623_p7 }
  0xcb   : > { %p4631_p12 = pnand %p4630_p11, %p4624_p9 }
  0xcd   : > { %4634 = shalt.err (!%p4631_p12)
}
  0xce   : > { %s5762_s24 = smov 64   ;;  %s4635_s20 = scalar_lea.hbm %s5734_s9, 32 }
  0xcf   : > { %4156 = dma.hbm_to_vmem [thread:$0]  (!%p4928_p6), %s5733_s8, 1024, %s373_s29, [#allocation16], %s5762_s24, %s5762_s24, %s4822_s10  }
  0xd0   : > { %p4636_p1 = scmp.ne.s32.totalorder %s5734_s9, %s4635_s20  ;;  %p4642_p0 = scmp.lt.u32.totalorder %s4635_s20, %s5734_s9 }
  0xd2   : > { %p4638_p3 = pnand %p4636_p1, %p4944_p8 }
  0xd4   : > { %p4639_p13 = pneg %p4638_p3 }
  0xd6   : > { %p4644_p2 = pnand %p4642_p0, %p4639_p13 }
  0xd8   : > { %4647 = shalt.err (!%p4644_p2)
}
  0xd9   : > { %s4648_s10 = scalar_lea.vmem %s5087_s21, 32  ;;  %p4656_p4 = scmp.lt.s32.totalorder %s5087_s21, %s5087_s21 }
  0xda   : > { %p4649_p5 = scmp.ne.s32.totalorder %s5087_s21, %s4648_s10  ;;  %p4657_p10 = scmp.lt.s32.totalorder %s4648_s10, %s4648_s10 }
  0xdc   : > { %p4651_p7 = pnand %p4649_p5, %p4944_p8  ;;  %p4658_p11 = por %p4657_p10, %p4656_p4 }
  0xde   : > { %p4652_p9 = pneg %p4651_p7 }
  0xe0   : > { %p4659_p12 = pnand %p4658_p11, %p4652_p9 }
  0xe2   : > { %4662 = shalt.err (!%p4659_p12)
}
  0xe3   : > { %4159 = dma.hbm_to_vmem [thread:$0]  (!%p4928_p6), %s5734_s9, 32, %s5087_s21, [#allocation19]  }
  0xe4   : > { %s3509_s23 = sadd.s32 4294967294, %s4813_s16   ;;  %s5135_s11 = sadd.s32 1, %s4813_s16  }
  0xe5   : > { %s37_s24 = ssub.s32 %s4813_s16, %s5135_s11  ;;  %s40_s26 = sadd.s32 1, %s4809_s15 }
  0xe6   : > { %p38_p8 = scmp.eq.s32.totalorder %s37_s24, 0  ;;  %p47_p1 = scmp.ne.s32.totalorder %s4809_s15, %s4805_s14 }
  0xe7   : > { %p48_p3 = scmp.eq.s32.totalorder %s4813_s16, 0  ;;  %p53_p13 = scmp.ne.s32.totalorder %s4805_s14, %s4801_s13 }
  0xe8   : > { %s5146_s12 = scalar_select %p38_p8, %s4809_s15, %s40_s26  }
  0xe9   : > { %p5148_p0 = por %p48_p3, %p47_p1  ;;  %p5764_p2 = scmp.eq.s32.totalorder %s4912_s19, 0 }
  0xea   : > { %p271_p5 = scmp.eq.s32.totalorder %s4912_s19, 1  ;;  %p277_p7 = scmp.eq.s32.totalorder %s3509_s23, 1 }
  0xeb   : > { %p5154_p6 = por %p5764_p2, %p53_p13  ;;  %p4179_p9 = scmp.lt.s32.totalorder %s4813_s16, 2 }
  0xec   : > { %s397_s25 = sand.u32 1, %s4809_s15   ;;  %p5161_p4 = por %p271_p5, %p47_p1 }
  0xed   : > { %s5765_s21 = scalar_select %p5154_p6, 1, 0 }
  0xee   : > { %s5766_s20 = scalar_select %p5161_p4, 1, 0 }
  0xef   : > { %p5165_p10 = por %p277_p7, %p53_p13  ;;  %s5169_s28 = sshll.u32 %s397_s25, 3 }
  0xf0   : > { %s3521_s30 = sshll.u32 %s4813_s16, 7  ;;  %s401_s18 = scalar_lea.vmem [#allocation3], %s5169_s28 }
  0xf1   : > { %s5767_s27 = scalar_select %p5165_p10, 1, 0 }
  0xf2   : > { %s5175_s29 = scalar_lea.hbm %s5725_s0, %s3521_s30  ;;  %s408_s23 = sshll.u32 %s401_s18, 4  ;;  %s5178_s23 = int_to_ptr.vmem [resolvable:$true] %s408_s23 }
  0xf3   : > { %p5182_p11 = pnand %p4179_p9, %p5148_p0  ;;  %s5189_s17 = scalar_lea.hbm %s5726_s1, %s3521_s30 }
  0xf4   : > { %s415_s10 = sand.u32 1, %s4813_s16   ;;  %s398_s3 = scalar_lea.sflag [#allocation4], %s397_s25 }
  0xf5   : > { %s4663_s4 = scalar_lea.hbm %s5175_s29, 128  ;;  %p4665_p8 = pneg %p5182_p11 }
  0xf6   : > { %p4664_p12 = scmp.ne.s32.totalorder %s5175_s29, %s4663_s4  ;;  %s4668_s5 = scalar_lea.hbm %s5725_s0, 256 }
  0xf7   : > { %p4669_p13 = scmp.lt.u32.totalorder %s5175_s29, %s5725_s0  ;;  %p4670_p0 = scmp.lt.u32.totalorder %s4668_s5, %s4663_s4 }
  0xf8   : > { %p4666_p1 = pnand %p4665_p8, %p4664_p12  ;;  %p4672_p5 = scmp.lt.u32.totalorder %s4663_s4, %s5175_s29 }
  0xf9   : > { %p4671_p2 = por %p4670_p0, %p4669_p13 }
  0xfa   : > { %p4667_p3 = pneg %p4666_p1 }
  0xfb   : > { %p4673_p7 = por %p4672_p5, %p4671_p2 }
  0xfd   : > { %p4674_p9 = pnand %p4673_p7, %p4667_p3 }
  0xff   : > { %4677 = shalt.err (!%p4674_p9)
}
 0x100   : > { %s4678_s25 = scalar_lea.vmem %s5178_s23, 128  ;;  %s4827_s30 = smov [#allocation3]  }
 0x101   : > { %p4679_p12 = scmp.ne.s32.totalorder %s5178_s23, %s4678_s25  ;;  %s4683_s26 = sshll.u32 %s4827_s30, 4  ;;  %s4684_s26 = int_to_ptr.vmem [resolvable:$false] %s4683_s26 }
 0x102   : > { %s4685_s6 = scalar_lea.vmem %s4684_s26, 256  ;;  %p4686_p4 = scmp.lt.s32.totalorder %s5178_s23, %s4684_s26 }
 0x103   : > { %p4681_p1 = pnand %p4679_p12, %p4665_p8  ;;  %p4687_p13 = scmp.lt.s32.totalorder %s4685_s6, %s4678_s25 }
 0x105   : > { %p4682_p10 = pneg %p4681_p1  ;;  %p4688_p0 = por %p4687_p13, %p4686_p4 }
 0x107   : > { %p4689_p2 = pnand %p4688_p0, %p4682_p10 }
 0x109   : > { %4692 = shalt.err (!%p4689_p2)
}
 0x10a   : > { %4163 = dma.hbm_to_vmem [thread:$0]  (!%p5182_p11), %s5175_s29, 128, %s5178_s23, %s398_s3  }
 0x10b   : > { %s419_s4 = scalar_lea.vmem [#allocation6], %s5169_s28  ;;  %s416_s22 = scalar_lea.sflag [#allocation7], %s415_s10 }
 0x10c   : > { %s426_s5 = sshll.u32 %s419_s4, 4  ;;  %s4693_s18 = scalar_lea.hbm %s5189_s17, 128  ;;  %s427_s5 = int_to_ptr.vmem [resolvable:$true] %s426_s5 }
 0x10d   : > { %p4694_p4 = scmp.ne.s32.totalorder %s5189_s17, %s4693_s18  ;;  %s4698_s30 = scalar_lea.hbm %s5726_s1, 256 }
 0x10e   : > { %p4699_p5 = scmp.lt.u32.totalorder %s5189_s17, %s5726_s1  ;;  %p4700_p7 = scmp.lt.u32.totalorder %s4698_s30, %s4693_s18 }
 0x10f   : > { %p4696_p10 = pnand %p4694_p4, %p4665_p8  ;;  %p4702_p12 = scmp.lt.u32.totalorder %s4693_s18, %s5189_s17 }
 0x110   : > { %p4701_p9 = por %p4700_p7, %p4699_p5 }
 0x111   : > { %p4697_p3 = pneg %p4696_p10 }
 0x112   : > { %p4703_p1 = por %p4702_p12, %p4701_p9 }
 0x114   : > { %p4704_p13 = pnand %p4703_p1, %p4697_p3 }
 0x116   : > { %4707 = shalt.err (!%p4704_p13)
}
 0x117   : > { %s4708_s3 = scalar_lea.vmem %s427_s5, 128  ;;  %s4828_s28 = smov [#allocation6]  }
 0x118   : > { %p4709_p0 = scmp.ne.s32.totalorder %s427_s5, %s4708_s3  ;;  %s4713_s29 = sshll.u32 %s4828_s28, 4  ;;  %s4714_s29 = int_to_ptr.vmem [resolvable:$false] %s4713_s29 }
 0x119   : > { %s4715_s23 = scalar_lea.vmem %s4714_s29, 256  ;;  %p4716_p10 = scmp.lt.s32.totalorder %s427_s5, %s4714_s29 }
 0x11a   : > { %p4711_p2 = pnand %p4709_p0, %p4665_p8  ;;  %p4717_p6 = scmp.lt.s32.totalorder %s4715_s23, %s4708_s3 }
 0x11c   : > { %p4712_p4 = pneg %p4711_p2  ;;  %p4718_p5 = por %p4717_p6, %p4716_p10 }
 0x11e   : > { %p4719_p7 = pnand %p4718_p5, %p4712_p4 }
 0x120   : > { %4722 = shalt.err (!%p4719_p7)
}
 0x121   : > { %4166 = dma.hbm_to_vmem [thread:$0]  (!%p5182_p11), %s5189_s17, 128, %s427_s5, %s416_s22  }
 0x122   : > { %s5769_s10 = sld [smem:[#allocation29_spill]] }
 0x128   : > { %p5770_p3 = scmp.ne.s32.totalorder %s5769_s10, 0 }
 0x129   : > { %s5242_s4 = sand.u32 (!%p5770_p3), 1, %s4805_s14   ;;  %p5771_p6 = scmp.ne.s32.totalorder (!%p5770_p3), %s5765_s21, 0 }
 0x12a   : > { %435 = sbr.rel (%p5770_p3) target bundleno = 4558 (0x11ce), region = 60  ;;  %s3525_s18 = sshll.u32 (!%p5770_p3), %s5242_s4, 3 }
 0x12b   : > { %s438_s2 = scalar_lea.sflag (!%p5770_p3), [#allocation4], %s5242_s4  ;;  %s5246_s25 = scalar_lea.vmem (!%p5770_p3), [#allocation3], %s3525_s18 }
 0x131   : > { %4768 = dma.done.wait (%p5771_p6), %s438_s2, 128  }
 0x132   : > { %4770 = vsyncadd (%p5771_p6), %s438_s2, 4294967168  ;;  %s446_s24 = sand.u32 1, %s4912_s19   ;;  %s5253_s5 = scalar_lea.vmem [#allocation6], %s3525_s18 }
 0x133   : > { %s447_s17 = scalar_lea.sflag [#allocation7], %s446_s24 }
 0x134   : > { %4772 = dma.done.wait (%p5771_p6), %s447_s17, 128  }
 0x135   : > { %4774 = vsyncadd (%p5771_p6), %s447_s17, 4294967168  ;;  %p5772_p11 = scmp.eq.s32.totalorder %s4912_s19, 0 }
 0x137   : > { %4776 = dma.done.wait (%p5772_p11), [#allocation7], 3072   ;;  %p5773_p8 = pmov %p5772_p11 }
 0x139   : > { %4778 = vsyncadd (%p5773_p8), [#allocation7], 4294964224  ;;  %p5774_p9 = pmov %p5773_p8 }
 0x13a   : > { %p5775_p12 = pmov %p5773_p8 }
 0x13b   : > { %4780 = dma.done.wait (%p5774_p9), [#allocation10], 6144  }
 0x13c   : > { %4782 = vsyncadd (%p5775_p12), [#allocation10], 4294961152  ;;  %p5776_p1 = pmov %p5773_p8 }
 0x13e   : > { %4784 = dma.done.wait (%p5776_p1), [#allocation13], 3264   ;;  %p5777_p13 = pmov %p5776_p1 }
 0x13f   : > { %p5778_p0 = pmov %p5776_p1 }
 0x140   : > { %4786 = vsyncadd (%p5777_p13), [#allocation13], 4294964032 }
 0x141   : > { %4788 = dma.done.wait (%p5778_p0), [#allocation16], 2048   ;;  %p5779_p2 = pmov %p5778_p0 }
 0x142   : > { %p5780_p4 = pmov %p5778_p0 }
 0x143   : > { %4790 = vsyncadd (%p5779_p2), [#allocation16], 4294965248 }
 0x144   : > { %4792 = dma.done.wait (%p5780_p4), [#allocation19], 32   ;;  %p5781_p10 = pmov %p5778_p0 }
 0x145   : > { %v4829_v0 = vmov 0   ;;  %v4830_v1 = vmov 0.0   ;;  %vm4831_vm0 = vmmov 0   ;;  %v4239_v2 = vld [vmem:[#allocation8 + $0x4] ss:$12 sps:$4 sm:$0xff]   ;;  %vm1585_vm1 = vcmask 261120  }
 0x146   : > { %4794 = vsyncadd (%p5781_p10), [#allocation19], 4294967264  ;;  %753 = vmatprep.mubr.bf16.mxu0 %v4829_v0  ;;  %3811 = vmatprep.subr.bf16.mxu1 %v4830_v1  ;;  %v4241_v3 = vld [vmem:[#allocation8] ss:$12 sps:$4 sm:$0xff]   ;;  %v4242_v4 = vld [vmem:[#allocation8 + $0x1c] ss:$12 sps:$4 sm:$0xff]  }
 0x147   : > { %3827 = vmatprep.mubr.msk.bf16.mxu1 %vm4831_vm0, %v4830_v1  ;;  %721 = vmatprep.subr.bf16.mxu0 %v4239_v2  ;;  %v4244_v5 = vld [vmem:[#allocation8 + $0x18] ss:$12 sps:$4 sm:$0xff]   ;;  %v4245_v6 = vld [vmem:[#allocation8 + $0x34] ss:$12 sps:$4 sm:$0xff]   ;;  %v4247_v7 = vld [vmem:[#allocation8 + $0x30] ss:$12 sps:$4 sm:$0xff]  }
 0x148   : > { %722 = vmatpush1.bf16.msra.mxu0 %v4241_v3  ;;  %v4248_v8 = vld [vmem:[#allocation8 + $0x4c] ss:$12 sps:$4 sm:$0xff]   ;;  %v4250_v9 = vld [vmem:[#allocation8 + $0x48] ss:$12 sps:$4 sm:$0xff]   ;;  %v4251_v10 = vld [vmem:[#allocation8 + $0x64] ss:$12 sps:$4 sm:$0xff]  }
 0x149   : > { %723 = vmatprep.subr.bf16.mxu0 %v4242_v4  ;;  %v4253_v11 = vld [vmem:[#allocation8 + $0x60] ss:$12 sps:$4 sm:$0xff]   ;;  %v4254_v12 = vld [vmem:[#allocation8 + $0x7c] ss:$12 sps:$4 sm:$0xff]   ;;  %v4256_v13 = vld [vmem:[#allocation8 + $0x78] ss:$12 sps:$4 sm:$0xff]  }
 0x14a   : > { %v4257_v14 = vld [vmem:[#allocation8 + $0x94] ss:$12 sps:$4 sm:$0xff]   ;;  %v4259_v15 = vld [vmem:[#allocation8 + $0x90] ss:$12 sps:$4 sm:$0xff]   ;;  %v4260_v17 = vld [vmem:[#allocation8 + $0xac] ss:$12 sps:$4 sm:$0xff]  }
 0x14b   : > { %v4287_v16 = vld [vmem:[#allocation8 + $0x8] ss:$12 sps:$4 sm:$0xff]   ;;  %v4288_v18 = vld [vmem:[#allocation8 + $0x20] ss:$12 sps:$4 sm:$0xff]   ;;  %v4265_v21 = vld [vmem:[#allocation9 + $0x4] ss:$12 sps:$4 sm:$0xff]  }
 0x14c   : > { %724 = vmatpush1.bf16.msra.mxu0 %v4244_v5  ;;  %3812 = vmatpush3.bf16.msra.mxu1 %v4287_v16  ;;  %v4262_v19 = vld [vmem:[#allocation8 + $0xa8] ss:$12 sps:$4 sm:$0xff]   ;;  %v4289_v22 = vld [vmem:[#allocation8 + $0x38] ss:$12 sps:$4 sm:$0xff]   ;;  %v4263_v24 = vld [vmem:[#allocation9] ss:$12 sps:$4 sm:$0xff]  }
 0x14d   : > { %725 = vmatprep.subr.bf16.mxu0 %v4245_v6  ;;  %3813 = vmatprep.subr.bf16.mxu1 %v4830_v1  ;;  %v525_v20 = vld [vmem:[%s5246_s25] sm:$0xff]  ;;  %v4290_v26 = vld [vmem:[#allocation8 + $0x50] ss:$12 sps:$4 sm:$0xff]   ;;  %s4832_s21 = smov 96   ;;  %vm1649_vm2 = vcmask 1043456   ;;  %s4833_s22 = smov 64  }
 0x14e   : > { %v5286_v23 = vpack.c.bf16 %v525_v20, %v525_v20  ;;  %v4268_v25 = vld [vmem:[#allocation9 + $0x1c] ss:$12 sps:$4 sm:$0xff]   ;;  %v4266_v27 = vld [vmem:[#allocation9 + $0x18] ss:$12 sps:$4 sm:$0xff]   ;;  %v4271_v28 = vld [vmem:[#allocation9 + $0x34] ss:$12 sps:$4 sm:$0xff]  }
 0x14f   : > { %v4291_v29 = vld [vmem:[#allocation8 + $0x68] ss:$12 sps:$4 sm:$0xff]   ;;  %v4269_v30 = vld [vmem:[#allocation9 + $0x30] ss:$12 sps:$4 sm:$0xff]   ;;  %v4274_v31 = vld [vmem:[#allocation9 + $0x4c] ss:$12 sps:$4 sm:$0xff]  }
 0x150   : > { %726 = vmatpush1.bf16.msra.mxu0 %v4247_v7  ;;  %3814 = vmatpush3.bf16.msra.mxu1 %v4288_v18  ;;  %v4292_v32 = vld [vmem:[#allocation8 + $0x80] ss:$12 sps:$4 sm:$0xff]   ;;  %v4272_v33 = vld [vmem:[#allocation9 + $0x48] ss:$12 sps:$4 sm:$0xff]   ;;  %v4277_v34 = vld [vmem:[#allocation9 + $0x64] ss:$12 sps:$4 sm:$0xff]  }
 0x151   : > { %727 = vmatprep.subr.bf16.mxu0 %v4248_v8  ;;  %3815 = vmatprep.subr.bf16.mxu1 %v4830_v1  ;;  %v4293_v35 = vld [vmem:[#allocation8 + $0x98] ss:$12 sps:$4 sm:$0xff]   ;;  %v4275_v36 = vld [vmem:[#allocation9 + $0x60] ss:$12 sps:$4 sm:$0xff]   ;;  %v4280_v37 = vld [vmem:[#allocation9 + $0x7c] ss:$12 sps:$4 sm:$0xff]   ;;  %v566_v8 = vlaneseq }
 0x152   : > { %v4294_v38 = vld [vmem:[#allocation8 + $0xb0] ss:$12 sps:$4 sm:$0xff]   ;;  %v4278_v39 = vld [vmem:[#allocation9 + $0x78] ss:$12 sps:$4 sm:$0xff]   ;;  %v4283_v40 = vld [vmem:[#allocation9 + $0x94] ss:$12 sps:$4 sm:$0xff]  }
 0x153   : > { %v4295_v41 = vld [vmem:[#allocation9 + $0x8] ss:$12 sps:$4 sm:$0xff]   ;;  %v4281_v42 = vld [vmem:[#allocation9 + $0x90] ss:$12 sps:$4 sm:$0xff]   ;;  %v4286_v43 = vld [vmem:[#allocation9 + $0xac] ss:$12 sps:$4 sm:$0xff]  }
 0x154   : > { %728 = vmatpush1.bf16.msra.mxu0 %v4250_v9  ;;  %3816 = vmatpush3.bf16.msra.mxu1 %v4289_v22  ;;  %v4296_v44 = vld [vmem:[#allocation9 + $0x20] ss:$12 sps:$4 sm:$0xff]   ;;  %v4284_v45 = vld [vmem:[#allocation9 + $0xa8] ss:$12 sps:$4 sm:$0xff]   ;;  %v4297_v47 = vld [vmem:[#allocation9 + $0x38] ss:$12 sps:$4 sm:$0xff]  }
 0x155   : > { %729 = vmatprep.subr.bf16.mxu0 %v4251_v10  ;;  %3817 = vmatprep.subr.bf16.mxu1 %v4830_v1  ;;  %v526_v46 = vld [vmem:[%s5253_s5] sm:$0xff]  ;;  %v4300_v51 = vld [vmem:[#allocation9 + $0x80] ss:$12 sps:$4 sm:$0xff]   ;;  %v5337_v9 = vshrl.u32 %v566_v8, 7  ;;  %s4834_s30 = smov 32   ;;  %vm1633_vm3 = vcmask 64512  }
 0x156   : > { %v5302_v48 = vpack.c.bf16 %v526_v46, %v526_v46  ;;  %v4298_v49 = vld [vmem:[#allocation9 + $0x50] ss:$12 sps:$4 sm:$0xff]   ;;  %v4299_v50 = vld [vmem:[#allocation9 + $0x68] ss:$12 sps:$4 sm:$0xff]   ;;  %v4301_v52 = vld [vmem:[#allocation9 + $0x98] ss:$12 sps:$4 sm:$0xff]  }
 0x157   : > { %v4302_v53 = vld [vmem:[#allocation9 + $0xb0] ss:$12 sps:$4 sm:$0xff]   ;;  %v4303_v54 = vld [vmem:[#allocation12 + $0x8] ss:$12 sps:$4 sm:$0xff]   ;;  %v4304_v55 = vld [vmem:[#allocation12 + $0x20] ss:$12 sps:$4 sm:$0xff]  }
 0x158   : > { %730 = vmatpush1.bf16.msra.mxu0 %v4253_v11  ;;  %3818 = vmatpush3.bf16.msra.mxu1 %v4290_v26  ;;  %v4305_v56 = vld [vmem:[#allocation12 + $0x38] ss:$12 sps:$4 sm:$0xff]   ;;  %v4306_v57 = vld [vmem:[#allocation12 + $0x50] ss:$12 sps:$4 sm:$0xff]   ;;  %v4307_v58 = vld [vmem:[#allocation12 + $0x68] ss:$12 sps:$4 sm:$0xff]  }
 0x159   : > { %731 = vmatprep.subr.bf16.mxu0 %v4254_v12  ;;  %3819 = vmatprep.subr.bf16.mxu1 %v4830_v1  ;;  %v4308_v59 = vld [vmem:[#allocation12 + $0x80] ss:$12 sps:$4 sm:$0xff]   ;;  %v4309_v60 = vld [vmem:[#allocation12 + $0x98] ss:$12 sps:$4 sm:$0xff]   ;;  %v4310_v61 = vld [vmem:[#allocation12 + $0xb0] ss:$12 sps:$4 sm:$0xff]  }
 0x15a   : > { %v4311_v62 = vld [vmem:[#allocation11 + $0x8] ss:$12 sps:$4 sm:$0xff]   ;;  %v4312_v63 = vld [vmem:[#allocation11 + $0x20] ss:$12 sps:$4 sm:$0xff]   ;;  %v4313_v2 = vld [vmem:[#allocation11 + $0x38] ss:$12 sps:$4 sm:$0xff]  }
 0x15b   : > { %v4314_v3 = vld [vmem:[#allocation11 + $0x50] ss:$12 sps:$4 sm:$0xff]   ;;  %v4315_v4 = vld [vmem:[#allocation11 + $0x68] ss:$12 sps:$4 sm:$0xff]   ;;  %v4316_v5 = vld [vmem:[#allocation11 + $0x80] ss:$12 sps:$4 sm:$0xff]  }
 0x15c   : > { %732 = vmatpush1.bf16.msra.mxu0 %v4256_v13  ;;  %3820 = vmatpush3.bf16.msra.mxu1 %v4291_v29  ;;  %v4317_v6 = vld [vmem:[#allocation11 + $0x98] ss:$12 sps:$4 sm:$0xff]   ;;  %v4318_v7 = vld [vmem:[#allocation11 + $0xb0] ss:$12 sps:$4 sm:$0xff]   ;;  %v5340_v10 = vsub.s32 0, %v5337_v9  ;;  %vm1694_vm4 = vcmask 257024  }
 0x15d   : > { %733 = vmatprep.subr.bf16.mxu0 %v4257_v14  ;;  %3821 = vmatprep.subr.bf16.mxu1 %v4830_v1  ;;  %v5342_v11 = vld [vmem:[#allocation14] sm:$0x77]  ;;  %vm1817_vm5 = vcmask 519424   ;;  %vm1937_vm6 = vcmask 781824   ;;  %vm2057_vm7 = vcmask 1044224   ;;  %s4095_s26 = smul.u32 24, %s5242_s4 }
 0x15e   : > { %v569_v12 = vrot.slane %v5342_v11, %v5340_v10  ;;  %v4327_v8 = vld [vmem:[#allocation12 + $0x34] ss:$12 sps:$4 sm:$0xff]   ;;  %s4096_s3 = smul.u32 384, %s4912_s19  ;;  %s5782_s10 = sld [smem:[#allocation35_spill]] }
 0x15f   : > { %s5531_s6 = scalar_lea.vmem [#allocation20], %s4095_s26  ;;  %s3326_s2 = scalar_lea.sflag [#allocation5], %s5242_s4 }
 0x160   : > { %734 = vmatpush1.bf16.msra.mxu0 %v4259_v15  ;;  %3822 = vmatpush3.bf16.msra.mxu1 %v4292_v32  ;;  %v584_v13 = vrot.slane %v569_v12, %v5340_v10  ;;  %v4325_v12 = vld [vmem:[#allocation12 + $0x30] ss:$12 sps:$4 sm:$0xff]   ;;  %s3340_s28 = sshll.u32 %s5531_s6, 4  ;;  %p5783_p7 = scmp.ne.s32.totalorder %s5766_s20, 0  ;;  %s5682_s28 = int_to_ptr.vmem [resolvable:$true] %s3340_s28 }
 0x161   : > { %735 = vmatprep.subr.bf16.mxu0 %v4260_v17  ;;  %3823 = vmatprep.subr.bf16.mxu1 %v4830_v1  ;;  %s4723_s19 = scalar_lea.vmem %s5682_s28, 384  ;;  %s4835_s25 = smov [#allocation20]  }
 0x162   : > { %p4724_p5 = scmp.ne.s32.totalorder %s5682_s28, %s4723_s19  ;;  %s4727_s24 = sshll.u32 %s4835_s25, 4  ;;  %s4728_s24 = int_to_ptr.vmem [resolvable:$false] %s4727_s24 }
 0x163   : > { %s4729_s17 = scalar_lea.vmem %s4728_s24, 768  ;;  %p4730_p11 = scmp.lt.s32.totalorder %s5682_s28, %s4728_s24 }
 0x164   : > { %736 = vmatpush1.bf16.msra.mxu0 %v4262_v19  ;;  %3824 = vmatpush3.bf16.msra.mxu1 %v4293_v35  ;;  %s5680_s18 = scalar_lea.hbm %s5782_s10, %s4096_s3  ;;  %p4725_p3 = pnand %p4724_p5, %p5783_p7 }
 0x165   : > { %989 = vmatprep.subr.bf16.mxu0 %v4265_v21  ;;  %3825 = vmatprep.subr.bf16.mxu1 %v4830_v1  ;;  %v572_v21 = vsub.s32 4, %v5337_v9  ;;  %p4731_p8 = scmp.lt.s32.totalorder %s4729_s17, %s4723_s19 }
 0x166   : > { %p4726_p6 = pneg %p4725_p3 }
 0x167   : > { %754 = vmatmul.mubr.bf16.vlgmr.msra.gmra.mrb[0].mxu0 %v5286_v23  ;;  %v573_v22 = vrot.slane %v5342_v11, %v572_v21  ;;  %v4337_v21 = vld [vmem:[#allocation12 + $0x90] ss:$12 sps:$4 sm:$0xff]   ;;  %p4732_p9 = por %p4731_p8, %p4730_p11 }
 0x168   : > { %990 = vmatpush1.bf16.msra.mxu0 %v4263_v24  ;;  %1021 = vmatprep.mubr.bf16.mxu0 %v4829_v0  ;;  %v5357_v24 = vsub.s32 1, %v5337_v9 }
 0x169   : > { %991 = vmatprep.subr.bf16.mxu0 %v4268_v25  ;;  %3826 = vmatpush3.bf16.msra.mxu1 %v4294_v38  ;;  %v588_v29 = vrot.slane %v573_v22, %v5340_v10  ;;  %v4342_v22 = vld [vmem:[#allocation12 + $0xac] ss:$12 sps:$4 sm:$0xff]   ;;  %p4733_p12 = pnand %p4732_p9, %p4726_p6 }
 0x16a   : > { %3831 = vmatprep.subr.bf16.mxu1 %v4830_v1 }
 0x16c   : > { %992 = vmatpush1.bf16.msra.mxu0 %v4266_v27  ;;  %3828 = vmatmul.mubr.bf16.vlgmr.msra.gmra.mrb[0].mxu1 %v5286_v23 }
 0x16d   : > { %993 = vmatprep.subr.bf16.mxu0 %v4271_v28  ;;  %3832 = vmatpush3.bf16.msra.mxu1 %v4295_v41 }
 0x16e   : > { %3833 = vmatprep.subr.bf16.mxu1 %v4830_v1  ;;  %3847 = vmatprep.mubr.msk.bf16.mxu1 %vm4831_vm0, %v4830_v1 }
 0x170   : > { %994 = vmatpush1.bf16.msra.mxu0 %v4269_v30  ;;  %v837_v30 = vrot.slane %v5342_v11, %v5357_v24 }
 0x171   : > { %995 = vmatprep.subr.bf16.mxu0 %v4274_v31  ;;  %3834 = vmatpush3.bf16.msra.mxu1 %v4296_v44 }
 0x172   : > { %3835 = vmatprep.subr.bf16.mxu1 %v4830_v1  ;;  %v852_v32 = vrot.slane %v837_v30, %v5357_v24  ;;  %v4346_v30 = vld [vmem:[#allocation11 + $0x18] ss:$12 sps:$4 sm:$0xff]  }
 0x174   : > { %996 = vmatpush1.bf16.msra.mxu0 %v4272_v33 }
 0x175   : > { %997 = vmatprep.subr.bf16.mxu0 %v4277_v34  ;;  %3836 = vmatpush3.bf16.msra.mxu1 %v4297_v47 }
 0x176   : > { %3837 = vmatprep.subr.bf16.mxu1 %v4830_v1 }
 0x178   : > { %998 = vmatpush1.bf16.msra.mxu0 %v4275_v36 }
 0x179   : > { %999 = vmatprep.subr.bf16.mxu0 %v4280_v37  ;;  %3838 = vmatpush3.bf16.msra.mxu1 %v4298_v49 }
 0x17a   : > { %3839 = vmatprep.subr.bf16.mxu1 %v4830_v1 }
 0x17c   : > { %1000 = vmatpush1.bf16.msra.mxu0 %v4278_v39 }
 0x17d   : > { %1001 = vmatprep.subr.bf16.mxu0 %v4283_v40  ;;  %3840 = vmatpush3.bf16.msra.mxu1 %v4299_v50  ;;  %v5383_v50 = vsub.s32 2, %v5337_v9 }
 0x17e   : > { %3841 = vmatprep.subr.bf16.mxu1 %v4830_v1 }
 0x180   : > { %1002 = vmatpush1.bf16.msra.mxu0 %v4281_v42 }
 0x181   : > { %1003 = vmatprep.subr.bf16.mxu0 %v4286_v43  ;;  %3842 = vmatpush3.bf16.msra.mxu1 %v4300_v51  ;;  %v5385_v51 = vld [vmem:[#allocation14 + $0x8] sm:$0x7] }
 0x182   : > { %3843 = vmatprep.subr.bf16.mxu1 %v4830_v1 }
 0x184   : > { %1004 = vmatpush1.bf16.msra.mxu0 %v4284_v45 }
 0x185   : > { %3844 = vmatpush3.bf16.msra.mxu1 %v4301_v52  ;;  %v1563_v52 = vrot.slane %v5385_v51, %v5383_v50 }
 0x186   : > { %3845 = vmatprep.subr.bf16.mxu1 %v4830_v1 }
 0x187   : > { %1022 = vmatmul.mubr.bf16.vlgmr.msra.gmra.mrb[4].mxu0 %v5302_v48 }
 0x188   : > { %1294 = vmatprep.mubr.bf16.mxu0 %v4829_v0 }
 0x189   : > { %3846 = vmatpush3.bf16.msra.mxu1 %v4302_v53  ;;  %v1578_v53 = vrot.slane %v1563_v52, %v5383_v50 }
 0x18a   : > { %3851 = vmatprep.subr.bf16.mxu1 %v4830_v1 }
 0x18c   : > { %3848 = vmatmul.mubr.bf16.vlgmr.msra.gmra.mrb[4].mxu1 %v5302_v48 }
 0x18d   : > { %3852 = vmatpush3.bf16.msra.mxu1 %v4303_v54  ;;  %3867 = vmatprep.mubr.msk.bf16.mxu1 %vm4831_vm0, %v4830_v1 }
 0x18e   : > { %3853 = vmatprep.subr.bf16.mxu1 %v4830_v1 }
 0x191   : > { %3854 = vmatpush3.bf16.msra.mxu1 %v4304_v55 }
 0x192   : > { %3855 = vmatprep.subr.bf16.mxu1 %v4830_v1 }
 0x195   : > { %3856 = vmatpush3.bf16.msra.mxu1 %v4305_v56 }
 0x196   : > { %3857 = vmatprep.subr.bf16.mxu1 %v4830_v1 }
 0x199   : > { %3858 = vmatpush3.bf16.msra.mxu1 %v4306_v57 }
 0x19a   : > { %3859 = vmatprep.subr.bf16.mxu1 %v4830_v1 }
 0x19d   : > { %3860 = vmatpush3.bf16.msra.mxu1 %v4307_v58 }
 0x19e   : > { %3861 = vmatprep.subr.bf16.mxu1 %v4830_v1 }
 0x1a1   : > { %3862 = vmatpush3.bf16.msra.mxu1 %v4308_v59 }
 0x1a2   : > { %3863 = vmatprep.subr.bf16.mxu1 %v4830_v1 }
 0x1a5   : > { %3864 = vmatpush3.bf16.msra.mxu1 %v4309_v60 }
 0x1a6   : > { %3865 = vmatprep.subr.bf16.mxu1 %v4830_v1 }
 0x1a9   : > { %3866 = vmatpush3.bf16.msra.mxu1 %v4310_v61 }
 0x1aa   : > { %3871 = vmatprep.subr.bf16.mxu1 %v4830_v1 }
 0x1ac   : > { %3868 = vmatmul.mubr.bf16.vlgmr.msra.gmra.mrb[8].mxu1 %v5302_v48 }
 0x1ad   : > { %3872 = vmatpush3.bf16.msra.mxu1 %v4311_v62  ;;  %3887 = vmatprep.mubr.msk.bf16.mxu1 %vm4831_vm0, %v4830_v1 }
 0x1ae   : > { %3873 = vmatprep.subr.bf16.mxu1 %v4830_v1 }
 0x1b1   : > { %3874 = vmatpush3.bf16.msra.mxu1 %v4312_v63 }
 0x1b2   : > { %3875 = vmatprep.subr.bf16.mxu1 %v4830_v1 }
 0x1b5   : > { %3876 = vmatpush3.bf16.msra.mxu1 %v4313_v2 }
 0x1b6   : > { %3877 = vmatprep.subr.bf16.mxu1 %v4830_v1 }
 0x1b9   : > { %3878 = vmatpush3.bf16.msra.mxu1 %v4314_v3 }
 0x1ba   : > { %3879 = vmatprep.subr.bf16.mxu1 %v4830_v1 }
 0x1bd   : > { %3880 = vmatpush3.bf16.msra.mxu1 %v4315_v4  ;;  %v4319_v4 = vld [vmem:[#allocation12] ss:$12 sps:$4 sm:$0xff]  }
 0x1be   : > { %3881 = vmatprep.subr.bf16.mxu1 %v4830_v1 }
 0x1c1   : > { %3882 = vmatpush3.bf16.msra.mxu1 %v4316_v5  ;;  %v4321_v5 = vld [vmem:[#allocation12 + $0x4] ss:$12 sps:$4 sm:$0xff]  }
 0x1c2   : > { %3883 = vmatprep.subr.bf16.mxu1 %v4830_v1  ;;  %1262 = vmatprep.subr.bf16.mxu0 %v4321_v5 }
 0x1c3   : > { %1263 = vmatpush1.bf16.msra.mxu0 %v4319_v4 }
 0x1c5   : > { %3884 = vmatpush3.bf16.msra.mxu1 %v4317_v6  ;;  %v4324_v6 = vld [vmem:[#allocation12 + $0x1c] ss:$12 sps:$4 sm:$0xff]  }
 0x1c6   : > { %3885 = vmatprep.subr.bf16.mxu1 %v4830_v1  ;;  %1264 = vmatprep.subr.bf16.mxu0 %v4324_v6 }
 0x1c9   : > { %3886 = vmatpush3.bf16.msra.mxu1 %v4318_v7  ;;  %v4322_v7 = vld [vmem:[#allocation12 + $0x18] ss:$12 sps:$4 sm:$0xff]  }
 0x1ca   : > { %3891 = vmatprep.subr.bf16.mxu1 %v4830_v1  ;;  %1265 = vmatpush1.bf16.msra.mxu0 %v4322_v7 }
 0x1cb   : > { %1266 = vmatprep.subr.bf16.mxu0 %v4327_v8 }
 0x1cc   : > { %3888 = vmatmul.mubr.bf16.vlgmr.msra.gmra.mrb[12].mxu1 %v5286_v23 }
 0x1cd   : > { %3893 = vmatprep.mubr.msk.bf16.mxu1 %vm4831_vm0, %v4830_v1 }
 0x1ce   : > { %1267 = vmatpush1.bf16.msra.mxu0 %v4325_v12 }
 0x23a   : > { %v755_v14 = vpop.f32.mrb[0].mxu0 }
 0x23b   : > { %v756_v15 = vadd.f32 %v755_v14, %v584_v13  ;;  %v757_v16 = vpop.f32.mrb[1].mxu0  ;;  %v4330_v13 = vld [vmem:[#allocation12 + $0x4c] ss:$12 sps:$4 sm:$0xff]   ;;  %v4328_v14 = vld [vmem:[#allocation12 + $0x48] ss:$12 sps:$4 sm:$0xff]  }
 0x23c   : > { %v759_v17 = vpop.f32.mrb[2].mxu0  ;;  %v758_v31 = vadd.f32 %v757_v16, %v588_v29  ;;  %1268 = vmatprep.subr.bf16.mxu0 %v4330_v13  ;;  %v4331_v16 = vld [vmem:[#allocation12 + $0x60] ss:$12 sps:$4 sm:$0xff]   ;;  %v4348_v29 = vld [vmem:[#allocation11 + $0x1c] ss:$12 sps:$4 sm:$0xff]  }
 0x23d   : > { %v5347_v18 = vpack.c.bf16 %v756_v15, %v756_v15  ;;  %v760_v19 = vpop.f32.mrb[3].mxu0  ;;  %v4333_v15 = vld [vmem:[#allocation12 + $0x64] ss:$12 sps:$4 sm:$0xff]   ;;  %1269 = vmatpush1.bf16.msra.mxu0 %v4328_v14  ;;  %v4336_v17 = vld [vmem:[#allocation12 + $0x7c] ss:$12 sps:$4 sm:$0xff]  }
 0x23e   : > { %v5365_v34 = vpack.c.bf16 %v758_v31, %v758_v31  ;;  %1270 = vmatprep.subr.bf16.mxu0 %v4333_v15  ;;  %v4334_v19 = vld [vmem:[#allocation12 + $0x78] ss:$12 sps:$4 sm:$0xff]   ;;  %v4351_v31 = vld [vmem:[#allocation11 + $0x34] ss:$12 sps:$4 sm:$0xff]  }
 0x23f   : > { %1700 = vrot.lane.b32.xlu1 %v5347_v18, %s4832_s21  ;;  %v1590_v20 = vsel %vm1585_vm1, %v5347_v18, 0  ;;  %v5359_v25 = vpop.f32.mrb[0].mxu1 }
 0x240   : > { %3892 = vmatpush3.bf16.xpose.msra.mxu1 %v1590_v20  ;;  %v3829_v26 = vpop.f32.mrb[1].mxu1  ;;  %v1651_v40 = vsel %vm1649_vm2, %v5365_v34, 0  ;;  %v4339_v20 = vld [vmem:[#allocation12 + $0x94] ss:$12 sps:$4 sm:$0xff]  }
 0x241   : > { %3897 = vmatprep.subr.bf16.mxu1 %v4830_v1  ;;  %v799_v27 = vpop.f32.mrb[2].mxu1  ;;  %1271 = vmatpush1.bf16.msra.mxu0 %v4331_v16  ;;  %v4340_v26 = vld [vmem:[#allocation12 + $0xa8] ss:$12 sps:$4 sm:$0xff]  }
 0x242   : > { %v3830_v28 = vpop.f32.mrb[3].mxu1  ;;  %1272 = vmatprep.subr.bf16.mxu0 %v4336_v17  ;;  %v4345_v27 = vld [vmem:[#allocation11 + $0x4] ss:$12 sps:$4 sm:$0xff]  }
 0x243   : > { %v4343_v28 = vld [vmem:[#allocation11] ss:$12 sps:$4 sm:$0xff]  }
 0x245   : > { %1273 = vmatpush1.bf16.msra.mxu0 %v4334_v19 }
 0x246   : > { %1274 = vmatprep.subr.bf16.mxu0 %v4339_v20 }
 0x249   : > { %1275 = vmatpush1.bf16.msra.mxu0 %v4337_v21 }
 0x24a   : > { %1276 = vmatprep.subr.bf16.mxu0 %v4342_v22 }
 0x24d   : > { %1277 = vmatpush1.bf16.msra.mxu0 %v4340_v26 }
 0x24e   : > { %1471 = vmatprep.subr.bf16.mxu0 %v4345_v27 }
 0x250   : > { %1295 = vmatmul.mubr.bf16.vlgmr.msra.gmra.mrb[8].mxu0 %v5302_v48  ;;  %v4358_v48 = vld [vmem:[#allocation11 + $0x78] ss:$12 sps:$4 sm:$0xff]  }
 0x251   : > { %1472 = vmatpush1.bf16.msra.mxu0 %v4343_v28  ;;  %1503 = vmatprep.mubr.bf16.mxu0 %v4829_v0  ;;  %v4361_v0 = vld [vmem:[#allocation11 + $0x90] ss:$12 sps:$4 sm:$0xff]  }
 0x252   : > { %1473 = vmatprep.subr.bf16.mxu0 %v4348_v29 }
 0x255   : > { %1474 = vmatpush1.bf16.msra.mxu0 %v4346_v30 }
 0x256   : > { %1475 = vmatprep.subr.bf16.mxu0 %v4351_v31 }
 0x25a   : > { %v1023_v33 = vpop.f32.mrb[4].mxu0 }
 0x25b   : > { %v1024_v35 = vadd.f32 %v1023_v33, %v852_v32  ;;  %v5367_v36 = vpop.f32.mrb[5].mxu0  ;;  %v4349_v32 = vld [vmem:[#allocation11 + $0x30] ss:$12 sps:$4 sm:$0xff]   ;;  %v4354_v33 = vld [vmem:[#allocation11 + $0x4c] ss:$12 sps:$4 sm:$0xff]  }
 0x25c   : > { %v1027_v37 = vpop.f32.mrb[6].mxu0  ;;  %1476 = vmatpush1.bf16.msra.mxu0 %v4349_v32 }
 0x25d   : > { %v1582_v38 = vpack.c.bf16 %v1024_v35, %v1024_v35  ;;  %v1028_v39 = vpop.f32.mrb[7].mxu0  ;;  %v4352_v35 = vld [vmem:[#allocation11 + $0x48] ss:$12 sps:$4 sm:$0xff]   ;;  %1477 = vmatprep.subr.bf16.mxu0 %v4354_v33  ;;  %v4357_v37 = vld [vmem:[#allocation11 + $0x64] ss:$12 sps:$4 sm:$0xff]  }
 0x25e   : > { %v4360_v39 = vld [vmem:[#allocation11 + $0x7c] ss:$12 sps:$4 sm:$0xff]  }
 0x25f   : > { %1697 = vrot.lane.b32.xlu1 %v1582_v38, %s4832_s21  ;;  %3894 = vmatmul.mubr.msk.bf16.vlgmr.msra.gmra.mrb[16].mxu1 %vm1585_vm1, %v1582_v38  ;;  %v5380_v41 = vpop.f32.mrb[4].mxu1 }
 0x260   : > { %3898 = vmatpush3.bf16.msra.mxu1 %v1651_v40  ;;  %3899 = vmatprep.mubr.msk.bf16.mxu1 %vm4831_vm0, %v4830_v1  ;;  %v3849_v42 = vpop.f32.mrb[5].mxu1  ;;  %v4363_v40 = vld [vmem:[#allocation11 + $0x94] ss:$12 sps:$4 sm:$0xff]  }
 0x261   : > { %3903 = vmatprep.subr.bf16.mxu1 %v4830_v1  ;;  %v1067_v43 = vpop.f32.mrb[6].mxu1  ;;  %1478 = vmatpush1.bf16.msra.mxu0 %v4352_v35  ;;  %v4366_v42 = vld [vmem:[#allocation11 + $0xac] ss:$12 sps:$4 sm:$0xff]  }
 0x262   : > { %v3850_v44 = vpop.f32.mrb[7].mxu1  ;;  %1479 = vmatprep.subr.bf16.mxu0 %v4357_v37  ;;  %v4364_v43 = vld [vmem:[#allocation11 + $0xa8] ss:$12 sps:$4 sm:$0xff]  }
 0x263   : > { %1819 = vrot.lane.b32.xlu1 %v1582_v38, %s4833_s22 }
 0x267   : > { %1941 = vrot.lane.b32.xlu1 %v5347_v18, %s4834_s30 }
 0x26b   : > { %1939 = vrot.lane.b32.xlu1 %v1582_v38, %s4834_s30  ;;  %v4355_v38 = vld [vmem:[#allocation11 + $0x60] ss:$12 sps:$4 sm:$0xff]  }
 0x26c   : > { %1480 = vmatpush1.bf16.msra.mxu0 %v4355_v38 }
 0x26d   : > { %1481 = vmatprep.subr.bf16.mxu0 %v4360_v39 }
 0x270   : > { %1482 = vmatpush1.bf16.msra.mxu0 %v4358_v48 }
 0x271   : > { %1483 = vmatprep.subr.bf16.mxu0 %v4363_v40 }
 0x274   : > { %1484 = vmatpush1.bf16.msra.mxu0 %v4361_v0 }
 0x275   : > { %1485 = vmatprep.subr.bf16.mxu0 %v4366_v42 }
 0x278   : > { %1486 = vmatpush1.bf16.msra.mxu0 %v4364_v43 }
 0x279   : > { %3915 = vmatprep.subr.bf16.mxu0 %v4830_v1 }
 0x27b   : > { %1504 = vmatmul.mubr.bf16.vlgmr.msra.gmra.mrb[12].mxu0 %v5286_v23 }
 0x27c   : > { %3917 = vmatprep.mubr.msk.bf16.mxu0 %vm4831_vm0, %v4830_v1 }
 0x27f   : > { %v1337_v45 = vpop.f32.mrb[8].mxu1 }
 0x280   : > { %v3869_v46 = vpop.f32.mrb[9].mxu1 }
 0x281   : > { %v1340_v47 = vpop.f32.mrb[10].mxu1 }
 0x282   : > { %v3870_v49 = vpop.f32.mrb[11].mxu1 }
 0x29f   : > { %v1546_v54 = vpop.f32.mrb[12].mxu1 }
 0x2a0   : > { %v1547_v55 = vadd.f32 %v1546_v54, %v1337_v45  ;;  %v3889_v56 = vpop.f32.mrb[13].mxu1 }
 0x2a1   : > { %v1549_v57 = vpop.f32.mrb[14].mxu1 }
 0x2a2   : > { %v5390_v58 = vadd.f32 %v1578_v53, %v1547_v55  ;;  %v3890_v59 = vpop.f32.mrb[15].mxu1 }
 0x2b1   : > { %v1701_v52 = vpop.permute.xlu1 %1700 }
 0x2b2   : > { %v1706_v4 = vsel %vm1585_vm1, %v1701_v52, 0 }
 0x2d1   : > { %v1698_v53 = vpop.permute.xlu1 %1697 }
 0x2d5   : > { %v1820_v59 = vpop.permute.xlu1 %1819 }
 0x323   : > { %v1296_v54 = vpop.f32.mrb[8].mxu0 }
 0x324   : > { %v1298_v55 = vpop.f32.mrb[9].mxu0 }
 0x325   : > { %v1300_v56 = vpop.f32.mrb[10].mxu0 }
 0x326   : > { %v1301_v57 = vpop.f32.mrb[11].mxu0 }
 0x332   : > { %v1626_v60 = vpop.f32.mrb[16].mxu1 }
 0x333   : > { %v5392_v61 = vmul.f32 0.17677669, %v1626_v60  ;;  %v3895_v62 = vpop.f32.mrb[17].mxu1 }
 0x334   : > { %v1629_v63 = vpop.f32.mrb[18].mxu1  ;;  %v1942_v62 = vpop.permute.xlu1 %1941 }
 0x335   : > { %v3896_v2 = vpop.f32.mrb[19].mxu1  ;;  %v1634_v3 = vsel %vm1633_vm3, %v5392_v61, -inf }
 0x336   : > { %1635 = vmax.xlane.f32.xlu0 %v1634_v3 }
 0x338   : > { %v1940_v5 = vpop.permute.xlu1 %1939 }
 0x34e   : > { %v1505_v6 = vpop.f32.mrb[12].mxu0 }
 0x34f   : > { %v5424_v7 = vadd.f32 %v1505_v6, %v1296_v54  ;;  %v1507_v8 = vpop.f32.mrb[13].mxu0  ;;  %v840_v6 = vsub.s32 5, %v5337_v9 }
 0x350   : > { %v5426_v12 = vadd.f32 %v1507_v8, %v1298_v55  ;;  %v1509_v13 = vpop.f32.mrb[14].mxu0 }
 0x351   : > { %v1510_v14 = vpop.f32.mrb[15].mxu0 }
 0x352   : > { %v841_v14 = vrot.slane %v5342_v11, %v840_v6 }
 0x3c3   : > { %v1636_v44 = vpop.xlane.xlu0 %1635 }
 0x3c4   : > { %v1637_v45 = vsub.f32 %v5392_v61, %v1636_v44 }
 0x3c6   : > { %v1638_v46 = vmul.f32 1.442695, %v1637_v45 }
 0x3c8   : > { %4391 = vpow2.f32 %v1638_v46 }
 0x3d2   : > { %v4392_v47 = vpop.eup %4391 }
 0x3d3   : > { %v1640_v49 = vsel %vm1633_vm3, %v4392_v47, 0.0 }
 0x3d4   : > { %1641 = vadd.xlane.f32.xlu0 %v1640_v49 }
 0x3ea   : > { %1821 = vrot.lane.b32.xlu0 %v5347_v18, %s4833_s22  ;;  %v1947_v18 = vsel %vm1585_vm1, %v1942_v62, 0 }
 0x461   : > { %v1642_v23 = vpop.xlane.xlu0 %1641 }
 0x462   : > { %4393 = vrcp.f32 %v1642_v23 }
 0x465   : > { %v1822_v60 = vpop.permute.xlu0 %1821 }
 0x466   : > { %v1827_v61 = vsel %vm1585_vm1, %v1822_v60, 0 }
 0x467   : > { %3916 = vmatpush3.bf16.xpose.msra.mxu0 %v1827_v61 }
 0x468   : > { %3927 = vmatprep.subr.bf16.mxu0 %v4830_v1 }
 0x46c   : > { %v4394_v63 = vpop.eup %4393 }
 0x46d   : > { %v1644_v2 = vmul.f32 %v4394_v63, %v4392_v47 }
 0x46e   : > { %3918 = vmatmul.mubr.msk.bf16.vlgmr.msra.gmra.mrb[16].mxu0 %vm1585_vm1, %v1820_v59 }
 0x46f   : > { %3928 = vmatpush3.bf16.xpose.msra.mxu0 %v1947_v18  ;;  %v1645_v3 = vpack.c.bf16 %v1644_v2, %v1644_v2  ;;  %3929 = vmatprep.mubr.msk.bf16.mxu0 %vm4831_vm0, %v4830_v1 }
 0x470   : > { %3939 = vmatprep.subr.bf16.mxu0 %v4830_v1 }
 0x471   : > { %3900 = vmatmul.mubr.msk.bf16.vlgmr.msra.gmra.mrb[20].mxu1 %vm1633_vm3, %v1645_v3 }
 0x472   : > { %3904 = vmatpush3.bf16.xpose.msra.mxu1 %v1706_v4  ;;  %3905 = vmatprep.mubr.msk.bf16.mxu1 %vm4831_vm0, %v4830_v1 }
 0x473   : > { %3909 = vmatprep.subr.bf16.mxu1 %v4830_v1 }
 0x476   : > { %3930 = vmatmul.mubr.msk.bf16.vlgmr.msra.gmra.mrb[20].mxu0 %vm1585_vm1, %v1940_v5 }
 0x477   : > { %3955 = vmatprep.mubr.msk.bf16.mxu0 %vm4831_vm0, %v4830_v1 }
 0x479   : > { %3906 = vmatmul.mubr.msk.bf16.vlgmr.msra.gmra.mrb[24].mxu1 %vm1585_vm1, %v1698_v53 }
 0x47a   : > { %3911 = vmatprep.mubr.msk.bf16.mxu1 %vm4831_vm0, %v4830_v1 }
 0x541   : > { %v1863_v15 = vpop.f32.mrb[16].mxu0 }
 0x542   : > { %v1869_v16 = vmul.f32 0.17677669, %v1863_v15  ;;  %v3919_v17 = vpop.f32.mrb[17].mxu0 }
 0x543   : > { %v1866_v19 = vpop.f32.mrb[18].mxu0 }
 0x544   : > { %v1687_v20 = vpop.f32.mrb[20].mxu1  ;;  %v3920_v21 = vpop.f32.mrb[19].mxu0  ;;  %v1870_v22 = vsel %vm1633_vm3, %v1869_v16, -inf }
 0x545   : > { %v1693_v26 = vpack.c.bf16 %v1687_v20, %v1687_v20  ;;  %1871 = vmax.xlane.f32.xlu0 %v1870_v22  ;;  %v3901_v27 = vpop.f32.mrb[21].mxu1 }
 0x546   : > { %v1690_v28 = vpop.f32.mrb[22].mxu1 }
 0x547   : > { %1695 = vst.msk [vmem:[#allocation2] sm:$0xf] %vm1694_vm4, %v1693_v26  ;;  %v3902_v29 = vpop.f32.mrb[23].mxu1  ;;  %v845_v26 = vrot.slane %v5385_v51, %v5357_v24  ;;  %v577_v28 = vrot.slane %v5385_v51, %v5340_v10 }
 0x549   : > { %v1983_v30 = vpop.f32.mrb[20].mxu0 }
 0x54a   : > { %v3931_v31 = vpop.f32.mrb[21].mxu0  ;;  %v1989_v48 = vmul.f32 0.17677669, %v1983_v30  ;;  %v860_v30 = vrot.slane %v845_v26, %v5357_v24 }
 0x54b   : > { %v1986_v32 = vpop.f32.mrb[22].mxu0 }
 0x54c   : > { %v1742_v33 = vpop.f32.mrb[24].mxu1  ;;  %v3932_v35 = vpop.f32.mrb[23].mxu0  ;;  %v1990_v42 = vsel %vm1633_vm3, %v1989_v48, -inf  ;;  %v1065_v32 = vadd.f32 %v5380_v41, %v860_v30  ;;  %v4367_v41 = vld [vmem:[#allocation15] sm:$0xff]  }
 0x54d   : > { %v1748_v37 = vmul.f32 0.17677669, %v1742_v33  ;;  %v3907_v38 = vpop.f32.mrb[25].mxu1  ;;  %3940 = vmatpush3.bf16.msra.mxu0 %v4367_v41 }
 0x54e   : > { %v1745_v39 = vpop.f32.mrb[26].mxu1  ;;  %v5473_v35 = vpack.c.bf16 %v1065_v32, %v1065_v32  ;;  %3941 = vmatprep.subr.bf16.mxu0 %v4830_v1 }
 0x54f   : > { %v3908_v40 = vpop.f32.mrb[27].mxu1  ;;  %v1749_v0 = vsel %vm1633_vm3, %v1748_v37, -inf  ;;  %v4368_v39 = vld [vmem:[#allocation15 + $0x8] sm:$0xff]  }
 0x550   : > { %1750 = vmax.xlane.f32.xlu1 %v1749_v0  ;;  %v2235_v38 = vsel %vm1649_vm2, %v5473_v35, 0 }
 0x551   : > { %3942 = vmatpush3.bf16.msra.mxu0 %v4368_v39 }
 0x552   : > { %3943 = vmatprep.subr.bf16.mxu0 %v4830_v1 }
 0x554   : > { %1991 = vmax.xlane.f32.xlu1 %v1990_v42  ;;  %v4369_v42 = vld [vmem:[#allocation15 + $0x10] sm:$0xff]  }
 0x555   : > { %3944 = vmatpush3.bf16.msra.mxu0 %v4369_v42 }
 0x556   : > { %3945 = vmatprep.subr.bf16.mxu0 %v4830_v1 }
 0x5d2   : > { %v1872_v43 = vpop.xlane.xlu0 %1871 }
 0x5d3   : > { %v1873_v44 = vsub.f32 %v1869_v16, %v1872_v43  ;;  %v856_v16 = vrot.slane %v841_v14, %v5357_v24  ;;  %v4370_v43 = vld [vmem:[#allocation15 + $0x18] sm:$0xff]  }
 0x5d4   : > { %3946 = vmatpush3.bf16.msra.mxu0 %v4370_v43 }
 0x5d5   : > { %v1874_v45 = vmul.f32 1.442695, %v1873_v44  ;;  %v1026_v22 = vadd.f32 %v5367_v36, %v856_v16  ;;  %v592_v36 = vrot.slane %v577_v28, %v5340_v10  ;;  %3947 = vmatprep.subr.bf16.mxu0 %v4830_v1 }
 0x5d7   : > { %4395 = vpow2.f32 %v1874_v45  ;;  %v5461_v29 = vpack.c.bf16 %v1026_v22, %v1026_v22  ;;  %v797_v51 = vadd.f32 %v5359_v25, %v592_v36 }
 0x5d9   : > { %v2176_v33 = vsel %vm1585_vm1, %v5461_v29, 0 }
 0x5dd   : > { %v1751_v46 = vpop.xlane.xlu1 %1750 }
 0x5de   : > { %v1752_v56 = vsub.f32 %v1748_v37, %v1751_v46  ;;  %v2169_v37 = vpack.c.bf16 %v797_v51, %v797_v51  ;;  %v5526_v51 = vld [vmem:[#allocation18] sm:$0x3] }
 0x5e0   : > { %v1753_v57 = vmul.f32 1.442695, %v1752_v56 }
 0x5e1   : > { %v4396_v47 = vpop.eup %4395  ;;  %v1992_v49 = vpop.xlane.xlu1 %1991 }
 0x5e2   : > { %v1993_v52 = vsub.f32 %v1989_v48, %v1992_v49  ;;  %v1876_v53 = vsel %vm1633_vm3, %v4396_v47, 0.0 }
 0x5e3   : > { %1877 = vadd.xlane.f32.xlu0 %v1876_v53 }
 0x5e4   : > { %v1994_v54 = vmul.f32 1.442695, %v1993_v52 }
 0x5e6   : > { %4397 = vpow2.f32 %v1994_v54 }
 0x5e7   : > { %4399 = vpow2.f32 %v1753_v57 }
 0x5f0   : > { %v4398_v55 = vpop.eup %4397 }
 0x5f1   : > { %v1996_v23 = vsel %vm1633_vm3, %v4398_v55, 0.0  ;;  %v4400_v59 = vpop.eup %4399 }
 0x5f2   : > { %1997 = vadd.xlane.f32.xlu1 %v1996_v23  ;;  %v1755_v60 = vsel %vm1633_vm3, %v4400_v59, 0.0 }
 0x5f9   : > { %1762 = vrot.lane.b32.xlu0 %v5365_v34, %s4832_s21 }
 0x603   : > { %1882 = vrot.lane.b32.xlu1 %v5365_v34, %s4833_s22 }
 0x627   : > { %1756 = vadd.xlane.f32.xlu1 %v1755_v60 }
 0x638   : > { %2002 = vrot.lane.b32.xlu1 %v5365_v34, %s4834_s30 }
 0x670   : > { %v1878_v61 = vpop.xlane.xlu0 %1877 }
 0x674   : > { %v1763_v62 = vpop.permute.xlu0 %1762 }
 0x675   : > { %v1768_v63 = vsel %vm1649_vm2, %v1763_v62, 0  ;;  %v4371_v62 = vld [vmem:[#allocation15 + $0x20] sm:$0xff]  }
 0x676   : > { %3910 = vmatpush3.bf16.msra.mxu1 %v1768_v63  ;;  %3948 = vmatpush3.bf16.msra.mxu0 %v4371_v62  ;;  %v4372_v63 = vld [vmem:[#allocation15 + $0x28] sm:$0xff]  }
 0x677   : > { %3921 = vmatprep.subr.bf16.mxu1 %v4830_v1  ;;  %3949 = vmatprep.subr.bf16.mxu0 %v4830_v1 }
 0x67a   : > { %3950 = vmatpush3.bf16.msra.mxu0 %v4372_v63 }
 0x67b   : > { %3951 = vmatprep.subr.bf16.mxu0 %v4830_v1 }
 0x67f   : > { %v1998_v2 = vpop.xlane.xlu1 %1997 }
 0x683   : > { %v1883_v18 = vpop.permute.xlu1 %1882 }
 0x684   : > { %v1888_v34 = vsel %vm1649_vm2, %v1883_v18, 0  ;;  %v4373_v18 = vld [vmem:[#allocation15 + $0x30] sm:$0xff]  }
 0x685   : > { %3952 = vmatpush3.bf16.msra.mxu0 %v4373_v18 }
 0x686   : > { %3953 = vmatprep.subr.bf16.mxu0 %v4830_v1 }
 0x6b4   : > { %v1757_v3 = vpop.xlane.xlu1 %1756 }
 0x6b5   : > { %4401 = vrcp.f32 %v1757_v3 }
 0x6b6   : > { %4403 = vrcp.f32 %v1878_v61 }
 0x6b7   : > { %4405 = vrcp.f32 %v1998_v2 }
 0x6b8   : > { %v2003_v17 = vpop.permute.xlu1 %2002 }
 0x6b9   : > { %v2008_v21 = vsel %vm1649_vm2, %v2003_v17, 0 }
 0x6bf   : > { %v4402_v4 = vpop.eup %4401 }
 0x6c0   : > { %v1759_v5 = vmul.f32 %v4402_v4, %v4400_v59  ;;  %v4404_v13 = vpop.eup %4403  ;;  %v4374_v4 = vld [vmem:[#allocation15 + $0x38] sm:$0xff]  }
 0x6c1   : > { %v1880_v15 = vmul.f32 %v4404_v13, %v4396_v47  ;;  %v4406_v20 = vpop.eup %4405  ;;  %3954 = vmatpush3.bf16.msra.mxu0 %v4374_v4 }
 0x6c2   : > { %v1760_v8 = vpack.c.bf16 %v1759_v5, %v1759_v5  ;;  %v2000_v27 = vmul.f32 %v4406_v20, %v4398_v55  ;;  %3983 = vmatprep.subr.bf16.mxu0 %v4830_v1 }
 0x6c3   : > { %v1881_v19 = vpack.c.bf16 %v1880_v15, %v1880_v15 }
 0x6c4   : > { %3912 = vmatmul.mubr.msk.bf16.vlgmr.msra.gmra.mrb[28].mxu1 %vm1633_vm3, %v1760_v8  ;;  %v2001_v31 = vpack.c.bf16 %v2000_v27, %v2000_v27 }
 0x6c5   : > { %3922 = vmatpush3.bf16.msra.mxu1 %v1888_v34  ;;  %3923 = vmatprep.mubr.msk.bf16.mxu1 %vm4831_vm0, %v4830_v1 }
 0x6c6   : > { %3933 = vmatprep.subr.bf16.mxu1 %v4830_v1 }
 0x6cc   : > { %3924 = vmatmul.mubr.msk.bf16.vlgmr.msra.gmra.mrb[32].mxu1 %vm1633_vm3, %v1881_v19 }
 0x6cd   : > { %3934 = vmatpush3.bf16.msra.mxu1 %v2008_v21  ;;  %3935 = vmatprep.mubr.msk.bf16.mxu1 %vm4831_vm0, %v4830_v1 }
 0x6ce   : > { %3959 = vmatprep.subr.bf16.mxu1 %v4830_v1 }
 0x6d4   : > { %3936 = vmatmul.mubr.msk.bf16.vlgmr.msra.gmra.mrb[36].mxu1 %vm1633_vm3, %v2001_v31 }
 0x6d5   : > { %3961 = vmatprep.mubr.msk.bf16.mxu1 %vm4831_vm0, %v4830_v1 }
 0x6d6   : > { %3960 = vmatpush3.bf16.xpose.msra.mxu1 %v2176_v33 }
 0x6d7   : > { %3965 = vmatprep.subr.bf16.mxu1 %v4830_v1 }
 0x6dd   : > { %3962 = vmatmul.mubr.msk.bf16.vlgmr.msra.gmra.mrb[40].mxu1 %vm1585_vm1, %v2169_v37 }
 0x6de   : > { %3966 = vmatpush3.bf16.msra.mxu1 %v2235_v38  ;;  %3967 = vmatprep.mubr.msk.bf16.mxu1 %vm4831_vm0, %v4830_v1 }
 0x6df   : > { %3971 = vmatprep.subr.bf16.mxu1 %v4830_v1 }
 0x797   : > { %v1804_v25 = vpop.f32.mrb[28].mxu1 }
 0x798   : > { %v3913_v48 = vpop.f32.mrb[29].mxu1  ;;  %v3691_v2 = vpack.c.bf16 %v1804_v25, %v1804_v25 }
 0x799   : > { %v1807_v40 = vpop.f32.mrb[30].mxu1 }
 0x79a   : > { %v3914_v0 = vpop.f32.mrb[31].mxu1 }
 0x79f   : > { %v1924_v44 = vpop.f32.mrb[32].mxu1 }
 0x7a0   : > { %v3692_v45 = vpack.c.bf16 %v1924_v44, %v1924_v44  ;;  %v3925_v46 = vpop.f32.mrb[33].mxu1 }
 0x7a1   : > { %v1927_v47 = vpop.f32.mrb[34].mxu1 }
 0x7a2   : > { %1934 = vrot.lane.b32.xlu1 %v3692_v45, %s4833_s22  ;;  %v3926_v49 = vpop.f32.mrb[35].mxu1 }
 0x7a7   : > { %v2044_v52 = vpop.f32.mrb[36].mxu1 }
 0x7a8   : > { %v3937_v53 = vpop.f32.mrb[37].mxu1  ;;  %v3693_v3 = vpack.c.bf16 %v2044_v52, %v2044_v52 }
 0x7a9   : > { %v2047_v54 = vpop.f32.mrb[38].mxu1 }
 0x7aa   : > { %v3938_v55 = vpop.f32.mrb[39].mxu1 }
 0x7b0   : > { %v2212_v23 = vpop.f32.mrb[40].mxu1 }
 0x7b1   : > { %v2218_v56 = vmul.f32 0.17677669, %v2212_v23  ;;  %v3963_v57 = vpop.f32.mrb[41].mxu1 }
 0x7b2   : > { %v2215_v59 = vpop.f32.mrb[42].mxu1 }
 0x7b3   : > { %v3964_v60 = vpop.f32.mrb[43].mxu1  ;;  %v2219_v61 = vsel %vm1633_vm3, %v2218_v56, -inf }
 0x7b4   : > { %2220 = vmax.xlane.f32.xlu0 %v2219_v61 }
 0x7ca   : > { %1814 = vrot.lane.b32.xlu0 %v3691_v2, %s4834_s30 }
 0x7ce   : > { %2054 = vrot.lane.b32.xlu0 %v3693_v3, %s4832_s21 }
 0x7d2   : > { %2280 = vrot.lane.b32.xlu0 %v2169_v37, %s4832_s21 }
 0x7d6   : > { %2401 = vrot.lane.b32.xlu0 %v2169_v37, %s4833_s22 }
 0x7da   : > { %2520 = vrot.lane.b32.xlu0 %v2169_v37, %s4834_s30  ;;  %v2079_v37 = vrot.slane %v5526_v51, %v5340_v10 }
 0x814   : > { %v1935_v34 = vpop.permute.xlu1 %1934 }
 0x841   : > { %v2221_v5 = vpop.xlane.xlu0 %2220 }
 0x842   : > { %v2222_v6 = vsub.f32 %v2218_v56, %v2221_v5 }
 0x844   : > { %v2223_v8 = vmul.f32 1.442695, %v2222_v6 }
 0x845   : > { %v1815_v13 = vpop.permute.xlu0 %1814 }
 0x846   : > { %4407 = vpow2.f32 %v2223_v8  ;;  %1818 = vst.msk [vmem:[#allocation2] sm:$0xf] %vm1817_vm5, %v1815_v13 }
 0x847   : > { %1938 = vst.msk [vmem:[#allocation2] sm:$0xf] %vm1937_vm6, %v1935_v34 }
 0x849   : > { %v2055_v14 = vpop.permute.xlu0 %2054 }
 0x84a   : > { %2058 = vst.msk [vmem:[#allocation2] sm:$0xf] %vm2057_vm7, %v2055_v14 }
 0x84d   : > { %v2281_v26 = vpop.permute.xlu0 %2280 }
 0x850   : > { %v4408_v15 = vpop.eup %4407 }
 0x851   : > { %v2225_v16 = vsel %vm1633_vm3, %v4408_v15, 0.0  ;;  %v2059_v17 = vld [vmem:[#allocation2] sm:$0xf]  ;;  %v2402_v36 = vpop.permute.xlu0 %2401 }
 0x852   : > { %2226 = vadd.xlane.f32.xlu1 %v2225_v16  ;;  %3956 = vmatmul.mubr.bf16.vlgmr.msra.gmra.mrb[24].mxu0 %v2059_v17 }
 0x853   : > { %3985 = vmatprep.mubr.msk.bf16.mxu0 %vm4831_vm0, %v4830_v1 }
 0x855   : > { %v2521_v33 = vpop.permute.xlu0 %2520 }
 0x863   : > { %2283 = vrot.lane.b32.xlu1 %v5461_v29, %s4832_s21 }
 0x867   : > { %2403 = vrot.lane.b32.xlu1 %v5461_v29, %s4833_s22 }
 0x86b   : > { %2522 = vrot.lane.b32.xlu1 %v5461_v29, %s4834_s30 }
 0x8df   : > { %v2227_v19 = vpop.xlane.xlu1 %2226 }
 0x8e0   : > { %4409 = vrcp.f32 %v2227_v19 }
 0x8e3   : > { %v2284_v20 = vpop.permute.xlu1 %2283 }
 0x8e4   : > { %v2289_v32 = vsel %vm1585_vm1, %v2284_v20, 0 }
 0x8e7   : > { %v2404_v21 = vpop.permute.xlu1 %2403 }
 0x8e8   : > { %v2409_v22 = vsel %vm1585_vm1, %v2404_v21, 0 }
 0x8e9   : > { %3984 = vmatpush3.bf16.xpose.msra.mxu0 %v2409_v22 }
 0x8ea   : > { %v4410_v27 = vpop.eup %4409  ;;  %3995 = vmatprep.subr.bf16.mxu0 %v4830_v1 }
 0x8eb   : > { %v2229_v28 = vmul.f32 %v4410_v27, %v4408_v15  ;;  %v2523_v30 = vpop.permute.xlu1 %2522 }
 0x8ec   : > { %v2528_v29 = vsel %vm1585_vm1, %v2523_v30, 0 }
 0x8ed   : > { %v2230_v31 = vpack.c.bf16 %v2229_v28, %v2229_v28 }
 0x8ef   : > { %3968 = vmatmul.mubr.msk.bf16.vlgmr.msra.gmra.mrb[44].mxu1 %vm1633_vm3, %v2230_v31 }
 0x8f0   : > { %3972 = vmatpush3.bf16.xpose.msra.mxu1 %v2289_v32  ;;  %3986 = vmatmul.mubr.msk.bf16.vlgmr.msra.gmra.mrb[28].mxu0 %vm1585_vm1, %v2402_v36 }
 0x8f1   : > { %3996 = vmatpush3.bf16.xpose.msra.mxu0 %v2528_v29  ;;  %3973 = vmatprep.mubr.msk.bf16.mxu1 %vm4831_vm0, %v4830_v1  ;;  %v1558_v29 = vsub.s32 6, %v5337_v9 }
 0x8f2   : > { %3997 = vmatprep.mubr.msk.bf16.mxu0 %vm4831_vm0, %v4830_v1  ;;  %3977 = vmatprep.subr.bf16.mxu1 %v4830_v1 }
 0x8f3   : > { %4007 = vmatprep.subr.bf16.mxu0 %v4830_v1 }
 0x8f7   : > { %3974 = vmatmul.mubr.msk.bf16.vlgmr.msra.gmra.mrb[48].mxu1 %vm1585_vm1, %v2281_v26 }
 0x8f8   : > { %3998 = vmatmul.mubr.msk.bf16.vlgmr.msra.gmra.mrb[32].mxu0 %vm1585_vm1, %v2521_v33  ;;  %3979 = vmatprep.mubr.msk.bf16.mxu1 %vm4831_vm0, %v4830_v1 }
 0x8f9   : > { %4023 = vmatprep.mubr.msk.bf16.mxu0 %vm4831_vm0, %v4830_v1 }
 0x925   : > { %v2162_v38 = vpop.f32.mrb[24].mxu0 }
 0x926   : > { %v2163_v41 = vadd.f32 %v2162_v38, %v2079_v37  ;;  %v3957_v39 = vpop.f32.mrb[25].mxu0  ;;  %v1559_v38 = vrot.slane %v5342_v11, %v1558_v29 }
 0x927   : > { %v2165_v25 = vpop.f32.mrb[26].mxu0 }
 0x928   : > { %2168 = vst [vmem:[%s5531_s6] sm:$0xff] %v2163_v41  ;;  %v3958_v48 = vpop.f32.mrb[27].mxu0  ;;  %v1574_v39 = vrot.slane %v1559_v38, %v5383_v50 }
 0x9c2   : > { %v2271_v40 = vpop.f32.mrb[44].mxu1 }
 0x9c3   : > { %v2277_v0 = vpack.c.bf16 %v2271_v40, %v2271_v40  ;;  %v3969_v42 = vpop.f32.mrb[45].mxu1  ;;  %v2445_v43 = vpop.f32.mrb[28].mxu0 }
 0x9c4   : > { %v2451_v44 = vmul.f32 0.17677669, %v2445_v43  ;;  %v2274_v45 = vpop.f32.mrb[46].mxu1  ;;  %v3987_v46 = vpop.f32.mrb[29].mxu0  ;;  %v1555_v43 = vrot.slane %v5342_v11, %v5383_v50  ;;  %v5577_v11 = vpack.c.bf16 %v5390_v58, %v5390_v58 }
 0x9c5   : > { %2278 = vst.msk [vmem:[#allocation2] sm:$0xf] %vm1694_vm4, %v2277_v0  ;;  %v3970_v47 = vpop.f32.mrb[47].mxu1  ;;  %v2448_v10 = vpop.f32.mrb[30].mxu0  ;;  %v1580_v0 = vadd.f32 %v1574_v39, %v5426_v12 }
 0x9c6   : > { %v3988_v49 = vpop.f32.mrb[31].mxu0  ;;  %v2452_v52 = vsel %vm1633_vm3, %v2451_v44, -inf  ;;  %v1570_v46 = vrot.slane %v1555_v43, %v5383_v50  ;;  %v2815_v50 = vsel %vm1649_vm2, %v5577_v11, 0 }
 0x9c7   : > { %2453 = vmax.xlane.f32.xlu0 %v2452_v52  ;;  %v4375_v49 = vld [vmem:[#allocation17] sm:$0xff]  }
 0x9c8   : > { %v1579_v47 = vadd.f32 %v1570_v46, %v5424_v7  ;;  %4008 = vmatpush3.bf16.msra.mxu0 %v4375_v49  ;;  %v4376_v7 = vld [vmem:[#allocation17 + $0x8] sm:$0xff]  }
 0x9c9   : > { %4009 = vmatprep.subr.bf16.mxu0 %v4830_v1 }
 0x9ca   : > { %v2325_v53 = vpop.f32.mrb[48].mxu1  ;;  %v2749_v10 = vpack.c.bf16 %v1579_v47, %v1579_v47 }
 0x9cb   : > { %v2331_v54 = vmul.f32 0.17677669, %v2325_v53  ;;  %v3975_v55 = vpop.f32.mrb[49].mxu1  ;;  %v2564_v23 = vpop.f32.mrb[32].mxu0 }
 0x9cc   : > { %v2570_v56 = vmul.f32 0.17677669, %v2564_v23  ;;  %v2328_v57 = vpop.f32.mrb[50].mxu1  ;;  %v3999_v59 = vpop.f32.mrb[33].mxu0  ;;  %4010 = vmatpush3.bf16.msra.mxu0 %v4376_v7  ;;  %v4377_v55 = vld [vmem:[#allocation17 + $0x10] sm:$0xff]   ;;  %v4378_v23 = vld [vmem:[#allocation17 + $0x18] sm:$0xff]  }
 0x9cd   : > { %v3976_v60 = vpop.f32.mrb[51].mxu1  ;;  %v2567_v61 = vpop.f32.mrb[34].mxu0  ;;  %v2332_v62 = vsel %vm1633_vm3, %v2331_v54, -inf  ;;  %4011 = vmatprep.subr.bf16.mxu0 %v4830_v1 }
 0x9ce   : > { %v4000_v63 = vpop.f32.mrb[35].mxu0  ;;  %2333 = vmax.xlane.f32.xlu1 %v2332_v62  ;;  %v2571_v2 = vsel %vm1633_vm3, %v2570_v56, -inf }
 0x9cf   : > { %2572 = vmax.xlane.f32.xlu0 %v2571_v2 }
 0x9d0   : > { %4012 = vmatpush3.bf16.msra.mxu0 %v4377_v55 }
 0x9d1   : > { %4013 = vmatprep.subr.bf16.mxu0 %v4830_v1 }
 0x9d4   : > { %4014 = vmatpush3.bf16.msra.mxu0 %v4378_v23 }
 0x9d5   : > { %4015 = vmatprep.subr.bf16.mxu0 %v4830_v1 }
 0xa54   : > { %v2454_v18 = vpop.xlane.xlu0 %2453 }
 0xa55   : > { %v2455_v3 = vsub.f32 %v2451_v44, %v2454_v18  ;;  %v5565_v44 = vpack.c.bf16 %v1580_v0, %v1580_v0 }
 0xa57   : > { %v2456_v4 = vmul.f32 1.442695, %v2455_v3  ;;  %v2756_v12 = vsel %vm1585_vm1, %v5565_v44, 0 }
 0xa59   : > { %4411 = vpow2.f32 %v2456_v4 }
 0xa5b   : > { %v2334_v16 = vpop.xlane.xlu1 %2333 }
 0xa5c   : > { %v2573_v5 = vpop.xlane.xlu0 %2572  ;;  %v2335_v17 = vsub.f32 %v2331_v54, %v2334_v16  ;;  %v4381_v16 = vld [vmem:[#allocation17 + $0x30] sm:$0xff]  }
 0xa5d   : > { %v2574_v6 = vsub.f32 %v2570_v56, %v2573_v5 }
 0xa5e   : > { %v2336_v19 = vmul.f32 1.442695, %v2335_v17 }
 0xa5f   : > { %v2575_v8 = vmul.f32 1.442695, %v2574_v6 }
 0xa61   : > { %4413 = vpow2.f32 %v2575_v8 }
 0xa62   : > { %4415 = vpow2.f32 %v2336_v19  ;;  %v4382_v19 = vld [vmem:[#allocation17 + $0x38] sm:$0xff]  }
 0xa63   : > { %v4412_v13 = vpop.eup %4411 }
 0xa64   : > { %v2458_v34 = vsel %vm1633_vm3, %v4412_v13, 0.0 }
 0xa65   : > { %2459 = vadd.xlane.f32.xlu0 %v2458_v34  ;;  %v4379_v34 = vld [vmem:[#allocation17 + $0x20] sm:$0xff]  }
 0xa66   : > { %4016 = vmatpush3.bf16.msra.mxu0 %v4379_v34 }
 0xa67   : > { %4017 = vmatprep.subr.bf16.mxu0 %v4830_v1 }
 0xa6b   : > { %v4414_v14 = vpop.eup %4413 }
 0xa6c   : > { %v2577_v15 = vsel %vm1633_vm3, %v4414_v14, 0.0  ;;  %v4416_v20 = vpop.eup %4415 }
 0xa6d   : > { %2578 = vadd.xlane.f32.xlu1 %v2577_v15  ;;  %v2338_v21 = vsel %vm1633_vm3, %v4416_v20, 0.0 }
 0xa7b   : > { %2345 = vrot.lane.b32.xlu0 %v5473_v35, %s4832_s21 }
 0xa7e   : > { %2464 = vrot.lane.b32.xlu1 %v5473_v35, %s4833_s22 }
 0xaa2   : > { %2339 = vadd.xlane.f32.xlu1 %v2338_v21 }
 0xab3   : > { %2583 = vrot.lane.b32.xlu1 %v5473_v35, %s4834_s30 }
 0xaf2   : > { %v2460_v22 = vpop.xlane.xlu0 %2459 }
 0xaf6   : > { %v2346_v26 = vpop.permute.xlu0 %2345 }
 0xaf7   : > { %v2351_v27 = vsel %vm1649_vm2, %v2346_v26, 0 }
 0xaf8   : > { %3978 = vmatpush3.bf16.msra.mxu1 %v2351_v27 }
 0xaf9   : > { %3989 = vmatprep.subr.bf16.mxu1 %v4830_v1 }
 0xafa   : > { %v2579_v28 = vpop.xlane.xlu1 %2578 }
 0xafe   : > { %v2465_v30 = vpop.permute.xlu1 %2464 }
 0xaff   : > { %v2470_v35 = vsel %vm1649_vm2, %v2465_v30, 0 }
 0xb2f   : > { %v2340_v31 = vpop.xlane.xlu1 %2339 }
 0xb30   : > { %4417 = vrcp.f32 %v2340_v31 }
 0xb31   : > { %4419 = vrcp.f32 %v2460_v22 }
 0xb32   : > { %4421 = vrcp.f32 %v2579_v28 }
 0xb33   : > { %v2584_v25 = vpop.permute.xlu1 %2583 }
 0xb34   : > { %v2589_v40 = vsel %vm1649_vm2, %v2584_v25, 0 }
 0xb3a   : > { %v4418_v36 = vpop.eup %4417 }
 0xb3b   : > { %v2342_v32 = vmul.f32 %v4418_v36, %v4416_v20  ;;  %v4420_v37 = vpop.eup %4419 }
 0xb3c   : > { %v2462_v41 = vmul.f32 %v4420_v37, %v4412_v13  ;;  %v4422_v48 = vpop.eup %4421 }
 0xb3d   : > { %v2343_v33 = vpack.c.bf16 %v2342_v32, %v2342_v32  ;;  %v2581_v42 = vmul.f32 %v4422_v48, %v4414_v14  ;;  %v4380_v14 = vld [vmem:[#allocation17 + $0x28] sm:$0xff]  }
 0xb3e   : > { %v2463_v9 = vpack.c.bf16 %v2462_v41, %v2462_v41  ;;  %4018 = vmatpush3.bf16.msra.mxu0 %v4380_v14 }
 0xb3f   : > { %3980 = vmatmul.mubr.msk.bf16.vlgmr.msra.gmra.mrb[52].mxu1 %vm1633_vm3, %v2343_v33  ;;  %v2582_v45 = vpack.c.bf16 %v2581_v42, %v2581_v42  ;;  %4019 = vmatprep.subr.bf16.mxu0 %v4830_v1  ;;  %v5632_v42 = vrot.slane %v5526_v51, %v5357_v24 }
 0xb40   : > { %3990 = vmatpush3.bf16.msra.mxu1 %v2470_v35  ;;  %3991 = vmatprep.mubr.msk.bf16.mxu1 %vm4831_vm0, %v4830_v1 }
 0xb41   : > { %4001 = vmatprep.subr.bf16.mxu1 %v4830_v1 }
 0xb42   : > { %4020 = vmatpush3.bf16.msra.mxu0 %v4381_v16 }
 0xb43   : > { %4021 = vmatprep.subr.bf16.mxu0 %v4830_v1 }
 0xb46   : > { %4022 = vmatpush3.bf16.msra.mxu0 %v4382_v19 }
 0xb47   : > { %3992 = vmatmul.mubr.msk.bf16.vlgmr.msra.gmra.mrb[56].mxu1 %vm1633_vm3, %v2463_v9  ;;  %4051 = vmatprep.subr.bf16.mxu0 %v4830_v1 }
 0xb48   : > { %4002 = vmatpush3.bf16.msra.mxu1 %v2589_v40  ;;  %4003 = vmatprep.mubr.msk.bf16.mxu1 %vm4831_vm0, %v4830_v1 }
 0xb49   : > { %4027 = vmatprep.subr.bf16.mxu1 %v4830_v1 }
 0xb4f   : > { %4004 = vmatmul.mubr.msk.bf16.vlgmr.msra.gmra.mrb[60].mxu1 %vm1633_vm3, %v2582_v45 }
 0xb50   : > { %4029 = vmatprep.mubr.msk.bf16.mxu1 %vm4831_vm0, %v4830_v1 }
 0xb51   : > { %4028 = vmatpush3.bf16.xpose.msra.mxu1 %v2756_v12 }
 0xb52   : > { %4033 = vmatprep.subr.bf16.mxu1 %v4830_v1 }
 0xb58   : > { %4030 = vmatmul.mubr.msk.bf16.vlgmr.msra.gmra.mrb[64].mxu1 %vm1585_vm1, %v2749_v10 }
 0xb59   : > { %4034 = vmatpush3.bf16.msra.mxu1 %v2815_v50  ;;  %4035 = vmatprep.mubr.msk.bf16.mxu1 %vm4831_vm0, %v4830_v1 }
 0xb5a   : > { %4039 = vmatprep.subr.bf16.mxu1 %v4830_v1 }
 0xc12   : > { %v2387_v52 = vpop.f32.mrb[52].mxu1 }
 0xc13   : > { %v3981_v58 = vpop.f32.mrb[53].mxu1  ;;  %v3694_v15 = vpack.c.bf16 %v2387_v52, %v2387_v52 }
 0xc14   : > { %v2390_v53 = vpop.f32.mrb[54].mxu1 }
 0xc15   : > { %v3982_v54 = vpop.f32.mrb[55].mxu1 }
 0xc1a   : > { %v2506_v56 = vpop.f32.mrb[56].mxu1 }
 0xc1b   : > { %v3695_v57 = vpack.c.bf16 %v2506_v56, %v2506_v56  ;;  %v3993_v59 = vpop.f32.mrb[57].mxu1 }
 0xc1c   : > { %v2509_v60 = vpop.f32.mrb[58].mxu1 }
 0xc1d   : > { %2516 = vrot.lane.b32.xlu1 %v3695_v57, %s4833_s22  ;;  %v3994_v61 = vpop.f32.mrb[59].mxu1 }
 0xc22   : > { %v2625_v62 = vpop.f32.mrb[60].mxu1 }
 0xc23   : > { %v4005_v63 = vpop.f32.mrb[61].mxu1  ;;  %v3696_v17 = vpack.c.bf16 %v2625_v62, %v2625_v62 }
 0xc24   : > { %v2628_v2 = vpop.f32.mrb[62].mxu1 }
 0xc25   : > { %v4006_v18 = vpop.f32.mrb[63].mxu1 }
 0xc2b   : > { %v2792_v3 = vpop.f32.mrb[64].mxu1 }
 0xc2c   : > { %v2798_v4 = vmul.f32 0.17677669, %v2792_v3  ;;  %v4031_v5 = vpop.f32.mrb[65].mxu1 }
 0xc2d   : > { %v2795_v6 = vpop.f32.mrb[66].mxu1 }
 0xc2e   : > { %v4032_v8 = vpop.f32.mrb[67].mxu1  ;;  %v2799_v13 = vsel %vm1633_vm3, %v2798_v4, -inf }
 0xc2f   : > { %2800 = vmax.xlane.f32.xlu0 %v2799_v13 }
 0xc45   : > { %2397 = vrot.lane.b32.xlu0 %v3694_v15, %s4834_s30 }
 0xc49   : > { %2635 = vrot.lane.b32.xlu0 %v3696_v17, %s4832_s21 }
 0xc4d   : > { %2860 = vrot.lane.b32.xlu0 %v2749_v10, %s4832_s21 }
 0xc51   : > { %2981 = vrot.lane.b32.xlu0 %v2749_v10, %s4833_s22 }
 0xc55   : > { %3100 = vrot.lane.b32.xlu0 %v2749_v10, %s4834_s30 }
 0xc8f   : > { %v2517_v27 = vpop.permute.xlu1 %2516 }
 0xcbc   : > { %v2801_v20 = vpop.xlane.xlu0 %2800 }
 0xcbd   : > { %v2802_v21 = vsub.f32 %v2798_v4, %v2801_v20 }
 0xcbf   : > { %v2803_v22 = vmul.f32 1.442695, %v2802_v21 }
 0xcc0   : > { %v2398_v26 = vpop.permute.xlu0 %2397 }
 0xcc1   : > { %4423 = vpow2.f32 %v2803_v22  ;;  %2400 = vst.msk [vmem:[#allocation2] sm:$0xf] %vm1817_vm5, %v2398_v26 }
 0xcc2   : > { %2519 = vst.msk [vmem:[#allocation2] sm:$0xf] %vm1937_vm6, %v2517_v27 }
 0xcc4   : > { %v2636_v28 = vpop.permute.xlu0 %2635 }
 0xcc5   : > { %2638 = vst.msk [vmem:[#allocation2] sm:$0xf] %vm2057_vm7, %v2636_v28 }
 0xcc8   : > { %v2861_v35 = vpop.permute.xlu0 %2860 }
 0xccb   : > { %v4424_v30 = vpop.eup %4423 }
 0xccc   : > { %v2805_v31 = vsel %vm1633_vm3, %v4424_v30, 0.0  ;;  %v2639_v36 = vld [vmem:[#allocation2] sm:$0xf]  ;;  %v2982_v9 = vpop.permute.xlu0 %2981 }
 0xccd   : > { %2806 = vadd.xlane.f32.xlu1 %v2805_v31  ;;  %4024 = vmatmul.mubr.bf16.vlgmr.msra.gmra.mrb[36].mxu0 %v2639_v36 }
 0xcce   : > { %4053 = vmatprep.mubr.msk.bf16.mxu0 %vm4831_vm0, %v4830_v1 }
 0xcd0   : > { %v3101_v0 = vpop.permute.xlu0 %3100 }
 0xcde   : > { %2863 = vrot.lane.b32.xlu1 %v5565_v44, %s4832_s21 }
 0xce2   : > { %2983 = vrot.lane.b32.xlu1 %v5565_v44, %s4833_s22 }
 0xce6   : > { %3102 = vrot.lane.b32.xlu1 %v5565_v44, %s4834_s30 }
 0xd5a   : > { %v2807_v32 = vpop.xlane.xlu1 %2806 }
 0xd5b   : > { %4425 = vrcp.f32 %v2807_v32 }
 0xd5e   : > { %v2864_v29 = vpop.permute.xlu1 %2863 }
 0xd5f   : > { %v2869_v48 = vsel %vm1585_vm1, %v2864_v29, 0 }
 0xd62   : > { %v2984_v33 = vpop.permute.xlu1 %2983 }
 0xd63   : > { %v2989_v37 = vsel %vm1585_vm1, %v2984_v33, 0 }
 0xd64   : > { %4052 = vmatpush3.bf16.xpose.msra.mxu0 %v2989_v37 }
 0xd65   : > { %v4426_v38 = vpop.eup %4425  ;;  %4063 = vmatprep.subr.bf16.mxu0 %v4830_v1 }
 0xd66   : > { %v2809_v41 = vmul.f32 %v4426_v38, %v4424_v30  ;;  %v3103_v39 = vpop.permute.xlu1 %3102 }
 0xd67   : > { %v3108_v40 = vsel %vm1585_vm1, %v3103_v39, 0 }
 0xd68   : > { %v2810_v25 = vpack.c.bf16 %v2809_v41, %v2809_v41 }
 0xd6a   : > { %4036 = vmatmul.mubr.msk.bf16.vlgmr.msra.gmra.mrb[68].mxu1 %vm1633_vm3, %v2810_v25 }
 0xd6b   : > { %4040 = vmatpush3.bf16.xpose.msra.mxu1 %v2869_v48  ;;  %4054 = vmatmul.mubr.msk.bf16.vlgmr.msra.gmra.mrb[40].mxu0 %vm1585_vm1, %v2982_v9 }
 0xd6c   : > { %4064 = vmatpush3.bf16.xpose.msra.mxu0 %v3108_v40  ;;  %4041 = vmatprep.mubr.msk.bf16.mxu1 %vm4831_vm0, %v4830_v1 }
 0xd6d   : > { %4065 = vmatprep.mubr.msk.bf16.mxu0 %vm4831_vm0, %v4830_v1  ;;  %4045 = vmatprep.subr.bf16.mxu1 %v4830_v1 }
 0xd6e   : > { %4075 = vmatprep.subr.bf16.mxu0 %v4830_v1 }
 0xd72   : > { %4042 = vmatmul.mubr.msk.bf16.vlgmr.msra.gmra.mrb[72].mxu1 %vm1585_vm1, %v2861_v35 }
 0xd73   : > { %4066 = vmatmul.mubr.msk.bf16.vlgmr.msra.gmra.mrb[44].mxu0 %vm1585_vm1, %v3101_v0  ;;  %4047 = vmatprep.mubr.msk.bf16.mxu1 %vm4831_vm0, %v4830_v1  ;;  %v4383_v0 = vld [vmem:[#allocation17] sm:$0xff]  }
 0xd74   : > { %4091 = vmatprep.mubr.msk.bf16.mxu0 %vm4831_vm0, %v4830_v1  ;;  %4076 = vmatpush3.bf16.msra.mxu0 %v4383_v0 }
 0xd75   : > { %4077 = vmatprep.subr.bf16.mxu0 %v4830_v1 }
 0xda0   : > { %v2742_v43 = vpop.f32.mrb[36].mxu0 }
 0xda1   : > { %v2743_v44 = vadd.f32 %v2742_v43, %v5632_v42  ;;  %v4025_v45 = vpop.f32.mrb[37].mxu0  ;;  %v4384_v43 = vld [vmem:[#allocation17 + $0x8] sm:$0xff]  }
 0xda2   : > { %v2745_v46 = vpop.f32.mrb[38].mxu0  ;;  %4078 = vmatpush3.bf16.msra.mxu0 %v4384_v43  ;;  %v4386_v45 = vld [vmem:[#allocation17 + $0x18] sm:$0xff]  }
 0xda3   : > { %2748 = vst [vmem:[%s5531_s6 + $0x8] sm:$0xff] %v2743_v44  ;;  %v4026_v12 = vpop.f32.mrb[39].mxu0  ;;  %4079 = vmatprep.subr.bf16.mxu0 %v4830_v1  ;;  %v4385_v44 = vld [vmem:[#allocation17 + $0x10] sm:$0xff]   ;;  %v4387_v46 = vld [vmem:[#allocation17 + $0x20] sm:$0xff]  }
 0xda6   : > { %4080 = vmatpush3.bf16.msra.mxu0 %v4385_v44 }
 0xda7   : > { %4081 = vmatprep.subr.bf16.mxu0 %v4830_v1 }
 0xdaa   : > { %4082 = vmatpush3.bf16.msra.mxu0 %v4386_v45 }
 0xdab   : > { %4083 = vmatprep.subr.bf16.mxu0 %v4830_v1 }
 0xdae   : > { %4084 = vmatpush3.bf16.msra.mxu0 %v4387_v46 }
 0xdaf   : > { %4085 = vmatprep.subr.bf16.mxu0 %v4830_v1 }
 0xe3d   : > { %v2851_v47 = vpop.f32.mrb[68].mxu1 }
 0xe3e   : > { %v2857_v10 = vpack.c.bf16 %v2851_v47, %v2851_v47  ;;  %v4037_v50 = vpop.f32.mrb[69].mxu1  ;;  %v3025_v49 = vpop.f32.mrb[40].mxu0  ;;  %v4388_v47 = vld [vmem:[#allocation17 + $0x28] sm:$0xff]  }
 0xe3f   : > { %v3031_v7 = vmul.f32 0.17677669, %v3025_v49  ;;  %v2854_v52 = vpop.f32.mrb[70].mxu1  ;;  %v4055_v58 = vpop.f32.mrb[41].mxu0  ;;  %4086 = vmatpush3.bf16.msra.mxu0 %v4388_v47 }
 0xe40   : > { %2858 = vst.msk [vmem:[#allocation2] sm:$0xf] %vm1694_vm4, %v2857_v10  ;;  %v4038_v53 = vpop.f32.mrb[71].mxu1  ;;  %v3028_v54 = vpop.f32.mrb[42].mxu0  ;;  %4087 = vmatprep.subr.bf16.mxu0 %v4830_v1  ;;  %v4389_v52 = vld [vmem:[#allocation17 + $0x30] sm:$0xff]  }
 0xe41   : > { %v4056_v24 = vpop.f32.mrb[43].mxu0  ;;  %v3032_v51 = vsel %vm1633_vm3, %v3031_v7, -inf  ;;  %v4390_v53 = vld [vmem:[#allocation17 + $0x38] sm:$0xff]  }
 0xe42   : > { %3033 = vmax.xlane.f32.xlu0 %v3032_v51 }
 0xe43   : > { %4088 = vmatpush3.bf16.msra.mxu0 %v4389_v52 }
 0xe44   : > { %4089 = vmatprep.subr.bf16.mxu0 %v4830_v1 }
 0xe45   : > { %v2905_v55 = vpop.f32.mrb[72].mxu1 }
 0xe46   : > { %v2911_v23 = vmul.f32 0.17677669, %v2905_v55  ;;  %v4043_v56 = vpop.f32.mrb[73].mxu1  ;;  %v3144_v57 = vpop.f32.mrb[44].mxu0 }
 0xe47   : > { %v3150_v59 = vmul.f32 0.17677669, %v3144_v57  ;;  %v2908_v60 = vpop.f32.mrb[74].mxu1  ;;  %v4067_v61 = vpop.f32.mrb[45].mxu0  ;;  %4090 = vmatpush3.bf16.msra.mxu0 %v4390_v53 }
 0xe48   : > { %v4044_v62 = vpop.f32.mrb[75].mxu1  ;;  %v3147_v63 = vpop.f32.mrb[46].mxu0  ;;  %v2912_v2 = vsel %vm1633_vm3, %v2911_v23, -inf }
 0xe49   : > { %v4068_v18 = vpop.f32.mrb[47].mxu0  ;;  %2913 = vmax.xlane.f32.xlu1 %v2912_v2  ;;  %v3151_v3 = vsel %vm1633_vm3, %v3150_v59, -inf }
 0xe4a   : > { %3152 = vmax.xlane.f32.xlu0 %v3151_v3 }
 0xecf   : > { %v3034_v4 = vpop.xlane.xlu0 %3033 }
 0xed0   : > { %v3035_v5 = vsub.f32 %v3031_v7, %v3034_v4 }
 0xed2   : > { %v3036_v6 = vmul.f32 1.442695, %v3035_v5 }
 0xed4   : > { %4427 = vpow2.f32 %v3036_v6 }
 0xed6   : > { %v2914_v8 = vpop.xlane.xlu1 %2913 }
 0xed7   : > { %v2915_v13 = vsub.f32 %v2911_v23, %v2914_v8  ;;  %v3153_v34 = vpop.xlane.xlu0 %3152 }
 0xed8   : > { %v3154_v14 = vsub.f32 %v3150_v59, %v3153_v34 }
 0xed9   : > { %v2916_v15 = vmul.f32 1.442695, %v2915_v13 }
 0xeda   : > { %v3155_v16 = vmul.f32 1.442695, %v3154_v14 }
 0xedc   : > { %4429 = vpow2.f32 %v3155_v16 }
 0xedd   : > { %4431 = vpow2.f32 %v2916_v15 }
 0xede   : > { %v4428_v17 = vpop.eup %4427 }
 0xedf   : > { %v3038_v19 = vsel %vm1633_vm3, %v4428_v17, 0.0 }
 0xee0   : > { %3039 = vadd.xlane.f32.xlu0 %v3038_v19 }
 0xee6   : > { %v4430_v20 = vpop.eup %4429 }
 0xee7   : > { %v3157_v21 = vsel %vm1633_vm3, %v4430_v20, 0.0  ;;  %v4432_v22 = vpop.eup %4431 }
 0xee8   : > { %3158 = vadd.xlane.f32.xlu1 %v3157_v21  ;;  %v2918_v26 = vsel %vm1633_vm3, %v4432_v22, 0.0 }
 0xeec   : > { %2919 = vadd.xlane.f32.xlu1 %v2918_v26 }
 0xef6   : > { %2925 = vrot.lane.b32.xlu0 %v5577_v11, %s4832_s21 }
 0xefd   : > { %3044 = vrot.lane.b32.xlu1 %v5577_v11, %s4833_s22 }
 0xf01   : > { %3163 = vrot.lane.b32.xlu1 %v5577_v11, %s4834_s30 }
 0xf6d   : > { %v3040_v27 = vpop.xlane.xlu0 %3039 }
 0xf71   : > { %v2926_v28 = vpop.permute.xlu0 %2925 }
 0xf72   : > { %v2931_v30 = vsel %vm1649_vm2, %v2926_v28, 0 }
 0xf73   : > { %4046 = vmatpush3.bf16.msra.mxu1 %v2931_v30 }
 0xf74   : > { %4057 = vmatprep.subr.bf16.mxu1 %v4830_v1 }
 0xf75   : > { %v3159_v31 = vpop.xlane.xlu1 %3158 }
 0xf79   : > { %v2920_v36 = vpop.xlane.xlu1 %2919 }
 0xf7a   : > { %4433 = vrcp.f32 %v2920_v36 }
 0xf7b   : > { %4435 = vrcp.f32 %v3040_v27 }
 0xf7c   : > { %4437 = vrcp.f32 %v3159_v31 }
 0xf7d   : > { %v3045_v33 = vpop.permute.xlu1 %3044 }
 0xf7e   : > { %v3050_v38 = vsel %vm1649_vm2, %v3045_v33, 0 }
 0xf81   : > { %v3164_v41 = vpop.permute.xlu1 %3163 }
 0xf82   : > { %v3169_v9 = vsel %vm1649_vm2, %v3164_v41, 0 }
 0xf84   : > { %v4434_v32 = vpop.eup %4433 }
 0xf85   : > { %v2922_v29 = vmul.f32 %v4434_v32, %v4432_v22  ;;  %v4436_v35 = vpop.eup %4435 }
 0xf86   : > { %v3042_v11 = vmul.f32 %v4436_v35, %v4428_v17  ;;  %v4438_v25 = vpop.eup %4437 }
 0xf87   : > { %v2923_v37 = vpack.c.bf16 %v2922_v29, %v2922_v29  ;;  %v3161_v48 = vmul.f32 %v4438_v25, %v4430_v20 }
 0xf88   : > { %v3043_v39 = vpack.c.bf16 %v3042_v11, %v3042_v11 }
 0xf89   : > { %4048 = vmatmul.mubr.msk.bf16.vlgmr.msra.gmra.mrb[76].mxu1 %vm1633_vm3, %v2923_v37  ;;  %v3162_v40 = vpack.c.bf16 %v3161_v48, %v3161_v48 }
 0xf8a   : > { %4058 = vmatpush3.bf16.msra.mxu1 %v3050_v38  ;;  %4059 = vmatprep.mubr.msk.bf16.mxu1 %vm4831_vm0, %v4830_v1 }
 0xf8b   : > { %4069 = vmatprep.subr.bf16.mxu1 %v4830_v1 }
 0xf91   : > { %4060 = vmatmul.mubr.msk.bf16.vlgmr.msra.gmra.mrb[80].mxu1 %vm1633_vm3, %v3043_v39 }
 0xf92   : > { %4070 = vmatpush3.bf16.msra.mxu1 %v3169_v9  ;;  %4071 = vmatprep.mubr.msk.bf16.mxu1 %vm4831_vm0, %v4830_v1 }
 0xf99   : > { %4072 = vmatmul.mubr.msk.bf16.vlgmr.msra.gmra.mrb[84].mxu1 %vm1633_vm3, %v3162_v40 }
0x105c   : > { %v2967_v12 = vpop.f32.mrb[76].mxu1 }
0x105d   : > { %v3697_v10 = vpack.c.bf16 %v2967_v12, %v2967_v12  ;;  %v4049_v50 = vpop.f32.mrb[77].mxu1 }
0x105e   : > { %v2970_v49 = vpop.f32.mrb[78].mxu1 }
0x105f   : > { %2977 = vrot.lane.b32.xlu0 %v3697_v10, %s4834_s30  ;;  %v4050_v7 = vpop.f32.mrb[79].mxu1 }
0x1064   : > { %v3086_v58 = vpop.f32.mrb[80].mxu1 }
0x1065   : > { %v3698_v54 = vpack.c.bf16 %v3086_v58, %v3086_v58  ;;  %v4061_v24 = vpop.f32.mrb[81].mxu1 }
0x1066   : > { %v3089_v51 = vpop.f32.mrb[82].mxu1 }
0x1067   : > { %3096 = vrot.lane.b32.xlu1 %v3698_v54, %s4833_s22  ;;  %v4062_v55 = vpop.f32.mrb[83].mxu1 }
0x106c   : > { %v3205_v23 = vpop.f32.mrb[84].mxu1 }
0x106d   : > { %v3699_v56 = vpack.c.bf16 %v3205_v23, %v3205_v23  ;;  %v4073_v57 = vpop.f32.mrb[85].mxu1 }
0x106e   : > { %v3208_v59 = vpop.f32.mrb[86].mxu1 }
0x106f   : > { %3215 = vrot.lane.b32.xlu0 %v3699_v56, %s4832_s21  ;;  %v4074_v60 = vpop.f32.mrb[87].mxu1 }
0x10d1   : > { %v2978_v61 = vpop.permute.xlu0 %2977 }
0x10d2   : > { %2980 = vst.msk [vmem:[#allocation2] sm:$0xf] %vm1817_vm5, %v2978_v61 }
0x10d9   : > { %v3097_v62 = vpop.permute.xlu1 %3096 }
0x10da   : > { %3099 = vst.msk [vmem:[#allocation2] sm:$0xf] %vm1937_vm6, %v3097_v62 }
0x10e1   : > { %v3216_v1 = vpop.permute.xlu0 %3215 }
0x10e2   : > { %3218 = vst.msk [vmem:[#allocation2] sm:$0xf] %vm2057_vm7, %v3216_v1 }
0x10e9   : > { %v3219_v63 = vld [vmem:[#allocation2] sm:$0xf] }
0x10ea   : > { %4092 = vmatmul.mubr.bf16.vlgmr.msra.gmra.mrb[48].mxu0 %v3219_v63 }
0x11bd   : > { %v3318_v2 = vpop.f32.mrb[48].mxu0 }
0x11be   : > { %v3319_v18 = vadd.f32 %v3318_v2, %v5632_v42  ;;  %v4093_v3 = vpop.f32.mrb[49].mxu0 }
0x11bf   : > { %v3321_v4 = vpop.f32.mrb[50].mxu0 }
0x11c0   : > { %3324 = vst [vmem:[%s5531_s6 + $0x10] sm:$0xff] %v3319_v18  ;;  %v4094_v5 = vpop.f32.mrb[51].mxu0 }
0x11c1   : > { %4736 = shalt.err (!%p4733_p12)
}
0x11c2   : > { %s4737_s4 = scalar_lea.hbm %s5680_s18, 384  ;;  %s4741_s22 = scalar_lea.hbm %s5782_s10, 768 }
0x11c3   : > { %p4738_p1 = scmp.ne.s32.totalorder %s5680_s18, %s4737_s4  ;;  %p4742_p2 = scmp.lt.u32.totalorder %s5680_s18, %s5782_s10 }
0x11c4   : > { %p4743_p4 = scmp.lt.u32.totalorder %s4741_s22, %s4737_s4  ;;  %p4745_p5 = scmp.lt.u32.totalorder %s4737_s4, %s5680_s18 }
0x11c5   : > { %p4739_p13 = pnand %p4738_p1, %p5783_p7 }
0x11c6   : > { %p4744_p10 = por %p4743_p4, %p4742_p2 }
0x11c7   : > { %p4740_p0 = pneg %p4739_p13 }
0x11c8   : > { %p4746_p3 = por %p4745_p5, %p4744_p10 }
0x11ca   : > { %p4747_p6 = pnand %p4746_p3, %p4740_p0 }
0x11cc   : > { %4750 = shalt.err (!%p4747_p6)
}
0x11cd   : > { %4133 = dma.vmem_to_hbm [thread:$0]  (%p5783_p7), %s5682_s28, 384, %s5680_s18, %s3326_s2  }
0x11ce PF: > { %s3352_s6 = sand.u32 1, %s4801_s13   ;;  %p5784_p11 = scmp.ne.s32.totalorder %s5767_s27, 0 }
0x11cf   : > { %p5785_p8 = scmp.ge.s32.totalorder %s4813_s16, 2  ;;  %s3353_s3 = scalar_lea.sflag [#allocation5], %s3352_s6 }
0x11d1   : > { %p4168_p9 = pnand %p5785_p8, %p5784_p11 }
0x11d3   : > { %4796 = dma.done.wait (!%p4168_p9), %s3353_s3, 384  }
0x11d4   : > { %4798 = vsyncadd (!%p4168_p9), %s3353_s3, 4294966912  ;;  %p30_p12 = scmp.ge.s32.totalorder %s5135_s11, 4   ;;  %s5786_s13 = smov %s4805_s14 }
0x11d5   : > { %s5787_s14 = smov %s4809_s15  ;;  %s5788_s15 = smov %s5146_s12 }
0x11d6   : > { %s5789_s16 = smov %s5135_s11  ;;  %32 = sbr.rel (!%p30_p12) target bundleno = 18 (0x12), region = 150 }
0x11dd   :  { %3358 = vsyncpa [#allocation4], 1 }
0x11de   :  { %3360 = vsyncpa [#allocation4 + $0x1], 1 }
0x11df   :  { %3361 = vsyncpa [#allocation7], 1 }
0x11e0   :  { %3363 = vsyncpa [#allocation7 + $0x1], 1 }
0x11e1   :  { %3364 = vsyncpa [#allocation10], 1 }
0x11e2   :  { %3365 = vsyncpa [#allocation13], 1 }
0x11e3   :  { %3366 = vsyncpa [#allocation16], 1 }
0x11e4   :  { %3367 = vsyncpa [#allocation19], 1 }
0x11e5   :  { %3368 = vsyncpa [#allocation5], 1 }
0x11e6   :  { %3370 = vsyncpa [#allocation5 + $0x1], 1 }

</bundles_post_ra>
